<compile_context>
chip_gen: v5e
topology: v5e:2x2
jax: 0.10.0
libtpu: 0.0.40
codegen_flags: <defaults>
</compile_context>

<pallas_src>
import jax
import jax.numpy as jnp
from jax.experimental import pallas as pl
from jax.experimental.pallas import tpu as pltpu

EPS = 1e-5      # BatchNorm2d default eps
_PADL = 8       # left column pad in staging buffers -> 8-aligned sublane writes


# --------------------------------------------------------------------------
# Stage 1: ConvTranspose2d(k=2, s=2) == flattened per-pixel matmul
# --------------------------------------------------------------------------
def _matmul_bias_kernel(x_ref, w_ref, b_ref, o_ref):
    acc = jnp.dot(x_ref[...], w_ref[...], preferred_element_type=jnp.float32)
    o_ref[...] = (acc + b_ref[...]).astype(o_ref.dtype)


def _rowtile_matmul_bias(x2d, w, b, *, tm=256, out_dtype=jnp.bfloat16):
    """(M, K) @ (K, N) + (1, N), tiled over M rows with a parallel grid."""
    M, K = x2d.shape
    N = w.shape[1]
    tm = max(8, (min(tm, M) // 8) * 8)
    Mp = pl.cdiv(M, tm) * tm
    if Mp != M:
        x2d = jnp.pad(x2d, ((0, Mp - M), (0, 0)))
    out = pl.pallas_call(
        _matmul_bias_kernel,
        out_shape=jax.ShapeDtypeStruct((Mp, N), out_dtype),
        grid=(Mp // tm,),
        in_specs=[pl.BlockSpec((tm, K), lambda i: (i, 0)),
                  pl.BlockSpec((K, N), lambda i: (0, 0)),
                  pl.BlockSpec((1, N), lambda i: (0, 0))],
        out_specs=pl.BlockSpec((tm, N), lambda i: (i, 0)),
        compiler_params=pltpu.CompilerParams(
            dimension_semantics=("parallel",)),
    )(x2d, w, b)
    return out[:M] if Mp != M else out


# --------------------------------------------------------------------------
# Stage 2: fused [concat -> conv3x3 + ReLU + BN -> conv3x3 + ReLU + BN]
# --------------------------------------------------------------------------
def _conv_block_kernel(up_ref, br_ref,
                       w1_ref, b1_ref, bn1s_ref, bn1t_ref,
                       w2_ref, b2_ref, bn2s_ref, bn2t_ref,
                       o_ref, pc_ref, p1_ref):
    Hs, Ws = up_ref.shape[1], up_ref.shape[2]
    c_up = up_ref.shape[3]
    c_mid = w1_ref.shape[2]
    c_out = w2_ref.shape[2]
    PL = _PADL

    # Zero-padded staging buffers: the zero border implements conv padding=1.
    # f32 staging + 8-aligned column offsets keep all stores on full sublane
    # tiles; operands are cast to bf16 right before each MXU dot.
    pc_ref[...] = jnp.zeros_like(pc_ref)
    p1_ref[...] = jnp.zeros_like(p1_ref)

    # Channel concat [up, bridge] materialized once into the staging buffer,
    # so conv1 runs with the full concatenated contraction dim (9 matmuls,
    # not 18).
    pc_ref[1:Hs + 1, PL:PL + Ws, :c_up] = up_ref[0].astype(jnp.float32)
    pc_ref[1:Hs + 1, PL:PL + Ws, c_up:] = br_ref[0].astype(jnp.float32)

    # conv1: 9 shifted-window matmuls, accumulated in f32 on the MXU.
    acc = jnp.zeros((Hs * Ws, c_mid), jnp.float32)
    for k in range(9):
        dy, dx = k // 3, k % 3
        c0 = PL - 1 + dx
        win = pc_ref[dy:dy + Hs, c0:c0 + Ws, :]
        acc = acc + jnp.dot(win.reshape(Hs * Ws, -1).astype(jnp.bfloat16),
                            w1_ref[k], preferred_element_type=jnp.float32)
    h = jnp.maximum(acc + b1_ref[...], 0.0)           # Conv bias + ReLU
    h = h * bn1s_ref[...] + bn1t_ref[...]             # BatchNorm2d (eval), after ReLU

    # stage the conv1 output for conv2 (again with a zero border)
    p1_ref[1:Hs + 1, PL:PL + Ws, :] = h.reshape(Hs, Ws, c_mid)

    # conv2
    acc = jnp.zeros((Hs * Ws, c_out), jnp.float32)
    for k in range(9):
        dy, dx = k // 3, k % 3
        c0 = PL - 1 + dx
        win = p1_ref[dy:dy + Hs, c0:c0 + Ws, :]
        acc = acc + jnp.dot(win.reshape(Hs * Ws, -1).astype(jnp.bfloat16),
                            w2_ref[k], preferred_element_type=jnp.float32)
    h = jnp.maximum(acc + b2_ref[...], 0.0)
    h = h * bn2s_ref[...] + bn2t_ref[...]
    o_ref[0] = h.reshape(Hs, Ws, c_out).astype(o_ref.dtype)


# --------------------------------------------------------------------------
# Wrapper
# --------------------------------------------------------------------------
def unet_up_block_forward(x, bridge, p):
    """x: (B, in_size+add_in_size, H, W), bridge: (B, in_size-out_size, Hb, Wb).
    Returns (B, out_size, 2H, 2W), matching UNetUpBlock('upconv', padding=True,
    batch_norm=True) in eval mode."""
    B, c_in, H, W = x.shape
    c_up = p["w_up"].shape[1]           # out_size
    c_br = bridge.shape[1]
    c_cat = c_up + c_br
    Hs, Ws = 2 * H, 2 * W
    c_mid = p["w1"].shape[0]
    c_out = p["w2"].shape[0]

    # ---- stage 1: ConvTranspose2d(k=2, s=2) as a flattened per-pixel matmul ----
    xr = jnp.transpose(x, (0, 2, 3, 1)).astype(jnp.bfloat16).reshape(B * H * W, c_in)
    w_up = jnp.transpose(p["w_up"], (0, 2, 3, 1)).reshape(c_in, 4 * c_up).astype(jnp.bfloat16)
    b_up = jnp.tile(p["b_up"], 4).reshape(1, 4 * c_up).astype(jnp.float32)
    y = _rowtile_matmul_bias(xr, w_up, b_up)                         # (B*H*W, 4*c_up) bf16
    up = jnp.transpose(y.reshape(B, H, W, 2, 2, c_up),
                       (0, 1, 3, 2, 4, 5)).reshape(B, Hs, Ws, c_up)  # depth-to-space (layout only)

    # ---- center crop of the bridge (static slice, layout only) ----
    Hb, Wb = bridge.shape[2], bridge.shape[3]
    oy, ox = (Hb - Hs) // 2, (Wb - Ws) // 2
    br = jnp.transpose(bridge, (0, 2, 3, 1)).astype(jnp.bfloat16)[:, oy:oy + Hs, ox:ox + Ws, :]

    # ---- stage 2 parameters (torch layouts -> (tap, Cin, Cout) bf16) ----
    # w1 contraction dim keeps torch's [up, bridge] channel order, matching the
    # staging-buffer concat layout.
    w1 = jnp.transpose(p["w1"], (2, 3, 1, 0)).reshape(9, c_cat, c_mid).astype(jnp.bfloat16)
    b1 = p["b1"].reshape(1, c_mid).astype(jnp.float32)
    g1, be1, m1, v1 = p["bn1"]
    bn1s = (g1 / jnp.sqrt(v1 + EPS)).reshape(1, c_mid).astype(jnp.float32)
    bn1t = (be1 - m1 * g1 / jnp.sqrt(v1 + EPS)).reshape(1, c_mid).astype(jnp.float32)
    w2 = jnp.transpose(p["w2"], (2, 3, 1, 0)).reshape(9, c_mid, c_out).astype(jnp.bfloat16)
    b2 = p["b2"].reshape(1, c_out).astype(jnp.float32)
    g2, be2, m2, v2 = p["bn2"]
    bn2s = (g2 / jnp.sqrt(v2 + EPS)).reshape(1, c_out).astype(jnp.float32)
    bn2t = (be2 - m2 * g2 / jnp.sqrt(v2 + EPS)).reshape(1, c_out).astype(jnp.float32)

    out = pl.pallas_call(
        _conv_block_kernel,
        out_shape=jax.ShapeDtypeStruct((B, Hs, Ws, c_out), jnp.float32),
        grid=(B,),
        in_specs=[
            pl.BlockSpec((1, Hs, Ws, c_up), lambda b: (b, 0, 0, 0)),
            pl.BlockSpec((1, Hs, Ws, c_br), lambda b: (b, 0, 0, 0)),
            pl.BlockSpec((9, c_cat, c_mid), lambda b: (0, 0, 0)),
            pl.BlockSpec((1, c_mid), lambda b: (0, 0)),
            pl.BlockSpec((1, c_mid), lambda b: (0, 0)),
            pl.BlockSpec((1, c_mid), lambda b: (0, 0)),
            pl.BlockSpec((9, c_mid, c_out), lambda b: (0, 0, 0)),
            pl.BlockSpec((1, c_out), lambda b: (0, 0)),
            pl.BlockSpec((1, c_out), lambda b: (0, 0)),
            pl.BlockSpec((1, c_out), lambda b: (0, 0)),
        ],
        out_specs=pl.BlockSpec((1, Hs, Ws, c_out), lambda b: (b, 0, 0, 0)),
        scratch_shapes=[
            pltpu.VMEM((Hs + 2, Ws + 2 * _PADL, c_cat), jnp.float32),
            pltpu.VMEM((Hs + 2, Ws + 2 * _PADL, c_mid), jnp.float32),
        ],
        compiler_params=pltpu.CompilerParams(
            dimension_semantics=("parallel",)),
    )(up, br, w1, b1, bn1s, bn1t, w2, b2, bn2s, bn2t)

    return jnp.transpose(out, (0, 3, 1, 2))   # back to NCHW like PyTorch


# --------------------------------------------------------------------------
# Deterministic synthetic params (PyTorch layouts) and a pure-JAX reference
# --------------------------------------------------------------------------
def init_params(key, c_up_in, out_size, c_bridge):
    ks = jax.random.split(key, 14)
    c1_in = out_size + c_bridge

    def bn(k0, k1, k2, k3, c):
        return (1.0 + 0.1 * jax.random.normal(k0, (c,), jnp.float32),    # gamma
                0.1 * jax.random.normal(k1, (c,), jnp.float32),          # beta
                0.1 * jax.random.normal(k2, (c,), jnp.float32),          # running mean
                jnp.abs(jax.random.normal(k3, (c,), jnp.float32)) + 0.5)  # running var

    return {
        "w_up": 0.1 * jax.random.normal(ks[0], (c_up_in, out_size, 2, 2), jnp.float32),
        "b_up": 0.1 * jax.random.normal(ks[1], (out_size,), jnp.float32),
        "w1": 0.1 * jax.random.normal(ks[2], (out_size, c1_in, 3, 3), jnp.float32),
        "b1": 0.1 * jax.random.normal(ks[3], (out_size,), jnp.float32),
        "bn1": bn(ks[4], ks[5], ks[6], ks[7], out_size),
        "w2": 0.1 * jax.random.normal(ks[8], (out_size, out_size, 3, 3), jnp.float32),
        "b2": 0.1 * jax.random.normal(ks[9], (out_size,), jnp.float32),
        "bn2": bn(ks[10], ks[11], ks[12], ks[13], out_size),
    }


def ref_forward(x, bridge, p):
    """Pure-JAX reference with the same bf16-operand / f32-accumulate policy."""
    B, c_in, H, W = x.shape
    c_up = p["w_up"].shape[1]
    Hs, Ws = 2 * H, 2 * W

    # ConvTranspose2d(k=2, s=2)
    xr = jnp.transpose(x, (0, 2, 3, 1)).astype(jnp.bfloat16).reshape(B * H * W, c_in)
    w_up = jnp.transpose(p["w_up"], (0, 2, 3, 1)).reshape(c_in, 4 * c_up).astype(jnp.bfloat16)
    y = jnp.dot(xr, w_up, preferred_element_type=jnp.float32) + jnp.tile(p["b_up"], 4)[None, :]
    up = jnp.transpose(y.reshape(B, H, W, 2, 2, c_up),
                       (0, 1, 3, 2, 4, 5)).reshape(B, Hs, Ws, c_up).astype(jnp.bfloat16)

    # center crop + channel concat
    Hb, Wb = bridge.shape[2], bridge.shape[3]
    oy, ox = (Hb - Hs) // 2, (Wb - Ws) // 2
    br = jnp.transpose(bridge, (0, 2, 3, 1))[:, oy:oy + Hs, ox:ox + Ws, :].astype(jnp.bfloat16)
    h = jnp.concatenate([up, br], axis=-1)

    def conv_relu_bn(h, w, b, bn_params):
        wk = jnp.transpose(w, (2, 3, 1, 0)).astype(jnp.bfloat16)     # HWIO
        z = jax.lax.conv_general_dilated(
            h.astype(jnp.bfloat16), wk, window_strides=(1, 1), padding="SAME",
            dimension_numbers=("NHWC", "HWIO", "NHWC"),
            preferred_element_type=jnp.float32) + b[None, None, None, :]
        a = jnp.maximum(z, 0.0)
        g, be, m, v = bn_params
        s = g / jnp.sqrt(v + EPS)
        return a * s + (be - m * s)

    h = conv_relu_bn(h, p["w1"], p["b1"], p["bn1"])
    h = conv_relu_bn(h, p["w2"], p["b2"], p["bn2"])
    return jnp.transpose(h, (0, 3, 1, 2))


if __name__ == "__main__":
    # UNetUpBlock(in_size=48, add_in_size=16, out_size=32,
    #             up_mode='upconv', padding=True, batch_norm=True)
    B = 2
    in_size, add_in_size, out_size = 48, 16, 32
    H = W = 8                  # x spatial; up-convolved output is 16x16
    Hb = Wb = 20               # bridge spatial; center-cropped to 16x16

    key = jax.random.PRNGKey(0)
    kx, kb, kp = jax.random.split(key, 3)
    x = jax.random.normal(kx, (B, in_size + add_in_size, H, W), jnp.float32)
    bridge = jax.random.normal(kb, (B, in_size - out_size, Hb, Wb), jnp.float32)
    params = init_params(kp, in_size + add_in_size, out_size, in_size - out_size)

    out = jax.jit(unet_up_block_forward)(x, bridge, params)
    out = jax.block_until_ready(out)

    ref = ref_forward(x, bridge, params)
    assert out.shape == (B, out_size, 2 * H, 2 * W), out.shape
    assert jnp.allclose(out, ref, atol=2e-2, rtol=2e-2), (
        "mismatch vs reference, max abs err = %f" % float(jnp.max(jnp.abs(out - ref))))

    print("KERNEL_OK")
</pallas_src>

<mosaic_0001>
module attributes {stable_mosaic.version = 11 : i64} {
  func.func @_matmul_bias_kernel(%arg0: i32, %arg1: memref<128x64xbf16, #tpu.memory_space<vmem>>, %arg2: memref<64x128xbf16, #tpu.memory_space<vmem>>, %arg3: memref<1x128xf32, #tpu.memory_space<vmem>>, %arg4: memref<128x128xbf16, #tpu.memory_space<vmem>>) attributes {dimension_semantics = [#tpu.dimension_semantics<parallel>], iteration_bounds = array<i64: 1>, scalar_prefetch = 0 : i64, scratch_operands = 0 : i64, tpu.core_type = #tpu.core_type<tc>, window_params = [{transform_indices = @transform_0, window_bounds = array<i64: 128, 64>}, {pipeline_mode = #tpu.pipeline_mode<synchronous>, transform_indices = @transform_1, window_bounds = array<i64: 64, 128>}, {pipeline_mode = #tpu.pipeline_mode<synchronous>, transform_indices = @transform_2, window_bounds = array<i64: 1, 128>}, {transform_indices = @transform_3, window_bounds = array<i64: 128, 128>}]} {
    %c0 = arith.constant 0 : index
    %c0_0 = arith.constant 0 : index
    %0 = vector.load %arg1[%c0, %c0_0] : memref<128x64xbf16, #tpu.memory_space<vmem>>, vector<128x64xbf16>
    %c0_1 = arith.constant 0 : index
    %c0_2 = arith.constant 0 : index
    %1 = vector.load %arg2[%c0_1, %c0_2] : memref<64x128xbf16, #tpu.memory_space<vmem>>, vector<64x128xbf16>
    %cst = arith.constant dense<0.000000e+00> : vector<128x128xf32>
    %2 = tpu.matmul %0, %1, %cst {dimension_numbers = #tpu.dot_dimension_numbers<[1], [0], [0], [1], [0, 0, 1, 1], [], []>} : vector<128x64xbf16>, vector<64x128xbf16>, vector<128x128xf32> -> vector<128x128xf32>
    %c0_3 = arith.constant 0 : index
    %c0_4 = arith.constant 0 : index
    %3 = vector.load %arg3[%c0_3, %c0_4] : memref<1x128xf32, #tpu.memory_space<vmem>>, vector<1x128xf32>
    %4 = vector.broadcast %3 : vector<1x128xf32> to vector<128x128xf32>
    %5 = arith.addf %2, %4 : vector<128x128xf32>
    %6 = arith.truncf %5 : vector<128x128xf32> to vector<128x128xbf16>
    %c0_5 = arith.constant 0 : index
    %c0_6 = arith.constant 0 : index
    %7 = vector.load %arg4[%c0_5, %c0_6] : memref<128x128xbf16, #tpu.memory_space<vmem>>, vector<128x128xbf16>
    tpu.vector_store %arg4[%c0_5, %c0_6], %6 {strides = array<i32>} : memref<128x128xbf16, #tpu.memory_space<vmem>>, vector<128x128xbf16>,
    return
  }
  func.func @transform_0(%arg0: i32) -> (i32, i32) {
    %c0_i32 = arith.constant 0 : i32
    %c0_i32_0 = arith.constant 0 : i32
    return %arg0, %c0_i32 : i32, i32
  }
  func.func @transform_1(%arg0: i32) -> (i32, i32) {
    %c0_i32 = arith.constant 0 : i32
    %c0_i32_0 = arith.constant 0 : i32
    %c0_i32_1 = arith.constant 0 : i32
    return %c0_i32, %c0_i32_0 : i32, i32
  }
  func.func @transform_2(%arg0: i32) -> (i32, i32) {
    %c0_i32 = arith.constant 0 : i32
    %c0_i32_0 = arith.constant 0 : i32
    %c0_i32_1 = arith.constant 0 : i32
    return %c0_i32, %c0_i32_0 : i32, i32
  }
  func.func @transform_3(%arg0: i32) -> (i32, i32) {
    %c0_i32 = arith.constant 0 : i32
    %c0_i32_0 = arith.constant 0 : i32
    return %arg0, %c0_i32 : i32, i32
  }
}

module attributes {stable_mosaic.version = 11 : i64} {
  func.func @_conv_block_kernel(%arg0: i32, %arg1: memref<1x16x16x32xbf16, #tpu.memory_space<vmem>>, %arg2: memref<1x16x16x16xbf16, #tpu.memory_space<vmem>>, %arg3: memref<9x48x32xbf16, #tpu.memory_space<vmem>>, %arg4: memref<1x32xf32, #tpu.memory_space<vmem>>, %arg5: memref<1x32xf32, #tpu.memory_space<vmem>>, %arg6: memref<1x32xf32, #tpu.memory_space<vmem>>, %arg7: memref<9x32x32xbf16, #tpu.memory_space<vmem>>, %arg8: memref<1x32xf32, #tpu.memory_space<vmem>>, %arg9: memref<1x32xf32, #tpu.memory_space<vmem>>, %arg10: memref<1x32xf32, #tpu.memory_space<vmem>>, %arg11: memref<1x16x16x32xf32, #tpu.memory_space<vmem>>, %arg12: memref<18x32x48xf32, #tpu.memory_space<vmem>>, %arg13: memref<18x32x32xf32, #tpu.memory_space<vmem>>) attributes {dimension_semantics = [#tpu.dimension_semantics<parallel>], iteration_bounds = array<i64: 2>, scalar_prefetch = 0 : i64, scratch_operands = 2 : i64, tpu.core_type = #tpu.core_type<tc>, window_params = [{transform_indices = @transform_0, window_bounds = array<i64: 1, 16, 16, 32>}, {transform_indices = @transform_1, window_bounds = array<i64: 1, 16, 16, 16>}, {pipeline_mode = #tpu.pipeline_mode<synchronous>, transform_indices = @transform_2, window_bounds = array<i64: 9, 48, 32>}, {pipeline_mode = #tpu.pipeline_mode<synchronous>, transform_indices = @transform_3, window_bounds = array<i64: 1, 32>}, {pipeline_mode = #tpu.pipeline_mode<synchronous>, transform_indices = @transform_4, window_bounds = array<i64: 1, 32>}, {pipeline_mode = #tpu.pipeline_mode<synchronous>, transform_indices = @transform_5, window_bounds = array<i64: 1, 32>}, {pipeline_mode = #tpu.pipeline_mode<synchronous>, transform_indices = @transform_6, window_bounds = array<i64: 9, 32, 32>}, {pipeline_mode = #tpu.pipeline_mode<synchronous>, transform_indices = @transform_7, window_bounds = array<i64: 1, 32>}, {pipeline_mode = #tpu.pipeline_mode<synchronous>, transform_indices = @transform_8, window_bounds = array<i64: 1, 32>}, {pipeline_mode = #tpu.pipeline_mode<synchronous>, transform_indices = @transform_9, window_bounds = array<i64: 1, 32>}, {transform_indices = @transform_10, window_bounds = array<i64: 1, 16, 16, 32>}]} {
    %cst = arith.constant 0.000000e+00 : f32
    %0 = vector.broadcast %cst : f32 to vector<18x32x48xf32>
    %c0 = arith.constant 0 : index
    %c0_0 = arith.constant 0 : index
    %c0_1 = arith.constant 0 : index
    %1 = vector.load %arg12[%c0, %c0_0, %c0_1] : memref<18x32x48xf32, #tpu.memory_space<vmem>>, vector<18x32x48xf32>
    tpu.vector_store %arg12[%c0, %c0_0, %c0_1], %0 {strides = array<i32>} : memref<18x32x48xf32, #tpu.memory_space<vmem>>, vector<18x32x48xf32>,
    %cst_2 = arith.constant 0.000000e+00 : f32
    %2 = vector.broadcast %cst_2 : f32 to vector<18x32x32xf32>
    %c0_3 = arith.constant 0 : index
    %c0_4 = arith.constant 0 : index
    %c0_5 = arith.constant 0 : index
    %3 = vector.load %arg13[%c0_3, %c0_4, %c0_5] : memref<18x32x32xf32, #tpu.memory_space<vmem>>, vector<18x32x32xf32>
    tpu.vector_store %arg13[%c0_3, %c0_4, %c0_5], %2 {strides = array<i32>} : memref<18x32x32xf32, #tpu.memory_space<vmem>>, vector<18x32x32xf32>,
    %c0_6 = arith.constant 0 : index
    %c0_7 = arith.constant 0 : index
    %c0_8 = arith.constant 0 : index
    %c0_9 = arith.constant 0 : index
    %4 = vector.load %arg1[%c0_6, %c0_7, %c0_8, %c0_9] : memref<1x16x16x32xbf16, #tpu.memory_space<vmem>>, vector<1x16x16x32xbf16>
    %5 = vector.shape_cast %4 : vector<1x16x16x32xbf16> to vector<16x16x32xbf16>
    %6 = arith.extf %5 : vector<16x16x32xbf16> to vector<16x16x32xf32>
    %c1 = arith.constant 1 : index
    %c8 = arith.constant 8 : index
    %c0_10 = arith.constant 0 : index
    %7 = vector.load %arg12[%c1, %c8, %c0_10] : memref<18x32x48xf32, #tpu.memory_space<vmem>>, vector<16x16x32xf32>
    tpu.vector_store %arg12[%c1, %c8, %c0_10], %6 {strides = array<i32>} : memref<18x32x48xf32, #tpu.memory_space<vmem>>, vector<16x16x32xf32>,
    %c0_11 = arith.constant 0 : index
    %c0_12 = arith.constant 0 : index
    %c0_13 = arith.constant 0 : index
    %c0_14 = arith.constant 0 : index
    %8 = vector.load %arg2[%c0_11, %c0_12, %c0_13, %c0_14] : memref<1x16x16x16xbf16, #tpu.memory_space<vmem>>, vector<1x16x16x16xbf16>
    %9 = vector.shape_cast %8 : vector<1x16x16x16xbf16> to vector<16x16x16xbf16>
    %10 = arith.extf %9 : vector<16x16x16xbf16> to vector<16x16x16xf32>
    %c1_15 = arith.constant 1 : index
    %c8_16 = arith.constant 8 : index
    %c32 = arith.constant 32 : index
    %11 = vector.load %arg12[%c1_15, %c8_16, %c32] : memref<18x32x48xf32, #tpu.memory_space<vmem>>, vector<16x16x16xf32>
    tpu.vector_store %arg12[%c1_15, %c8_16, %c32], %10 {strides = array<i32>} : memref<18x32x48xf32, #tpu.memory_space<vmem>>, vector<16x16x16xf32>,
    %cst_17 = arith.constant 0.000000e+00 : f32
    %12 = vector.broadcast %cst_17 : f32 to vector<256x32xf32>
    %c0_18 = arith.constant 0 : index
    %c7 = arith.constant 7 : index
    %c0_19 = arith.constant 0 : index
    %13 = vector.load %arg12[%c0_18, %c7, %c0_19] : memref<18x32x48xf32, #tpu.memory_space<vmem>>, vector<16x16x48xf32>
    %14 = vector.shape_cast %13 : vector<16x16x48xf32> to vector<256x48xf32>
    %15 = arith.truncf %14 : vector<256x48xf32> to vector<256x48xbf16>
    %c0_20 = arith.constant 0 : index
    %c0_21 = arith.constant 0 : index
    %c0_22 = arith.constant 0 : index
    %16 = vector.load %arg3[%c0_20, %c0_21, %c0_22] : memref<9x48x32xbf16, #tpu.memory_space<vmem>>, vector<1x48x32xbf16>
    %17 = vector.shape_cast %16 : vector<1x48x32xbf16> to vector<48x32xbf16>
    %cst_23 = arith.constant dense<0.000000e+00> : vector<256x32xf32>
    %18 = tpu.matmul %15, %17, %cst_23 {dimension_numbers = #tpu.dot_dimension_numbers<[1], [0], [0], [1], [0, 0, 1, 1], [], []>} : vector<256x48xbf16>, vector<48x32xbf16>, vector<256x32xf32> -> vector<256x32xf32>
    %19 = arith.addf %12, %18 : vector<256x32xf32>
    %c0_24 = arith.constant 0 : index
    %c8_25 = arith.constant 8 : index
    %c0_26 = arith.constant 0 : index
    %20 = vector.load %arg12[%c0_24, %c8_25, %c0_26] : memref<18x32x48xf32, #tpu.memory_space<vmem>>, vector<16x16x48xf32>
    %21 = vector.shape_cast %20 : vector<16x16x48xf32> to vector<256x48xf32>
    %22 = arith.truncf %21 : vector<256x48xf32> to vector<256x48xbf16>
    %c1_27 = arith.constant 1 : index
    %c0_28 = arith.constant 0 : index
    %c0_29 = arith.constant 0 : index
    %23 = vector.load %arg3[%c1_27, %c0_28, %c0_29] : memref<9x48x32xbf16, #tpu.memory_space<vmem>>, vector<1x48x32xbf16>
    %24 = vector.shape_cast %23 : vector<1x48x32xbf16> to vector<48x32xbf16>
    %cst_30 = arith.constant dense<0.000000e+00> : vector<256x32xf32>
    %25 = tpu.matmul %22, %24, %cst_30 {dimension_numbers = #tpu.dot_dimension_numbers<[1], [0], [0], [1], [0, 0, 1, 1], [], []>} : vector<256x48xbf16>, vector<48x32xbf16>, vector<256x32xf32> -> vector<256x32xf32>
    %26 = arith.addf %19, %25 : vector<256x32xf32>
    %c0_31 = arith.constant 0 : index
    %c9 = arith.constant 9 : index
    %c0_32 = arith.constant 0 : index
    %27 = vector.load %arg12[%c0_31, %c9, %c0_32] : memref<18x32x48xf32, #tpu.memory_space<vmem>>, vector<16x16x48xf32>
    %28 = vector.shape_cast %27 : vector<16x16x48xf32> to vector<256x48xf32>
    %29 = arith.truncf %28 : vector<256x48xf32> to vector<256x48xbf16>
    %c2 = arith.constant 2 : index
    %c0_33 = arith.constant 0 : index
    %c0_34 = arith.constant 0 : index
    %30 = vector.load %arg3[%c2, %c0_33, %c0_34] : memref<9x48x32xbf16, #tpu.memory_space<vmem>>, vector<1x48x32xbf16>
    %31 = vector.shape_cast %30 : vector<1x48x32xbf16> to vector<48x32xbf16>
    %cst_35 = arith.constant dense<0.000000e+00> : vector<256x32xf32>
    %32 = tpu.matmul %29, %31, %cst_35 {dimension_numbers = #tpu.dot_dimension_numbers<[1], [0], [0], [1], [0, 0, 1, 1], [], []>} : vector<256x48xbf16>, vector<48x32xbf16>, vector<256x32xf32> -> vector<256x32xf32>
    %33 = arith.addf %26, %32 : vector<256x32xf32>
    %c1_36 = arith.constant 1 : index
    %c7_37 = arith.constant 7 : index
    %c0_38 = arith.constant 0 : index
    %34 = vector.load %arg12[%c1_36, %c7_37, %c0_38] : memref<18x32x48xf32, #tpu.memory_space<vmem>>, vector<16x16x48xf32>
    %35 = vector.shape_cast %34 : vector<16x16x48xf32> to vector<256x48xf32>
    %36 = arith.truncf %35 : vector<256x48xf32> to vector<256x48xbf16>
    %c3 = arith.constant 3 : index
    %c0_39 = arith.constant 0 : index
    %c0_40 = arith.constant 0 : index
    %37 = vector.load %arg3[%c3, %c0_39, %c0_40] : memref<9x48x32xbf16, #tpu.memory_space<vmem>>, vector<1x48x32xbf16>
    %38 = vector.shape_cast %37 : vector<1x48x32xbf16> to vector<48x32xbf16>
    %cst_41 = arith.constant dense<0.000000e+00> : vector<256x32xf32>
    %39 = tpu.matmul %36, %38, %cst_41 {dimension_numbers = #tpu.dot_dimension_numbers<[1], [0], [0], [1], [0, 0, 1, 1], [], []>} : vector<256x48xbf16>, vector<48x32xbf16>, vector<256x32xf32> -> vector<256x32xf32>
    %40 = arith.addf %33, %39 : vector<256x32xf32>
    %c1_42 = arith.constant 1 : index
    %c8_43 = arith.constant 8 : index
    %c0_44 = arith.constant 0 : index
    %41 = vector.load %arg12[%c1_42, %c8_43, %c0_44] : memref<18x32x48xf32, #tpu.memory_space<vmem>>, vector<16x16x48xf32>
    %42 = vector.shape_cast %41 : vector<16x16x48xf32> to vector<256x48xf32>
    %43 = arith.truncf %42 : vector<256x48xf32> to vector<256x48xbf16>
    %c4 = arith.constant 4 : index
    %c0_45 = arith.constant 0 : index
    %c0_46 = arith.constant 0 : index
    %44 = vector.load %arg3[%c4, %c0_45, %c0_46] : memref<9x48x32xbf16, #tpu.memory_space<vmem>>, vector<1x48x32xbf16>
    %45 = vector.shape_cast %44 : vector<1x48x32xbf16> to vector<48x32xbf16>
    %cst_47 = arith.constant dense<0.000000e+00> : vector<256x32xf32>
    %46 = tpu.matmul %43, %45, %cst_47 {dimension_numbers = #tpu.dot_dimension_numbers<[1], [0], [0], [1], [0, 0, 1, 1], [], []>} : vector<256x48xbf16>, vector<48x32xbf16>, vector<256x32xf32> -> vector<256x32xf32>
    %47 = arith.addf %40, %46 : vector<256x32xf32>
    %c1_48 = arith.constant 1 : index
    %c9_49 = arith.constant 9 : index
    %c0_50 = arith.constant 0 : index
    %48 = vector.load %arg12[%c1_48, %c9_49, %c0_50] : memref<18x32x48xf32, #tpu.memory_space<vmem>>, vector<16x16x48xf32>
    %49 = vector.shape_cast %48 : vector<16x16x48xf32> to vector<256x48xf32>
    %50 = arith.truncf %49 : vector<256x48xf32> to vector<256x48xbf16>
    %c5 = arith.constant 5 : index
    %c0_51 = arith.constant 0 : index
    %c0_52 = arith.constant 0 : index
    %51 = vector.load %arg3[%c5, %c0_51, %c0_52] : memref<9x48x32xbf16, #tpu.memory_space<vmem>>, vector<1x48x32xbf16>
    %52 = vector.shape_cast %51 : vector<1x48x32xbf16> to vector<48x32xbf16>
    %cst_53 = arith.constant dense<0.000000e+00> : vector<256x32xf32>
    %53 = tpu.matmul %50, %52, %cst_53 {dimension_numbers = #tpu.dot_dimension_numbers<[1], [0], [0], [1], [0, 0, 1, 1], [], []>} : vector<256x48xbf16>, vector<48x32xbf16>, vector<256x32xf32> -> vector<256x32xf32>
    %54 = arith.addf %47, %53 : vector<256x32xf32>
    %c2_54 = arith.constant 2 : index
    %c7_55 = arith.constant 7 : index
    %c0_56 = arith.constant 0 : index
    %55 = vector.load %arg12[%c2_54, %c7_55, %c0_56] : memref<18x32x48xf32, #tpu.memory_space<vmem>>, vector<16x16x48xf32>
    %56 = vector.shape_cast %55 : vector<16x16x48xf32> to vector<256x48xf32>
    %57 = arith.truncf %56 : vector<256x48xf32> to vector<256x48xbf16>
    %c6 = arith.constant 6 : index
    %c0_57 = arith.constant 0 : index
    %c0_58 = arith.constant 0 : index
    %58 = vector.load %arg3[%c6, %c0_57, %c0_58] : memref<9x48x32xbf16, #tpu.memory_space<vmem>>, vector<1x48x32xbf16>
    %59 = vector.shape_cast %58 : vector<1x48x32xbf16> to vector<48x32xbf16>
    %cst_59 = arith.constant dense<0.000000e+00> : vector<256x32xf32>
    %60 = tpu.matmul %57, %59, %cst_59 {dimension_numbers = #tpu.dot_dimension_numbers<[1], [0], [0], [1], [0, 0, 1, 1], [], []>} : vector<256x48xbf16>, vector<48x32xbf16>, vector<256x32xf32> -> vector<256x32xf32>
    %61 = arith.addf %54, %60 : vector<256x32xf32>
    %c2_60 = arith.constant 2 : index
    %c8_61 = arith.constant 8 : index
    %c0_62 = arith.constant 0 : index
    %62 = vector.load %arg12[%c2_60, %c8_61, %c0_62] : memref<18x32x48xf32, #tpu.memory_space<vmem>>, vector<16x16x48xf32>
    %63 = vector.shape_cast %62 : vector<16x16x48xf32> to vector<256x48xf32>
    %64 = arith.truncf %63 : vector<256x48xf32> to vector<256x48xbf16>
    %c7_63 = arith.constant 7 : index
    %c0_64 = arith.constant 0 : index
    %c0_65 = arith.constant 0 : index
    %65 = vector.load %arg3[%c7_63, %c0_64, %c0_65] : memref<9x48x32xbf16, #tpu.memory_space<vmem>>, vector<1x48x32xbf16>
    %66 = vector.shape_cast %65 : vector<1x48x32xbf16> to vector<48x32xbf16>
    %cst_66 = arith.constant dense<0.000000e+00> : vector<256x32xf32>
    %67 = tpu.matmul %64, %66, %cst_66 {dimension_numbers = #tpu.dot_dimension_numbers<[1], [0], [0], [1], [0, 0, 1, 1], [], []>} : vector<256x48xbf16>, vector<48x32xbf16>, vector<256x32xf32> -> vector<256x32xf32>
    %68 = arith.addf %61, %67 : vector<256x32xf32>
    %c2_67 = arith.constant 2 : index
    %c9_68 = arith.constant 9 : index
    %c0_69 = arith.constant 0 : index
    %69 = vector.load %arg12[%c2_67, %c9_68, %c0_69] : memref<18x32x48xf32, #tpu.memory_space<vmem>>, vector<16x16x48xf32>
    %70 = vector.shape_cast %69 : vector<16x16x48xf32> to vector<256x48xf32>
    %71 = arith.truncf %70 : vector<256x48xf32> to vector<256x48xbf16>
    %c8_70 = arith.constant 8 : index
    %c0_71 = arith.constant 0 : index
    %c0_72 = arith.constant 0 : index
    %72 = vector.load %arg3[%c8_70, %c0_71, %c0_72] : memref<9x48x32xbf16, #tpu.memory_space<vmem>>, vector<1x48x32xbf16>
    %73 = vector.shape_cast %72 : vector<1x48x32xbf16> to vector<48x32xbf16>
    %cst_73 = arith.constant dense<0.000000e+00> : vector<256x32xf32>
    %74 = tpu.matmul %71, %73, %cst_73 {dimension_numbers = #tpu.dot_dimension_numbers<[1], [0], [0], [1], [0, 0, 1, 1], [], []>} : vector<256x48xbf16>, vector<48x32xbf16>, vector<256x32xf32> -> vector<256x32xf32>
    %75 = arith.addf %68, %74 : vector<256x32xf32>
    %c0_74 = arith.constant 0 : index
    %c0_75 = arith.constant 0 : index
    %76 = vector.load %arg4[%c0_74, %c0_75] : memref<1x32xf32, #tpu.memory_space<vmem>>, vector<1x32xf32>
    %77 = vector.broadcast %76 : vector<1x32xf32> to vector<256x32xf32>
    %78 = arith.addf %75, %77 : vector<256x32xf32>
    %cst_76 = arith.constant 0.000000e+00 : f32
    %79 = vector.broadcast %cst_76 : f32 to vector<256x32xf32>
    %80 = arith.maximumf %78, %79 : vector<256x32xf32>
    %c0_77 = arith.constant 0 : index
    %c0_78 = arith.constant 0 : index
    %81 = vector.load %arg5[%c0_77, %c0_78] : memref<1x32xf32, #tpu.memory_space<vmem>>, vector<1x32xf32>
    %82 = vector.broadcast %81 : vector<1x32xf32> to vector<256x32xf32>
    %83 = arith.mulf %80, %82 : vector<256x32xf32>
    %c0_79 = arith.constant 0 : index
    %c0_80 = arith.constant 0 : index
    %84 = vector.load %arg6[%c0_79, %c0_80] : memref<1x32xf32, #tpu.memory_space<vmem>>, vector<1x32xf32>
    %85 = vector.broadcast %84 : vector<1x32xf32> to vector<256x32xf32>
    %86 = arith.addf %83, %85 : vector<256x32xf32>
    %87 = vector.shape_cast %86 : vector<256x32xf32> to vector<16x16x32xf32>
    %c1_81 = arith.constant 1 : index
    %c8_82 = arith.constant 8 : index
    %c0_83 = arith.constant 0 : index
    %88 = vector.load %arg13[%c1_81, %c8_82, %c0_83] : memref<18x32x32xf32, #tpu.memory_space<vmem>>, vector<16x16x32xf32>
    tpu.vector_store %arg13[%c1_81, %c8_82, %c0_83], %87 {strides = array<i32>} : memref<18x32x32xf32, #tpu.memory_space<vmem>>, vector<16x16x32xf32>,
    %cst_84 = arith.constant 0.000000e+00 : f32
    %89 = vector.broadcast %cst_84 : f32 to vector<256x32xf32>
    %c0_85 = arith.constant 0 : index
    %c7_86 = arith.constant 7 : index
    %c0_87 = arith.constant 0 : index
    %90 = vector.load %arg13[%c0_85, %c7_86, %c0_87] : memref<18x32x32xf32, #tpu.memory_space<vmem>>, vector<16x16x32xf32>
    %91 = vector.shape_cast %90 : vector<16x16x32xf32> to vector<256x32xf32>
    %92 = arith.truncf %91 : vector<256x32xf32> to vector<256x32xbf16>
    %c0_88 = arith.constant 0 : index
    %c0_89 = arith.constant 0 : index
    %c0_90 = arith.constant 0 : index
    %93 = vector.load %arg7[%c0_88, %c0_89, %c0_90] : memref<9x32x32xbf16, #tpu.memory_space<vmem>>, vector<1x32x32xbf16>
    %94 = vector.shape_cast %93 : vector<1x32x32xbf16> to vector<32x32xbf16>
    %cst_91 = arith.constant dense<0.000000e+00> : vector<256x32xf32>
    %95 = tpu.matmul %92, %94, %cst_91 {dimension_numbers = #tpu.dot_dimension_numbers<[1], [0], [0], [1], [0, 0, 1, 1], [], []>} : vector<256x32xbf16>, vector<32x32xbf16>, vector<256x32xf32> -> vector<256x32xf32>
    %96 = arith.addf %89, %95 : vector<256x32xf32>
    %c0_92 = arith.constant 0 : index
    %c8_93 = arith.constant 8 : index
    %c0_94 = arith.constant 0 : index
    %97 = vector.load %arg13[%c0_92, %c8_93, %c0_94] : memref<18x32x32xf32, #tpu.memory_space<vmem>>, vector<16x16x32xf32>
    %98 = vector.shape_cast %97 : vector<16x16x32xf32> to vector<256x32xf32>
    %99 = arith.truncf %98 : vector<256x32xf32> to vector<256x32xbf16>
    %c1_95 = arith.constant 1 : index
    %c0_96 = arith.constant 0 : index
    %c0_97 = arith.constant 0 : index
    %100 = vector.load %arg7[%c1_95, %c0_96, %c0_97] : memref<9x32x32xbf16, #tpu.memory_space<vmem>>, vector<1x32x32xbf16>
    %101 = vector.shape_cast %100 : vector<1x32x32xbf16> to vector<32x32xbf16>
    %cst_98 = arith.constant dense<0.000000e+00> : vector<256x32xf32>
    %102 = tpu.matmul %99, %101, %cst_98 {dimension_numbers = #tpu.dot_dimension_numbers<[1], [0], [0], [1], [0, 0, 1, 1], [], []>} : vector<256x32xbf16>, vector<32x32xbf16>, vector<256x32xf32> -> vector<256x32xf32>
    %103 = arith.addf %96, %102 : vector<256x32xf32>
    %c0_99 = arith.constant 0 : index
    %c9_100 = arith.constant 9 : index
    %c0_101 = arith.constant 0 : index
    %104 = vector.load %arg13[%c0_99, %c9_100, %c0_101] : memref<18x32x32xf32, #tpu.memory_space<vmem>>, vector<16x16x32xf32>
    %105 = vector.shape_cast %104 : vector<16x16x32xf32> to vector<256x32xf32>
    %106 = arith.truncf %105 : vector<256x32xf32> to vector<256x32xbf16>
    %c2_102 = arith.constant 2 : index
    %c0_103 = arith.constant 0 : index
    %c0_104 = arith.constant 0 : index
    %107 = vector.load %arg7[%c2_102, %c0_103, %c0_104] : memref<9x32x32xbf16, #tpu.memory_space<vmem>>, vector<1x32x32xbf16>
    %108 = vector.shape_cast %107 : vector<1x32x32xbf16> to vector<32x32xbf16>
    %cst_105 = arith.constant dense<0.000000e+00> : vector<256x32xf32>
    %109 = tpu.matmul %106, %108, %cst_105 {dimension_numbers = #tpu.dot_dimension_numbers<[1], [0], [0], [1], [0, 0, 1, 1], [], []>} : vector<256x32xbf16>, vector<32x32xbf16>, vector<256x32xf32> -> vector<256x32xf32>
    %110 = arith.addf %103, %109 : vector<256x32xf32>
    %c1_106 = arith.constant 1 : index
    %c7_107 = arith.constant 7 : index
    %c0_108 = arith.constant 0 : index
    %111 = vector.load %arg13[%c1_106, %c7_107, %c0_108] : memref<18x32x32xf32, #tpu.memory_space<vmem>>, vector<16x16x32xf32>
    %112 = vector.shape_cast %111 : vector<16x16x32xf32> to vector<256x32xf32>
    %113 = arith.truncf %112 : vector<256x32xf32> to vector<256x32xbf16>
    %c3_109 = arith.constant 3 : index
    %c0_110 = arith.constant 0 : index
    %c0_111 = arith.constant 0 : index
    %114 = vector.load %arg7[%c3_109, %c0_110, %c0_111] : memref<9x32x32xbf16, #tpu.memory_space<vmem>>, vector<1x32x32xbf16>
    %115 = vector.shape_cast %114 : vector<1x32x32xbf16> to vector<32x32xbf16>
    %cst_112 = arith.constant dense<0.000000e+00> : vector<256x32xf32>
    %116 = tpu.matmul %113, %115, %cst_112 {dimension_numbers = #tpu.dot_dimension_numbers<[1], [0], [0], [1], [0, 0, 1, 1], [], []>} : vector<256x32xbf16>, vector<32x32xbf16>, vector<256x32xf32> -> vector<256x32xf32>
    %117 = arith.addf %110, %116 : vector<256x32xf32>
    %c1_113 = arith.constant 1 : index
    %c8_114 = arith.constant 8 : index
    %c0_115 = arith.constant 0 : index
    %118 = vector.load %arg13[%c1_113, %c8_114, %c0_115] : memref<18x32x32xf32, #tpu.memory_space<vmem>>, vector<16x16x32xf32>
    %119 = vector.shape_cast %118 : vector<16x16x32xf32> to vector<256x32xf32>
    %120 = arith.truncf %119 : vector<256x32xf32> to vector<256x32xbf16>
    %c4_116 = arith.constant 4 : index
    %c0_117 = arith.constant 0 : index
    %c0_118 = arith.constant 0 : index
    %121 = vector.load %arg7[%c4_116, %c0_117, %c0_118] : memref<9x32x32xbf16, #tpu.memory_space<vmem>>, vector<1x32x32xbf16>
    %122 = vector.shape_cast %121 : vector<1x32x32xbf16> to vector<32x32xbf16>
    %cst_119 = arith.constant dense<0.000000e+00> : vector<256x32xf32>
    %123 = tpu.matmul %120, %122, %cst_119 {dimension_numbers = #tpu.dot_dimension_numbers<[1], [0], [0], [1], [0, 0, 1, 1], [], []>} : vector<256x32xbf16>, vector<32x32xbf16>, vector<256x32xf32> -> vector<256x32xf32>
    %124 = arith.addf %117, %123 : vector<256x32xf32>
    %c1_120 = arith.constant 1 : index
    %c9_121 = arith.constant 9 : index
    %c0_122 = arith.constant 0 : index
    %125 = vector.load %arg13[%c1_120, %c9_121, %c0_122] : memref<18x32x32xf32, #tpu.memory_space<vmem>>, vector<16x16x32xf32>
    %126 = vector.shape_cast %125 : vector<16x16x32xf32> to vector<256x32xf32>
    %127 = arith.truncf %126 : vector<256x32xf32> to vector<256x32xbf16>
    %c5_123 = arith.constant 5 : index
    %c0_124 = arith.constant 0 : index
    %c0_125 = arith.constant 0 : index
    %128 = vector.load %arg7[%c5_123, %c0_124, %c0_125] : memref<9x32x32xbf16, #tpu.memory_space<vmem>>, vector<1x32x32xbf16>
    %129 = vector.shape_cast %128 : vector<1x32x32xbf16> to vector<32x32xbf16>
    %cst_126 = arith.constant dense<0.000000e+00> : vector<256x32xf32>
    %130 = tpu.matmul %127, %129, %cst_126 {dimension_numbers = #tpu.dot_dimension_numbers<[1], [0], [0], [1], [0, 0, 1, 1], [], []>} : vector<256x32xbf16>, vector<32x32xbf16>, vector<256x32xf32> -> vector<256x32xf32>
    %131 = arith.addf %124, %130 : vector<256x32xf32>
    %c2_127 = arith.constant 2 : index
    %c7_128 = arith.constant 7 : index
    %c0_129 = arith.constant 0 : index
    %132 = vector.load %arg13[%c2_127, %c7_128, %c0_129] : memref<18x32x32xf32, #tpu.memory_space<vmem>>, vector<16x16x32xf32>
    %133 = vector.shape_cast %132 : vector<16x16x32xf32> to vector<256x32xf32>
    %134 = arith.truncf %133 : vector<256x32xf32> to vector<256x32xbf16>
    %c6_130 = arith.constant 6 : index
    %c0_131 = arith.constant 0 : index
    %c0_132 = arith.constant 0 : index
    %135 = vector.load %arg7[%c6_130, %c0_131, %c0_132] : memref<9x32x32xbf16, #tpu.memory_space<vmem>>, vector<1x32x32xbf16>
    %136 = vector.shape_cast %135 : vector<1x32x32xbf16> to vector<32x32xbf16>
    %cst_133 = arith.constant dense<0.000000e+00> : vector<256x32xf32>
    %137 = tpu.matmul %134, %136, %cst_133 {dimension_numbers = #tpu.dot_dimension_numbers<[1], [0], [0], [1], [0, 0, 1, 1], [], []>} : vector<256x32xbf16>, vector<32x32xbf16>, vector<256x32xf32> -> vector<256x32xf32>
    %138 = arith.addf %131, %137 : vector<256x32xf32>
    %c2_134 = arith.constant 2 : index
    %c8_135 = arith.constant 8 : index
    %c0_136 = arith.constant 0 : index
    %139 = vector.load %arg13[%c2_134, %c8_135, %c0_136] : memref<18x32x32xf32, #tpu.memory_space<vmem>>, vector<16x16x32xf32>
    %140 = vector.shape_cast %139 : vector<16x16x32xf32> to vector<256x32xf32>
    %141 = arith.truncf %140 : vector<256x32xf32> to vector<256x32xbf16>
    %c7_137 = arith.constant 7 : index
    %c0_138 = arith.constant 0 : index
    %c0_139 = arith.constant 0 : index
    %142 = vector.load %arg7[%c7_137, %c0_138, %c0_139] : memref<9x32x32xbf16, #tpu.memory_space<vmem>>, vector<1x32x32xbf16>
    %143 = vector.shape_cast %142 : vector<1x32x32xbf16> to vector<32x32xbf16>
    %cst_140 = arith.constant dense<0.000000e+00> : vector<256x32xf32>
    %144 = tpu.matmul %141, %143, %cst_140 {dimension_numbers = #tpu.dot_dimension_numbers<[1], [0], [0], [1], [0, 0, 1, 1], [], []>} : vector<256x32xbf16>, vector<32x32xbf16>, vector<256x32xf32> -> vector<256x32xf32>
    %145 = arith.addf %138, %144 : vector<256x32xf32>
    %c2_141 = arith.constant 2 : index
    %c9_142 = arith.constant 9 : index
    %c0_143 = arith.constant 0 : index
    %146 = vector.load %arg13[%c2_141, %c9_142, %c0_143] : memref<18x32x32xf32, #tpu.memory_space<vmem>>, vector<16x16x32xf32>
    %147 = vector.shape_cast %146 : vector<16x16x32xf32> to vector<256x32xf32>
    %148 = arith.truncf %147 : vector<256x32xf32> to vector<256x32xbf16>
    %c8_144 = arith.constant 8 : index
    %c0_145 = arith.constant 0 : index
    %c0_146 = arith.constant 0 : index
    %149 = vector.load %arg7[%c8_144, %c0_145, %c0_146] : memref<9x32x32xbf16, #tpu.memory_space<vmem>>, vector<1x32x32xbf16>
    %150 = vector.shape_cast %149 : vector<1x32x32xbf16> to vector<32x32xbf16>
    %cst_147 = arith.constant dense<0.000000e+00> : vector<256x32xf32>
    %151 = tpu.matmul %148, %150, %cst_147 {dimension_numbers = #tpu.dot_dimension_numbers<[1], [0], [0], [1], [0, 0, 1, 1], [], []>} : vector<256x32xbf16>, vector<32x32xbf16>, vector<256x32xf32> -> vector<256x32xf32>
    %152 = arith.addf %145, %151 : vector<256x32xf32>
    %c0_148 = arith.constant 0 : index
    %c0_149 = arith.constant 0 : index
    %153 = vector.load %arg8[%c0_148, %c0_149] : memref<1x32xf32, #tpu.memory_space<vmem>>, vector<1x32xf32>
    %154 = vector.broadcast %153 : vector<1x32xf32> to vector<256x32xf32>
    %155 = arith.addf %152, %154 : vector<256x32xf32>
    %cst_150 = arith.constant 0.000000e+00 : f32
    %156 = vector.broadcast %cst_150 : f32 to vector<256x32xf32>
    %157 = arith.maximumf %155, %156 : vector<256x32xf32>
    %c0_151 = arith.constant 0 : index
    %c0_152 = arith.constant 0 : index
    %158 = vector.load %arg9[%c0_151, %c0_152] : memref<1x32xf32, #tpu.memory_space<vmem>>, vector<1x32xf32>
    %159 = vector.broadcast %158 : vector<1x32xf32> to vector<256x32xf32>
    %160 = arith.mulf %157, %159 : vector<256x32xf32>
    %c0_153 = arith.constant 0 : index
    %c0_154 = arith.constant 0 : index
    %161 = vector.load %arg10[%c0_153, %c0_154] : memref<1x32xf32, #tpu.memory_space<vmem>>, vector<1x32xf32>
    %162 = vector.broadcast %161 : vector<1x32xf32> to vector<256x32xf32>
    %163 = arith.addf %160, %162 : vector<256x32xf32>
    %164 = vector.shape_cast %163 : vector<256x32xf32> to vector<16x16x32xf32>
    %c0_155 = arith.constant 0 : index
    %c0_156 = arith.constant 0 : index
    %c0_157 = arith.constant 0 : index
    %c0_158 = arith.constant 0 : index
    %165 = vector.load %arg11[%c0_155, %c0_156, %c0_157, %c0_158] : memref<1x16x16x32xf32, #tpu.memory_space<vmem>>, vector<1x16x16x32xf32>
    %166 = vector.shape_cast %165 : vector<1x16x16x32xf32> to vector<16x16x32xf32>
    %167 = vector.shape_cast %164 : vector<16x16x32xf32> to vector<1x16x16x32xf32>
    tpu.vector_store %arg11[%c0_155, %c0_156, %c0_157, %c0_158], %167 {strides = array<i32>} : memref<1x16x16x32xf32, #tpu.memory_space<vmem>>, vector<1x16x16x32xf32>,
    return
  }
  func.func @transform_0(%arg0: i32) -> (i32, i32, i32, i32) {
    %c0_i32 = arith.constant 0 : i32
    %c0_i32_0 = arith.constant 0 : i32
    %c0_i32_1 = arith.constant 0 : i32
    %c0_i32_2 = arith.constant 0 : i32
    return %arg0, %c0_i32, %c0_i32_0, %c0_i32_1 : i32, i32, i32, i32
  }
  func.func @transform_1(%arg0: i32) -> (i32, i32, i32, i32) {
    %c0_i32 = arith.constant 0 : i32
    %c0_i32_0 = arith.constant 0 : i32
    %c0_i32_1 = arith.constant 0 : i32
    %c0_i32_2 = arith.constant 0 : i32
    return %arg0, %c0_i32, %c0_i32_0, %c0_i32_1 : i32, i32, i32, i32
  }
  func.func @transform_2(%arg0: i32) -> (i32, i32, i32) {
    %c0_i32 = arith.constant 0 : i32
    %c0_i32_0 = arith.constant 0 : i32
    %c0_i32_1 = arith.constant 0 : i32
    %c0_i32_2 = arith.constant 0 : i32
    return %c0_i32, %c0_i32_0, %c0_i32_1 : i32, i32, i32
  }
  func.func @transform_3(%arg0: i32) -> (i32, i32) {
    %c0_i32 = arith.constant 0 : i32
    %c0_i32_0 = arith.constant 0 : i32
    %c0_i32_1 = arith.constant 0 : i32
    return %c0_i32, %c0_i32_0 : i32, i32
  }
  func.func @transform_4(%arg0: i32) -> (i32, i32) {
    %c0_i32 = arith.constant 0 : i32
    %c0_i32_0 = arith.constant 0 : i32
    %c0_i32_1 = arith.constant 0 : i32
    return %c0_i32, %c0_i32_0 : i32, i32
  }
  func.func @transform_5(%arg0: i32) -> (i32, i32) {
    %c0_i32 = arith.constant 0 : i32
    %c0_i32_0 = arith.constant 0 : i32
    %c0_i32_1 = arith.constant 0 : i32
    return %c0_i32, %c0_i32_0 : i32, i32
  }
  func.func @transform_6(%arg0: i32) -> (i32, i32, i32) {
    %c0_i32 = arith.constant 0 : i32
    %c0_i32_0 = arith.constant 0 : i32
    %c0_i32_1 = arith.constant 0 : i32
    %c0_i32_2 = arith.constant 0 : i32
    return %c0_i32, %c0_i32_0, %c0_i32_1 : i32, i32, i32
  }
  func.func @transform_7(%arg0: i32) -> (i32, i32) {
    %c0_i32 = arith.constant 0 : i32
    %c0_i32_0 = arith.constant 0 : i32
    %c0_i32_1 = arith.constant 0 : i32
    return %c0_i32, %c0_i32_0 : i32, i32
  }
  func.func @transform_8(%arg0: i32) -> (i32, i32) {
    %c0_i32 = arith.constant 0 : i32
    %c0_i32_0 = arith.constant 0 : i32
    %c0_i32_1 = arith.constant 0 : i32
    return %c0_i32, %c0_i32_0 : i32, i32
  }
  func.func @transform_9(%arg0: i32) -> (i32, i32) {
    %c0_i32 = arith.constant 0 : i32
    %c0_i32_0 = arith.constant 0 : i32
    %c0_i32_1 = arith.constant 0 : i32
    return %c0_i32, %c0_i32_0 : i32, i32
  }
  func.func @transform_10(%arg0: i32) -> (i32, i32, i32, i32) {
    %c0_i32 = arith.constant 0 : i32
    %c0_i32_0 = arith.constant 0 : i32
    %c0_i32_1 = arith.constant 0 : i32
    %c0_i32_2 = arith.constant 0 : i32
    return %arg0, %c0_i32, %c0_i32_0, %c0_i32_1 : i32, i32, i32, i32
  }
}

</mosaic_0001>

<bundles_post_ra>
// kernel: tile.8
= control target key start
LH: loop header
LB: loop body
LE: loop exit
PB: predicated region body
PF: predicated region fallthrough
CT: control target
= control target key end

     0   :  { %s22_s0 = inlined_call_operand.vmem [shape: f32[32], index: 0, kind: input, shape index: {}]   ;;  %s23_s1 = inlined_call_operand.vmem [shape: f32[4,32], index: 1, kind: output, shape index: {}]  }
   0x1   :  { %v4_v0 = vld [vmem:[%s22_s0] ss:$0 sm:$0xff] }
   0x2   :  { %5 = vst [vmem:[%s23_s1] sm:$0xf] %v4_v0 }

// kernel: tile.9
= control target key start
LH: loop header
LB: loop body
LE: loop exit
PB: predicated region body
PF: predicated region fallthrough
CT: control target
= control target key end

     0   :  { %s37_s8 = smov 32   ;;  %s38_s9 = smov 64   ;;  %vm7_vm0 = vcmask 261120   ;;  %vm13_vm1 = vcmask 1048320   ;;  %vm19_vm2 = vcmask 785920   ;;  %vm25_vm3 = vcmask 523520   ;;  %s55_s0 = inlined_call_operand.vmem [shape: f32[4,32], index: 0, kind: input, shape index: {}]   ;;  %s56_s1 = inlined_call_operand.vmem [shape: f32[1,128], index: 1, kind: output, shape index: {}]  }
   0x1   :  { %v4_v0 = vld [vmem:[%s55_s0] sm:$0xf]  ;;  %s36_s0 = smov 96  }
   0x2   :  { %5 = vst [vmem:[#allocation1] sm:$0xf] %v4_v0 }
   0x9   :  { %v10_v1 = vld [vmem:[#allocation1 + $0x3] sm:$0x1]   ;;  %v22_v2 = vld [vmem:[#allocation1 + $0x1] sm:$0x1]   ;;  %v16_v3 = vld [vmem:[#allocation1 + $0x2] sm:$0x1]  }
   0xa   :  { %11 = vrot.lane.b32.xlu0 %v10_v1, %s36_s0  ;;  %23 = vrot.lane.b32.xlu1 %v22_v2, %s37_s8  ;;  %v6_v4 = vld [vmem:[#allocation1] sm:$0x1]  }
   0xb   :  { %8 = vst.msk [vmem:[#allocation0] sm:$0x1] %vm7_vm0, %v6_v4  }
  0x12   :  { %17 = vrot.lane.b32.xlu0 %v16_v3, %s38_s9 }
  0x7c   :  { %v12_v5 = vpop.permute.xlu0 %11   ;;  %v24_v6 = vpop.permute.xlu1 %23  }
  0x7d   :  { %14 = vst.msk [vmem:[#allocation0] sm:$0x1] %vm13_vm1, %v12_v5  }
  0x84   :  { %v18_v7 = vpop.permute.xlu0 %17  }
  0x85   :  { %20 = vst.msk [vmem:[#allocation0] sm:$0x1] %vm19_vm2, %v18_v7  }
  0x86   :  { %26 = vst.msk [vmem:[#allocation0] sm:$0x1] %vm25_vm3, %v24_v6  }
  0x8d   :  { %v29_v8 = vld [vmem:[#allocation0] sm:$0x1] }
  0x8e   :  { %32 = vst [vmem:[%s56_s1] sm:$0x1] %v29_v8 }

// kernel: unet_up_block_forward.2
= control target key start
LH: loop header
LB: loop body
LE: loop exit
PB: predicated region body
PF: predicated region fallthrough
CT: control target
= control target key end

     0   :  { %vm107_vm0 = vcmask 523264   ;;  %s436_s1 = inlined_call_operand.vmem [shape: bf16[64,128], index: 1, kind: input, shape index: {}]   ;;  %s437_s2 = inlined_call_operand.vmem [shape: f32[1,128], index: 2, kind: input, shape index: {}]   ;;  %s438_s0 = inlined_call_operand.vmem [shape: bf16[128,64], index: 0, kind: input, shape index: {}]   ;;  %s439_s3 = inlined_call_operand.vmem [shape: bf16[128,128], index: 3, kind: output, shape index: {}]  }
   0x1   :  { %v284_v0 = vld [vmem:[%s436_s1 + $0x18] sm:$0xff]  ;;  %v283_v1 = vld [vmem:[%s436_s1 + $0x10] sm:$0xff]  ;;  %v282_v2 = vld [vmem:[%s436_s1 + $0x8] sm:$0xff] }
   0x2   :  { %136 = vmatpush.bf16.msra.mxu0 %v284_v0  ;;  %332 = vmatpush.bf16.msra.mxu1 %v284_v0  ;;  %v281_v3 = vld [vmem:[%s436_s1] sm:$0xff]  ;;  %v275_v5 = vld [vmem:[%s438_s0 + $0x10] sm:$0xff]  ;;  %v274_v8 = vld [vmem:[%s438_s0 + $0x8] sm:$0xff] }
   0x3   :  { %333 = vmatpush.bf16.msra.mxu2 %v284_v0  ;;  %334 = vmatpush.bf16.msra.mxu3 %v284_v0  ;;  %v273_v4 = vld [vmem:[%s438_s0] sm:$0xff]  ;;  %v279_v7 = vld [vmem:[%s438_s0 + $0x30] sm:$0xff]  ;;  %v276_v9 = vld [vmem:[%s438_s0 + $0x18] sm:$0xff] }
   0x4   :  { %v277_v6 = vld [vmem:[%s438_s0 + $0x20] sm:$0xff]  ;;  %v278_v10 = vld [vmem:[%s438_s0 + $0x28] sm:$0xff]  ;;  %v280_v11 = vld [vmem:[%s438_s0 + $0x38] sm:$0xff] }
   0x5   :  { %v344_v14 = vld [vmem:[%s437_s2] ss:$0 sm:$0xff] }
   0x6   :  { %137 = vmatpush.bf16.msra.mxu0 %v283_v1  ;;  %335 = vmatpush.bf16.msra.mxu1 %v283_v1 }
   0x7   :  { %336 = vmatpush.bf16.msra.mxu2 %v283_v1  ;;  %337 = vmatpush.bf16.msra.mxu3 %v283_v1 }
   0xa   :  { %138 = vmatpush.bf16.msra.mxu0 %v282_v2  ;;  %338 = vmatpush.bf16.msra.mxu1 %v282_v2 }
   0xb   :  { %339 = vmatpush.bf16.msra.mxu2 %v282_v2  ;;  %340 = vmatpush.bf16.msra.mxu3 %v282_v2 }
   0xe   :  { %139 = vmatpush.bf16.msra.mxu0 %v281_v3  ;;  %341 = vmatpush.bf16.msra.mxu1 %v281_v3 }
   0xf   :  { %342 = vmatpush.bf16.msra.mxu2 %v281_v3  ;;  %343 = vmatpush.bf16.msra.mxu3 %v281_v3 }
  0x11   :  { %265 = vmatmul.msk.bf16.vlgmr.msra.gmra.mxu0 %vm107_vm0, %v273_v4  ;;  %267 = vmatmul.msk.bf16.vlgmr.msra.gmra.mxu1 %vm107_vm0, %v275_v5 }
  0x12   :  { %269 = vmatmul.msk.bf16.vlgmr.msra.gmra.mxu2 %vm107_vm0, %v277_v6  ;;  %271 = vmatmul.msk.bf16.vlgmr.msra.gmra.mxu3 %vm107_vm0, %v279_v7 }
  0x21   :  { %266 = vmatmul.msk.bf16.gmra.mxu0 %vm107_vm0, %v274_v8  ;;  %268 = vmatmul.msk.bf16.gmra.mxu1 %vm107_vm0, %v276_v9 }
  0x22   :  { %270 = vmatmul.msk.bf16.gmra.mxu2 %vm107_vm0, %v278_v10  ;;  %272 = vmatmul.msk.bf16.gmra.mxu3 %vm107_vm0, %v280_v11 }
  0x8e   :  { %v141_v12 = vpop.f32.mrf.mxu0  ;;  %v151_v13 = vpop.f32.mrf.mxu1 }
  0x8f   :  { %v142_v19 = vadd.f32 %v344_v14, %v141_v12  ;;  %v152_v20 = vadd.f32 %v344_v14, %v151_v13 }
  0x95   :  { %v161_v15 = vpop.f32.mrf.mxu2  ;;  %v171_v16 = vpop.f32.mrf.mxu3 }
  0x96   :  { %v143_v17 = vpop.f32.mrf.mxu0  ;;  %v153_v18 = vpop.f32.mrf.mxu1  ;;  %v162_v27 = vadd.f32 %v344_v14, %v161_v15  ;;  %v172_v28 = vadd.f32 %v344_v14, %v171_v16 }
  0x97   :  { %v144_v21 = vadd.f32 %v344_v14, %v143_v17  ;;  %v154_v22 = vadd.f32 %v344_v14, %v153_v18 }
  0x99   :  { %v288_v23 = vpack.c.bf16 %v144_v21, %v142_v19  ;;  %v298_v24 = vpack.c.bf16 %v154_v22, %v152_v20 }
  0x9b   :  { %289 = vst [vmem:[%s439_s3] sm:$0xff] %v288_v23  }
  0x9c   :  { %326 = vst [vmem:[%s439_s3 + $0x10] sm:$0xff] %v298_v24  }
  0x9d   :  { %v163_v25 = vpop.f32.mrf.mxu2  ;;  %v173_v26 = vpop.f32.mrf.mxu3 }
  0x9e   :  { %v164_v29 = vadd.f32 %v344_v14, %v163_v25  ;;  %v174_v30 = vadd.f32 %v344_v14, %v173_v26  ;;  %v146_v31 = vpop.f32.mrf.mxu0  ;;  %v156_v32 = vpop.f32.mrf.mxu1 }
  0x9f   :  { %v147_v39 = vadd.f32 %v344_v14, %v146_v31  ;;  %v157_v40 = vadd.f32 %v344_v14, %v156_v32 }
  0xa0   :  { %v308_v33 = vpack.c.bf16 %v164_v29, %v162_v27  ;;  %v318_v34 = vpack.c.bf16 %v174_v30, %v172_v28 }
  0xa2   :  { %328 = vst [vmem:[%s439_s3 + $0x20] sm:$0xff] %v308_v33  }
  0xa3   :  { %330 = vst [vmem:[%s439_s3 + $0x30] sm:$0xff] %v318_v34  }
  0xa5   :  { %v166_v35 = vpop.f32.mrf.mxu2  ;;  %v176_v36 = vpop.f32.mrf.mxu3 }
  0xa6   :  { %v148_v37 = vpop.f32.mrf.mxu0  ;;  %v158_v38 = vpop.f32.mrf.mxu1  ;;  %v167_v47 = vadd.f32 %v344_v14, %v166_v35  ;;  %v177_v48 = vadd.f32 %v344_v14, %v176_v36 }
  0xa7   :  { %v149_v41 = vadd.f32 %v344_v14, %v148_v37  ;;  %v159_v42 = vadd.f32 %v344_v14, %v158_v38 }
  0xa9   :  { %v293_v43 = vpack.c.bf16 %v149_v41, %v147_v39  ;;  %v303_v44 = vpack.c.bf16 %v159_v42, %v157_v40 }
  0xab   :  { %325 = vst [vmem:[%s439_s3 + $0x8] sm:$0xff] %v293_v43  }
  0xac   :  { %327 = vst [vmem:[%s439_s3 + $0x18] sm:$0xff] %v303_v44  }
  0xad   :  { %v168_v45 = vpop.f32.mrf.mxu2  ;;  %v178_v46 = vpop.f32.mrf.mxu3 }
  0xae   :  { %v169_v49 = vadd.f32 %v344_v14, %v168_v45  ;;  %v179_v50 = vadd.f32 %v344_v14, %v178_v46 }
  0xb0   :  { %v313_v51 = vpack.c.bf16 %v169_v49, %v167_v47  ;;  %v323_v52 = vpack.c.bf16 %v179_v50, %v177_v48 }
  0xb2   :  { %329 = vst [vmem:[%s439_s3 + $0x28] sm:$0xff] %v313_v51  }
  0xb3   :  { %331 = vst [vmem:[%s439_s3 + $0x38] sm:$0xff] %v323_v52  }

// kernel: unet_up_block_forward.3
= control target key start
LH: loop header
LB: loop body
LE: loop exit
PB: predicated region body
PF: predicated region fallthrough
CT: control target
= control target key end

     0   :  { %15 = vsyncpa [#allocation5], 0  ;;  %s8688_s0 = inlined_call_operand.vmem [shape: bf16[2,16,16,32], index: 0, kind: input, shape index: {}]   ;;  %s8689_s1 = inlined_call_operand.vmem [shape: bf16[2,16,16,16], index: 1, kind: input, shape index: {}]   ;;  %s8690_s2 = inlined_call_operand.vmem [shape: bf16[9,48,32], index: 2, kind: input, shape index: {}]   ;;  %s8691_s3 = inlined_call_operand.vmem [shape: f32[1,32], index: 3, kind: input, shape index: {}]   ;;  %s8692_s4 = inlined_call_operand.vmem [shape: f32[1,32], index: 4, kind: input, shape index: {}]   ;;  %s8693_s5 = inlined_call_operand.vmem [shape: f32[1,32], index: 5, kind: input, shape index: {}]   ;;  %s8694_s6 = inlined_call_operand.vmem [shape: bf16[9,32,32], index: 6, kind: input, shape index: {}]   ;;  %s8695_s7 = inlined_call_operand.vmem [shape: f32[1,32], index: 7, kind: input, shape index: {}]   ;;  %s8696_s8 = inlined_call_operand.vmem [shape: f32[1,32], index: 8, kind: input, shape index: {}]   ;;  %s8697_s9 = inlined_call_operand.vmem [shape: f32[1,32], index: 9, kind: input, shape index: {}]   ;;  %s8698_s10 = inlined_call_operand.hbm [shape: f32[2,16,16,32], index: 10, kind: output, shape index: {}]  }
   0x1   :  { %17 = vsyncpa [#allocation5 + $0x1], 0  ;;  %s6467_s13 = smov 0   ;;  %s6469_s14 = smov 0  }
   0x2   :  { %s6471_s15 = smov 0   ;;  %s6473_s16 = smov 0  }
   0x3 LB: > { %s6488_s17 = sadd.s32 4294967295, %s6406_s16   ;;  %s5438_s18 = sadd.s32 4294967294, %s6406_s16   ;;  %s6406_s16 = sphi %s6473_s16, %s8785_s16   ;;  %s6402_s15 = sphi %s6471_s15, %s8784_s15   ;;  %s6398_s14 = sphi %s6469_s14, %s8783_s14   ;;  %s6394_s13 = sphi %s6467_s13, %s8782_s13  }
   0x4   : > { %s6492_s19 = sadd.s32 1, %s6406_s16   ;;  %s250_s20 = sadd.s32 1, %s6402_s15 }
   0x5   : > { %s247_s21 = ssub.s32 %s6406_s16, %s6492_s19  ;;  %p260_p0 = scmp.ne.s32.totalorder %s6402_s15, %s6398_s14 }
   0x6   : > { %p248_p1 = scmp.eq.s32.totalorder %s247_s21, 0  ;;  %p261_p2 = scmp.eq.s32.totalorder %s6488_s17, 1 }
   0x7   : > { %p266_p3 = scmp.ne.s32.totalorder %s6398_s14, %s6394_s13  ;;  %p267_p4 = scmp.eq.s32.totalorder %s5438_s18, 1 }
   0x8   : > { %s6503_s22 = scalar_select %p248_p1, %s6402_s15, %s250_s20  }
   0x9   : > { %p6505_p5 = por %p261_p2, %p260_p0  ;;  %p6509_p6 = por %p267_p4, %p266_p3 }
   0xa   : > { %p5441_p7 = scmp.ge.s32.totalorder %s6406_s16, 1  ;;  %p325_p8 = scmp.lt.s32.totalorder %s6406_s16, 3 }
   0xc   : > { %p326_p9 = pnand %p5441_p7, %p325_p8 }
   0xe   : > { %329 = sbr.rel (%p326_p9) target bundleno = 1602 (0x642), region = 60 }
  0x13   : > { %p368_p10 = scmp.lt.s32.totalorder %s6488_s17, 1  ;;  %s6408_s30 = smov 32   ;;  %v6007_v18 = vld [vmem:[%s8690_s2 + $0x28] sm:$0xff]  ;;  %v6004_v19 = vld [vmem:[%s8690_s2 + $0x10] sm:$0xff]  ;;  %v6006_v21 = vld [vmem:[%s8690_s2 + $0x20] sm:$0xff]  ;;  %vm379_vm0 = vcmask 392192  }
  0x14   : > { %1027 = vmatpush.bf16.msra.mxu0 %v6007_v18  ;;  %1182 = vmatpush.bf16.msra.mxu1 %v6004_v19  ;;  %v6003_v22 = vld [vmem:[%s8690_s2 + $0x8] sm:$0xff]  ;;  %v6409_v29 = vmov 0.0   ;;  %v6005_v30 = vld [vmem:[%s8690_s2 + $0x18] sm:$0xff]  ;;  %v6002_v31 = vld [vmem:[%s8690_s2] sm:$0xff]  ;;  %vm452_vm1 = vcmask 261120   ;;  %vm814_vm2 = vcmask 392448  }
  0x15   : > { %s6517_s25 = scalar_select %p368_p10, %s6488_s17, 1  ;;  %6206 = vmatpush.bf16.msra.mxu2 %v6007_v18  ;;  %6209 = vmatpush.bf16.msra.mxu3 %v6004_v19  ;;  %381 = vst.msk [vmem:[#allocation2 + $0x8] sm:$0xff] %vm379_vm0, %v6409_v29 }
  0x16   : > { %382 = vst.msk [vmem:[#allocation2 + $0x10] sm:$0xff] %vm379_vm0, %v6409_v29  ;;  %s365_s12 = sand.u32 1, %s6398_s14  }
  0x17   : > { %s8699_s26 = sshll.u32 %s6517_s25, 7  ;;  %380 = vst.msk [vmem:[#allocation2] sm:$0xff] %vm379_vm0, %v6409_v29  ;;  %s8717_s20 = sshll.u32 %s6517_s25, 7 }
  0x18   : > { %s6525_s29 = scalar_lea.vmem %s8689_s1, %s8699_s26  ;;  %1028 = vmatpush.bf16.msra.mxu0 %v6006_v21  ;;  %1183 = vmatpush.bf16.msra.mxu1 %v6003_v22  ;;  %383 = vst.msk [vmem:[#allocation2 + $0x18] sm:$0xff] %vm379_vm0, %v6409_v29  ;;  %s6726_s28 = scalar_lea.vmem %s8688_s0, %s8717_s20 }
  0x19   : > { %v6197_v0 = vld [vmem:[%s6525_s29 + $0x38] sm:$0xff]   ;;  %v6113_v1 = vld [vmem:[%s6525_s29] sm:$0xff]   ;;  %v6191_v6 = vld [vmem:[%s6525_s29 + $0x8] sm:$0xff]   ;;  %6207 = vmatpush.bf16.msra.mxu2 %v6006_v21  ;;  %384 = vst.msk [vmem:[#allocation2 + $0x20] sm:$0xff] %vm379_vm0, %v6409_v29  ;;  %6210 = vmatpush.bf16.msra.mxu3 %v6003_v22  ;;  %s5442_s21 = sshll.u32 %s365_s12, 8 }
  0x1a   : > { %v6142_v2 = vunpack.c.l.bf16 %v6197_v0  ;;  %v6143_v3 = vunpack.c.h.bf16 %v6197_v0  ;;  %v6114_v4 = vunpack.c.l.bf16 %v6113_v1  ;;  %v6115_v5 = vunpack.c.h.bf16 %v6113_v1  ;;  %v6198_v7 = vld [vmem:[%s6525_s29 + $0x40] sm:$0xff]   ;;  %v6199_v8 = vld [vmem:[%s6525_s29 + $0x48] sm:$0xff]   ;;  %v6200_v13 = vld [vmem:[%s6525_s29 + $0x50] sm:$0xff]   ;;  %385 = vst.msk [vmem:[#allocation2 + $0x28] sm:$0xff] %vm379_vm0, %v6409_v29  ;;  %s8402_s26 = scalar_lea.vmem [#allocation4], %s5442_s21 }
  0x1b   : > { %v6118_v11 = vunpack.c.l.bf16 %v6191_v6  ;;  %v6119_v12 = vunpack.c.h.bf16 %v6191_v6  ;;  %v6146_v14 = vunpack.c.l.bf16 %v6198_v7  ;;  %v6147_v15 = vunpack.c.h.bf16 %v6198_v7  ;;  %v6192_v27 = vld [vmem:[%s6525_s29 + $0x10] sm:$0xff]   ;;  %v6201_v28 = vld [vmem:[%s6525_s29 + $0x58] sm:$0xff]   ;;  %386 = vst.msk [vmem:[#allocation2 + $0x30] sm:$0xff] %vm379_vm0, %v6409_v29  ;;  %v6194_v43 = vld [vmem:[%s6525_s29 + $0x20] sm:$0xff]   ;;  %s5361_s18 = sshll.u32 %s8402_s26, 4  ;;  %s5362_s18 = int_to_ptr.vmem [resolvable:$true] %s5361_s18 }
  0x1c   : > { %v6255_v9 = vpack.i.bf16 %v6143_v3, %v6142_v2  ;;  %v6265_v10 = vpack.i.bf16 %v6115_v5, %v6114_v4  ;;  %v6150_v16 = vunpack.c.l.bf16 %v6199_v8  ;;  %v6151_v17 = vunpack.c.h.bf16 %v6199_v8  ;;  %v6193_v37 = vld [vmem:[%s6525_s29 + $0x18] sm:$0xff]   ;;  %1029 = vmatpush.bf16.msra.mxu0 %v6005_v30  ;;  %1184 = vmatpush.bf16.msra.mxu1 %v6002_v31  ;;  %v901_v42 = vld [vmem:[#allocation2 + $0x8] sm:$0xff]  ;;  %387 = vst.msk [vmem:[#allocation2 + $0x38] sm:$0xff] %vm379_vm0, %v6409_v29  ;;  %v6202_v44 = vld [vmem:[%s6525_s29 + $0x60] sm:$0xff]  }
  0x1d   : > { %v6275_v20 = vpack.i.bf16 %v6119_v12, %v6118_v11  ;;  %v6154_v23 = vunpack.c.l.bf16 %v6200_v13  ;;  %v6155_v24 = vunpack.c.h.bf16 %v6200_v13  ;;  %v6260_v25 = vpack.i.bf16 %v6147_v15, %v6146_v14  ;;  %6208 = vmatpush.bf16.msra.mxu2 %v6005_v30  ;;  %v902_v45 = vld [vmem:[#allocation2 + $0x10] sm:$0xff]  ;;  %388 = vst.msk [vmem:[#allocation2 + $0x40] sm:$0xff] %vm379_vm0, %v6409_v29  ;;  %6211 = vmatpush.bf16.msra.mxu3 %v6002_v31  ;;  %v6195_v54 = vld [vmem:[%s6525_s29 + $0x28] sm:$0xff]   ;;  %v6182_v5 = vld [vmem:[%s6726_s28 + $0x38] sm:$0xff]  }
  0x1e   : > { %6256 = vrot.lane.b32.xlu0 %v6255_v9, %s6408_s30  ;;  %6266 = vrot.lane.b32.xlu1 %v6265_v10, %s6408_s30  ;;  %v6270_v26 = vpack.i.bf16 %v6151_v17, %v6150_v16  ;;  %v6122_v33 = vunpack.c.l.bf16 %v6192_v27  ;;  %v6123_v34 = vunpack.c.h.bf16 %v6192_v27  ;;  %v6158_v35 = vunpack.c.l.bf16 %v6201_v28  ;;  %389 = vst.msk [vmem:[#allocation2 + $0x48] sm:$0xff] %vm379_vm0, %v6409_v29  ;;  %v847_v58 = vld [vmem:[#allocation2 + $0x7] sm:$0xff]  ;;  %v848_v59 = vld [vmem:[#allocation2 + $0xf] sm:$0xff]  ;;  %v6013_v22 = vld [vmem:[%s8690_s2 + $0x58] sm:$0xff] }
  0x1f   : > { %6276 = vrot.lane.b32.xlu2 %v6275_v20, %s6408_s30  ;;  %v6280_v32 = vpack.i.bf16 %v6155_v24, %v6154_v23  ;;  %v6159_v36 = vunpack.c.h.bf16 %v6201_v28  ;;  %v6126_v38 = vunpack.c.l.bf16 %v6193_v37  ;;  %v6127_v39 = vunpack.c.h.bf16 %v6193_v37  ;;  %390 = vst.msk [vmem:[#allocation2 + $0x50] sm:$0xff] %vm379_vm0, %v6409_v29  ;;  %v6203_v60 = vld [vmem:[%s6525_s29 + $0x68] sm:$0xff]   ;;  %v6204_v0 = vld [vmem:[%s6525_s29 + $0x70] sm:$0xff]   ;;  %v6010_v21 = vld [vmem:[%s8690_s2 + $0x40] sm:$0xff] }
  0x20   : > { %v6285_v40 = vpack.i.bf16 %v6123_v34, %v6122_v33  ;;  %v933_v46 = vpack.c.bf16 %v902_v45, %v901_v42  ;;  %v6130_v48 = vunpack.c.l.bf16 %v6194_v43  ;;  %v6131_v49 = vunpack.c.h.bf16 %v6194_v43  ;;  %391 = vst.msk [vmem:[#allocation2 + $0x58] sm:$0xff] %vm379_vm0, %v6409_v29  ;;  %v6196_v11 = vld [vmem:[%s6525_s29 + $0x30] sm:$0xff]   ;;  %v6049_v24 = vld [vmem:[%s6726_s28] sm:$0xff]  }
  0x21   : > { %v6290_v41 = vpack.i.bf16 %v6159_v36, %v6158_v35  ;;  %v6295_v47 = vpack.i.bf16 %v6127_v39, %v6126_v38  ;;  %v6162_v50 = vunpack.c.l.bf16 %v6202_v44  ;;  %v6163_v51 = vunpack.c.h.bf16 %v6202_v44  ;;  %392 = vst.msk [vmem:[#allocation2 + $0x60] sm:$0xff] %vm379_vm0, %v6409_v29  ;;  %v6016_v23 = vld [vmem:[%s8690_s2 + $0x70] sm:$0xff]  ;;  %1392 = vmatpush.bf16.msrb.mxu2 %v6010_v21  ;;  %1634 = vmatpush.bf16.msrb.mxu3 %v6013_v22  ;;  %v6183_v28 = vld [vmem:[%s6726_s28 + $0x40] sm:$0xff]   ;;  %v6176_v36 = vld [vmem:[%s6726_s28 + $0x8] sm:$0xff]  }
  0x22   : > { %5465 = vmatmul.msk.bf16.vlgmr.msra.gmra.mxu0 %vm379_vm0, %v933_v46  ;;  %393 = vst.msk [vmem:[#allocation2 + $0x68] sm:$0xff] %vm379_vm0, %v6409_v29  ;;  %v6305_v52 = vpack.i.bf16 %v6131_v49, %v6130_v48  ;;  %v6134_v55 = vunpack.c.l.bf16 %v6195_v54  ;;  %v6135_v56 = vunpack.c.h.bf16 %v6195_v54  ;;  %v879_v61 = vpack.c.bf16 %v848_v59, %v847_v58  ;;  %v6184_v48 = vld [vmem:[%s6726_s28 + $0x48] sm:$0xff]  }
  0x23   : > { %394 = vst.msk [vmem:[#allocation2 + $0x70] sm:$0xff] %vm379_vm0, %v6409_v29  ;;  %v6300_v53 = vpack.i.bf16 %v6163_v51, %v6162_v50  ;;  %v6166_v62 = vunpack.c.l.bf16 %v6203_v60  ;;  %v6167_v63 = vunpack.c.h.bf16 %v6203_v60  ;;  %v6170_v1 = vunpack.c.l.bf16 %v6204_v0  ;;  %1876 = vmatpush.bf16.msrb.mxu0 %v6016_v23 }
  0x24   : > { %395 = vst.msk [vmem:[#allocation2 + $0x78] sm:$0xff] %vm379_vm0, %v6409_v29  ;;  %v6315_v57 = vpack.i.bf16 %v6135_v56, %v6134_v55  ;;  %v6171_v2 = vunpack.c.h.bf16 %v6204_v0  ;;  %5493 = vmatmul.msk.bf16.vlgmr.msra.gmra.mxu1 %vm379_vm0, %v879_v61  ;;  %v6078_v6 = vunpack.c.l.bf16 %v6182_v5  ;;  %v6079_v7 = vunpack.c.h.bf16 %v6182_v5  ;;  %v6185_v61 = vld [vmem:[%s6726_s28 + $0x50] sm:$0xff]  }
  0x25   : > { %396 = vst.msk [vmem:[#allocation2 + $0x80] sm:$0xff] %vm379_vm0, %v6409_v29  ;;  %v6310_v3 = vpack.i.bf16 %v6167_v63, %v6166_v62  ;;  %v6138_v12 = vunpack.c.l.bf16 %v6196_v11  ;;  %v6139_v13 = vunpack.c.h.bf16 %v6196_v11  ;;  %v6051_v27 = vunpack.c.h.bf16 %v6049_v24  ;;  %v6012_v5 = vld [vmem:[%s8690_s2 + $0x50] sm:$0xff] }
  0x26   : > { %6261 = vrot.lane.b32.xlu0 %v6260_v25, %s6408_s30  ;;  %6271 = vrot.lane.b32.xlu1 %v6270_v26, %s6408_s30  ;;  %397 = vst.msk [vmem:[#allocation2 + $0x88] sm:$0xff] %vm379_vm0, %v6409_v29  ;;  %v6320_v4 = vpack.i.bf16 %v6171_v2, %v6170_v1  ;;  %v6050_v26 = vunpack.c.l.bf16 %v6049_v24  ;;  %v6082_v33 = vunpack.c.l.bf16 %v6183_v28  ;;  %v6083_v34 = vunpack.c.h.bf16 %v6183_v28  ;;  %v6009_v1 = vld [vmem:[%s8690_s2 + $0x38] sm:$0xff] }
  0x27   : > { %6281 = vrot.lane.b32.xlu2 %v6280_v32, %s6408_s30  ;;  %398 = vst.msk [vmem:[#allocation2 + $0x90] sm:$0xff] %vm379_vm0, %v6409_v29  ;;  %v6325_v14 = vpack.i.bf16 %v6139_v13, %v6138_v12  ;;  %v6055_v39 = vunpack.c.h.bf16 %v6176_v36  ;;  %v6087_v60 = vunpack.c.h.bf16 %v6184_v48  ;;  %1393 = vmatpush.bf16.msrb.mxu2 %v6009_v1 }
  0x28   : > { %399 = vst.msk [vmem:[#allocation2 + $0x98] sm:$0xff] %vm379_vm0, %v6409_v29  ;;  %1635 = vmatpush.bf16.msrb.mxu3 %v6012_v5 }
  0x29   : > { %400 = vst.msk [vmem:[#allocation2 + $0xa0] sm:$0xff] %vm379_vm0, %v6409_v29 }
  0x2a   : > { %401 = vst.msk [vmem:[#allocation2 + $0xa8] sm:$0xff] %vm379_vm0, %v6409_v29 }
  0x2b   : > { %402 = vst.msk [vmem:[#allocation2 + $0xb0] sm:$0xff] %vm379_vm0, %v6409_v29 }
  0x2c   : > { %403 = vst.msk [vmem:[#allocation2 + $0xb8] sm:$0xff] %vm379_vm0, %v6409_v29 }
  0x2d   : > { %404 = vst.msk [vmem:[#allocation2 + $0xc0] sm:$0xff] %vm379_vm0, %v6409_v29 }
  0x2e   : > { %6286 = vrot.lane.b32.xlu0 %v6285_v40, %s6408_s30  ;;  %6291 = vrot.lane.b32.xlu1 %v6290_v41, %s6408_s30  ;;  %405 = vst.msk [vmem:[#allocation2 + $0xc8] sm:$0xff] %vm379_vm0, %v6409_v29  ;;  %v6177_v40 = vld [vmem:[%s6726_s28 + $0x10] sm:$0xff]  }
  0x2f   : > { %6296 = vrot.lane.b32.xlu2 %v6295_v47, %s6408_s30  ;;  %406 = vst.msk [vmem:[#allocation2 + $0xd0] sm:$0xff] %vm379_vm0, %v6409_v29  ;;  %v6058_v44 = vunpack.c.l.bf16 %v6177_v40  ;;  %v6059_v47 = vunpack.c.h.bf16 %v6177_v40  ;;  %v6015_v40 = vld [vmem:[%s8690_s2 + $0x68] sm:$0xff] }
  0x30   : > { %407 = vst.msk [vmem:[#allocation2 + $0xd8] sm:$0xff] %vm379_vm0, %v6409_v29  ;;  %1877 = vmatpush.bf16.msrb.mxu0 %v6015_v40 }
  0x31   : > { %408 = vst.msk [vmem:[#allocation2 + $0xe0] sm:$0xff] %vm379_vm0, %v6409_v29 }
  0x32   : > { %409 = vst.msk [vmem:[#allocation2 + $0xe8] sm:$0xff] %vm379_vm0, %v6409_v29 }
  0x33   : > { %410 = vst.msk [vmem:[#allocation2 + $0xf0] sm:$0xff] %vm379_vm0, %v6409_v29 }
  0x34   : > { %411 = vst.msk [vmem:[#allocation2 + $0xf8] sm:$0xff] %vm379_vm0, %v6409_v29 }
  0x35   : > { %412 = vst.msk [vmem:[#allocation2 + $0x100] sm:$0xff] %vm379_vm0, %v6409_v29 }
  0x36   : > { %6306 = vrot.lane.b32.xlu1 %v6305_v52, %s6408_s30  ;;  %6301 = vrot.lane.b32.xlu0 %v6300_v53, %s6408_s30  ;;  %413 = vst.msk [vmem:[#allocation2 + $0x108] sm:$0xff] %vm379_vm0, %v6409_v29 }
  0x37   : > { %414 = vst.msk [vmem:[#allocation2 + $0x110] sm:$0xff] %vm379_vm0, %v6409_v29  ;;  %6311 = vrot.lane.b32.xlu2 %v6310_v3, %s6408_s30 }
  0x38   : > { %415 = vst.msk [vmem:[#allocation2 + $0x118] sm:$0xff] %vm379_vm0, %v6409_v29 }
  0x39   : > { %416 = vst.msk [vmem:[#allocation2 + $0x120] sm:$0xff] %vm379_vm0, %v6409_v29 }
  0x3a   : > { %417 = vst.msk [vmem:[#allocation2 + $0x128] sm:$0xff] %vm379_vm0, %v6409_v29 }
  0x3b   : > { %418 = vst.msk [vmem:[#allocation2 + $0x130] sm:$0xff] %vm379_vm0, %v6409_v29 }
  0x3c   : > { %419 = vst.msk [vmem:[#allocation2 + $0x138] sm:$0xff] %vm379_vm0, %v6409_v29 }
  0x3d   : > { %420 = vst.msk [vmem:[#allocation2 + $0x140] sm:$0xff] %vm379_vm0, %v6409_v29 }
  0x3e   : > { %6316 = vrot.lane.b32.xlu0 %v6315_v57, %s6408_s30  ;;  %421 = vst.msk [vmem:[#allocation2 + $0x148] sm:$0xff] %vm379_vm0, %v6409_v29  ;;  %6321 = vrot.lane.b32.xlu1 %v6320_v4, %s6408_s30  ;;  %v6086_v57 = vunpack.c.l.bf16 %v6184_v48 }
  0x3f   : > { %422 = vst.msk [vmem:[#allocation2 + $0x150] sm:$0xff] %vm379_vm0, %v6409_v29  ;;  %6326 = vrot.lane.b32.xlu2 %v6325_v14, %s6408_s30 }
  0x40   : > { %423 = vst.msk [vmem:[#allocation2 + $0x158] sm:$0xff] %vm379_vm0, %v6409_v29 }
  0x41   : > { %424 = vst.msk [vmem:[#allocation2 + $0x160] sm:$0xff] %vm379_vm0, %v6409_v29 }
  0x42   : > { %425 = vst.msk [vmem:[#allocation2 + $0x168] sm:$0xff] %vm379_vm0, %v6409_v29 }
  0x43   : > { %426 = vst.msk [vmem:[#allocation2 + $0x170] sm:$0xff] %vm379_vm0, %v6409_v29 }
  0x44   : > { %427 = vst.msk [vmem:[#allocation2 + $0x178] sm:$0xff] %vm379_vm0, %v6409_v29 }
  0x45   : > { %428 = vst.msk [vmem:[#allocation2 + $0x180] sm:$0xff] %vm379_vm0, %v6409_v29 }
  0x46   : > { %429 = vst.msk [vmem:[#allocation2 + $0x188] sm:$0xff] %vm379_vm0, %v6409_v29 }
  0x47   : > { %430 = vst.msk [vmem:[#allocation2 + $0x190] sm:$0xff] %vm379_vm0, %v6409_v29 }
  0x48   : > { %431 = vst.msk [vmem:[#allocation2 + $0x198] sm:$0xff] %vm379_vm0, %v6409_v29 }
  0x49   : > { %432 = vst.msk [vmem:[#allocation2 + $0x1a0] sm:$0xff] %vm379_vm0, %v6409_v29 }
  0x4a   : > { %433 = vst.msk [vmem:[#allocation2 + $0x1a8] sm:$0xff] %vm379_vm0, %v6409_v29 }
  0x4b   : > { %434 = vst.msk [vmem:[#allocation2 + $0x1b0] sm:$0xff] %vm379_vm0, %v6409_v29 }
  0x4c   : > { %435 = vst.msk [vmem:[#allocation2 + $0x1b8] sm:$0xff] %vm379_vm0, %v6409_v29 }
  0x4d   : > { %436 = vst.msk [vmem:[#allocation2 + $0x1c0] sm:$0xff] %vm379_vm0, %v6409_v29 }
  0x4e   : > { %437 = vst.msk [vmem:[#allocation2 + $0x1c8] sm:$0xff] %vm379_vm0, %v6409_v29 }
  0x4f   : > { %438 = vst.msk [vmem:[#allocation2 + $0x1d0] sm:$0xff] %vm379_vm0, %v6409_v29 }
  0x50   : > { %439 = vst.msk [vmem:[#allocation2 + $0x1d8] sm:$0xff] %vm379_vm0, %v6409_v29 }
  0x51   : > { %440 = vst.msk [vmem:[#allocation2 + $0x1e0] sm:$0xff] %vm379_vm0, %v6409_v29 }
  0x52   : > { %441 = vst.msk [vmem:[#allocation2 + $0x1e8] sm:$0xff] %vm379_vm0, %v6409_v29 }
  0x53   : > { %442 = vst.msk [vmem:[#allocation2 + $0x1f0] sm:$0xff] %vm379_vm0, %v6409_v29 }
  0x54   : > { %443 = vst.msk [vmem:[#allocation2 + $0x1f8] sm:$0xff] %vm379_vm0, %v6409_v29 }
  0x55   : > { %444 = vst.msk [vmem:[#allocation2 + $0x200] sm:$0xff] %vm379_vm0, %v6409_v29 }
  0x56   : > { %445 = vst.msk [vmem:[#allocation2 + $0x208] sm:$0xff] %vm379_vm0, %v6409_v29 }
  0x57   : > { %446 = vst.msk [vmem:[#allocation2 + $0x210] sm:$0xff] %vm379_vm0, %v6409_v29 }
  0x58   : > { %447 = vst.msk [vmem:[#allocation2 + $0x218] sm:$0xff] %vm379_vm0, %v6409_v29 }
  0x59   : > { %448 = vst.msk [vmem:[#allocation2 + $0x220] sm:$0xff] %vm379_vm0, %v6409_v29 }
  0x5a   : > { %449 = vst.msk [vmem:[#allocation2 + $0x228] sm:$0xff] %vm379_vm0, %v6409_v29 }
  0x5b   : > { %450 = vst.msk [vmem:[#allocation2 + $0x230] sm:$0xff] %vm379_vm0, %v6409_v29 }
  0x5c   : > { %451 = vst.msk [vmem:[#allocation2 + $0x238] sm:$0xff] %vm379_vm0, %v6409_v29 }
  0x5d   : > { %453 = vst.msk [vmem:[#allocation3] sm:$0xff] %vm452_vm1, %v6409_v29 }
  0x5e   : > { %454 = vst.msk [vmem:[#allocation3 + $0x8] sm:$0xff] %vm452_vm1, %v6409_v29 }
  0x5f   : > { %455 = vst.msk [vmem:[#allocation3 + $0x10] sm:$0xff] %vm452_vm1, %v6409_v29 }
  0x60   : > { %456 = vst.msk [vmem:[#allocation3 + $0x18] sm:$0xff] %vm452_vm1, %v6409_v29 }
  0x61   : > { %457 = vst.msk [vmem:[#allocation3 + $0x20] sm:$0xff] %vm452_vm1, %v6409_v29 }
  0x62   : > { %458 = vst.msk [vmem:[#allocation3 + $0x28] sm:$0xff] %vm452_vm1, %v6409_v29 }
  0x63   : > { %459 = vst.msk [vmem:[#allocation3 + $0x30] sm:$0xff] %vm452_vm1, %v6409_v29 }
  0x64   : > { %604 = vst.msk [vmem:[#allocation2 + $0x108] sm:$0xff] %vm452_vm1, %v6078_v6  ;;  %v6090_v6 = vunpack.c.l.bf16 %v6185_v61 }
  0x65   : > { %605 = vst.msk [vmem:[#allocation2 + $0x110] sm:$0xff] %vm452_vm1, %v6079_v7  ;;  %v6091_v7 = vunpack.c.h.bf16 %v6185_v61 }
  0x66   : > { %460 = vst.msk [vmem:[#allocation3 + $0x38] sm:$0xff] %vm452_vm1, %v6409_v29 }
  0x67   : > { %461 = vst.msk [vmem:[#allocation3 + $0x40] sm:$0xff] %vm452_vm1, %v6409_v29 }
  0x68   : > { %462 = vst.msk [vmem:[#allocation3 + $0x48] sm:$0xff] %vm452_vm1, %v6409_v29 }
  0x69   : > { %463 = vst.msk [vmem:[#allocation3 + $0x50] sm:$0xff] %vm452_vm1, %v6409_v29 }
  0x6a   : > { %464 = vst.msk [vmem:[#allocation3 + $0x58] sm:$0xff] %vm452_vm1, %v6409_v29 }
  0x6b   : > { %465 = vst.msk [vmem:[#allocation3 + $0x60] sm:$0xff] %vm452_vm1, %v6409_v29 }
  0x6c   : > { %466 = vst.msk [vmem:[#allocation3 + $0x68] sm:$0xff] %vm452_vm1, %v6409_v29 }
  0x6d   : > { %467 = vst.msk [vmem:[#allocation3 + $0x70] sm:$0xff] %vm452_vm1, %v6409_v29 }
  0x6e   : > { %468 = vst.msk [vmem:[#allocation3 + $0x78] sm:$0xff] %vm452_vm1, %v6409_v29 }
  0x6f   : > { %469 = vst.msk [vmem:[#allocation3 + $0x80] sm:$0xff] %vm452_vm1, %v6409_v29 }
  0x70   : > { %470 = vst.msk [vmem:[#allocation3 + $0x88] sm:$0xff] %vm452_vm1, %v6409_v29 }
  0x71   : > { %471 = vst.msk [vmem:[#allocation3 + $0x90] sm:$0xff] %vm452_vm1, %v6409_v29 }
  0x72   : > { %472 = vst.msk [vmem:[#allocation3 + $0x98] sm:$0xff] %vm452_vm1, %v6409_v29 }
  0x73   : > { %473 = vst.msk [vmem:[#allocation3 + $0xa0] sm:$0xff] %vm452_vm1, %v6409_v29 }
  0x74   : > { %474 = vst.msk [vmem:[#allocation3 + $0xa8] sm:$0xff] %vm452_vm1, %v6409_v29 }
  0x75   : > { %475 = vst.msk [vmem:[#allocation3 + $0xb0] sm:$0xff] %vm452_vm1, %v6409_v29 }
  0x76   : > { %476 = vst.msk [vmem:[#allocation3 + $0xb8] sm:$0xff] %vm452_vm1, %v6409_v29 }
  0x77   : > { %477 = vst.msk [vmem:[#allocation3 + $0xc0] sm:$0xff] %vm452_vm1, %v6409_v29 }
  0x78   : > { %478 = vst.msk [vmem:[#allocation3 + $0xc8] sm:$0xff] %vm452_vm1, %v6409_v29 }
  0x79   : > { %479 = vst.msk [vmem:[#allocation3 + $0xd0] sm:$0xff] %vm452_vm1, %v6409_v29  ;;  %v6277_v35 = vpop.permute.xlu2 %6276 }
  0x7a   : > { %480 = vst.msk [vmem:[#allocation3 + $0xd8] sm:$0xff] %vm452_vm1, %v6409_v29  ;;  %v6278_v41 = vunpack.i.l.bf16 %v6277_v35  ;;  %v6279_v42 = vunpack.i.h.bf16 %v6277_v35 }
  0x7b   : > { %481 = vst.msk [vmem:[#allocation3 + $0xe0] sm:$0xff] %vm452_vm1, %v6409_v29 }
  0x7c   : > { %482 = vst.msk [vmem:[#allocation3 + $0xe8] sm:$0xff] %vm452_vm1, %v6409_v29 }
  0x7d   : > { %483 = vst.msk [vmem:[#allocation3 + $0xf0] sm:$0xff] %vm452_vm1, %v6409_v29 }
  0x7e   : > { %484 = vst.msk [vmem:[#allocation3 + $0xf8] sm:$0xff] %vm452_vm1, %v6409_v29 }
  0x7f   : > { %485 = vst.msk [vmem:[#allocation3 + $0x100] sm:$0xff] %vm452_vm1, %v6409_v29 }
  0x80   : > { %486 = vst.msk [vmem:[#allocation3 + $0x108] sm:$0xff] %vm452_vm1, %v6409_v29 }
  0x81   : > { %487 = vst.msk [vmem:[#allocation3 + $0x110] sm:$0xff] %vm452_vm1, %v6409_v29  ;;  %v6282_v49 = vpop.permute.xlu2 %6281 }
  0x82   : > { %488 = vst.msk [vmem:[#allocation3 + $0x118] sm:$0xff] %vm452_vm1, %v6409_v29 }
  0x83   : > { %489 = vst.msk [vmem:[#allocation3 + $0x120] sm:$0xff] %vm452_vm1, %v6409_v29 }
  0x84   : > { %490 = vst.msk [vmem:[#allocation3 + $0x128] sm:$0xff] %vm452_vm1, %v6409_v29 }
  0x85   : > { %491 = vst.msk [vmem:[#allocation3 + $0x130] sm:$0xff] %vm452_vm1, %v6409_v29 }
  0x86   : > { %492 = vst.msk [vmem:[#allocation3 + $0x138] sm:$0xff] %vm452_vm1, %v6409_v29 }
  0x87   : > { %493 = vst.msk [vmem:[#allocation3 + $0x140] sm:$0xff] %vm452_vm1, %v6409_v29 }
  0x88   : > { %494 = vst.msk [vmem:[#allocation3 + $0x148] sm:$0xff] %vm452_vm1, %v6409_v29 }
  0x89   : > { %495 = vst.msk [vmem:[#allocation3 + $0x150] sm:$0xff] %vm452_vm1, %v6409_v29  ;;  %v6297_v11 = vpop.permute.xlu2 %6296 }
  0x8a   : > { %496 = vst.msk [vmem:[#allocation3 + $0x158] sm:$0xff] %vm452_vm1, %v6409_v29  ;;  %v6298_v21 = vunpack.i.l.bf16 %v6297_v11  ;;  %v6299_v22 = vunpack.i.h.bf16 %v6297_v11 }
  0x8b   : > { %497 = vst.msk [vmem:[#allocation3 + $0x160] sm:$0xff] %vm452_vm1, %v6409_v29 }
  0x8c   : > { %498 = vst.msk [vmem:[#allocation3 + $0x168] sm:$0xff] %vm452_vm1, %v6409_v29 }
  0x8d   : > { %499 = vst.msk [vmem:[#allocation3 + $0x170] sm:$0xff] %vm452_vm1, %v6409_v29 }
  0x8e   : > { %500 = vst.msk [vmem:[#allocation3 + $0x178] sm:$0xff] %vm452_vm1, %v6409_v29 }
  0x8f   : > { %501 = vst.msk [vmem:[#allocation3 + $0x180] sm:$0xff] %vm452_vm1, %v6409_v29 }
  0x90   : > { %v6257_v8 = vpop.permute.xlu0 %6256  ;;  %502 = vst.msk [vmem:[#allocation3 + $0x188] sm:$0xff] %vm452_vm1, %v6409_v29  ;;  %v6267_v25 = vpop.permute.xlu1 %6266 }
  0x91   : > { %v6259_v9 = vunpack.i.h.bf16 %v6257_v8  ;;  %v6258_v10 = vunpack.i.l.bf16 %v6257_v8  ;;  %503 = vst.msk [vmem:[#allocation3 + $0x190] sm:$0xff] %vm452_vm1, %v6409_v29  ;;  %v6268_v30 = vunpack.i.l.bf16 %v6267_v25  ;;  %v6269_v31 = vunpack.i.h.bf16 %v6267_v25  ;;  %v6178_v8 = vld [vmem:[%s6726_s28 + $0x18] sm:$0xff]  }
  0x92   : > { %504 = vst.msk [vmem:[#allocation3 + $0x198] sm:$0xff] %vm452_vm1, %v6409_v29  ;;  %v6062_v13 = vunpack.c.l.bf16 %v6178_v8 }
  0x93   : > { %829 = vst.msk [vmem:[#allocation2 + $0x108] sm:$0xff] %vm814_vm2, %v6258_v10  ;;  %v6284_v10 = vunpack.i.h.bf16 %v6282_v49 }
  0x94   : > { %830 = vst.msk [vmem:[#allocation2 + $0x110] sm:$0xff] %vm814_vm2, %v6259_v9  ;;  %v6283_v9 = vunpack.i.l.bf16 %v6282_v49 }
  0x95   : > { %505 = vst.msk [vmem:[#allocation3 + $0x1a0] sm:$0xff] %vm452_vm1, %v6409_v29 }
  0x96   : > { %506 = vst.msk [vmem:[#allocation3 + $0x1a8] sm:$0xff] %vm452_vm1, %v6409_v29 }
  0x97   : > { %507 = vst.msk [vmem:[#allocation3 + $0x1b0] sm:$0xff] %vm452_vm1, %v6409_v29 }
  0x98   : > { %508 = vst.msk [vmem:[#allocation3 + $0x1b8] sm:$0xff] %vm452_vm1, %v6409_v29  ;;  %v6262_v32 = vpop.permute.xlu0 %6261  ;;  %v6272_v56 = vpop.permute.xlu1 %6271 }
  0x99   : > { %509 = vst.msk [vmem:[#allocation3 + $0x1c0] sm:$0xff] %vm452_vm1, %v6409_v29  ;;  %v6263_v37 = vunpack.i.l.bf16 %v6262_v32  ;;  %v6264_v38 = vunpack.i.h.bf16 %v6262_v32  ;;  %v6273_v0 = vunpack.i.l.bf16 %v6272_v56  ;;  %v6274_v4 = vunpack.i.h.bf16 %v6272_v56 }
  0x9a   : > { %v917_v15 = vld [vmem:[#allocation2 + $0x108] sm:$0xff]  ;;  %510 = vst.msk [vmem:[#allocation3 + $0x1c8] sm:$0xff] %vm452_vm1, %v6409_v29 }
  0x9b   : > { %v918_v16 = vld [vmem:[#allocation2 + $0x110] sm:$0xff]  ;;  %v863_v17 = vld [vmem:[#allocation2 + $0x107] sm:$0xff]  ;;  %511 = vst.msk [vmem:[#allocation3 + $0x1d0] sm:$0xff] %vm452_vm1, %v6409_v29 }
  0x9c   : > { %v6837_v18 = vpack.c.bf16 %v918_v16, %v917_v15  ;;  %v864_v19 = vld [vmem:[#allocation2 + $0x10f] sm:$0xff]  ;;  %512 = vst.msk [vmem:[#allocation3 + $0x1d8] sm:$0xff] %vm452_vm1, %v6409_v29  ;;  %v6063_v15 = vunpack.c.h.bf16 %v6178_v8  ;;  %v6186_v16 = vld [vmem:[%s6726_s28 + $0x58] sm:$0xff]   ;;  %v6312_v8 = vpop.permute.xlu2 %6311 }
  0x9d   : > { %v887_v20 = vpack.c.bf16 %v864_v19, %v863_v17  ;;  %513 = vst.msk [vmem:[#allocation3 + $0x1e0] sm:$0xff] %vm452_vm1, %v6409_v29  ;;  %v6094_v23 = vunpack.c.l.bf16 %v6186_v16  ;;  %v6314_v11 = vunpack.i.h.bf16 %v6312_v8 }
  0x9e   : > { %5473 = vmatmul.msk.bf16.vlgmr.msra.gmra.mxu2 %vm379_vm0, %v6837_v18  ;;  %514 = vst.msk [vmem:[#allocation3 + $0x1e8] sm:$0xff] %vm452_vm1, %v6409_v29 }
  0x9f   : > { %5501 = vmatmul.msk.bf16.vlgmr.msra.gmra.mxu3 %vm379_vm0, %v887_v20  ;;  %515 = vst.msk [vmem:[#allocation3 + $0x1f0] sm:$0xff] %vm452_vm1, %v6409_v29 }
  0xa0   : > { %516 = vst.msk [vmem:[#allocation3 + $0x1f8] sm:$0xff] %vm452_vm1, %v6409_v29  ;;  %v6287_v43 = vpop.permute.xlu0 %6286  ;;  %v6292_v12 = vpop.permute.xlu1 %6291 }
  0xa1   : > { %517 = vst.msk [vmem:[#allocation3 + $0x200] sm:$0xff] %vm452_vm1, %v6409_v29  ;;  %v6288_v52 = vunpack.i.l.bf16 %v6287_v43  ;;  %v6289_v55 = vunpack.i.h.bf16 %v6287_v43  ;;  %v6293_v32 = vunpack.i.l.bf16 %v6292_v12 }
  0xa2   : > { %518 = vst.msk [vmem:[#allocation3 + $0x208] sm:$0xff] %vm452_vm1, %v6409_v29 }
  0xa3   : > { %519 = vst.msk [vmem:[#allocation3 + $0x210] sm:$0xff] %vm452_vm1, %v6409_v29 }
  0xa4   : > { %520 = vst.msk [vmem:[#allocation3 + $0x218] sm:$0xff] %vm452_vm1, %v6409_v29 }
  0xa5   : > { %521 = vst.msk [vmem:[#allocation3 + $0x220] sm:$0xff] %vm452_vm1, %v6409_v29 }
  0xa6   : > { %522 = vst.msk [vmem:[#allocation3 + $0x228] sm:$0xff] %vm452_vm1, %v6409_v29 }
  0xa7   : > { %523 = vst.msk [vmem:[#allocation3 + $0x230] sm:$0xff] %vm452_vm1, %v6409_v29 }
  0xa8   : > { %524 = vst.msk [vmem:[#allocation3 + $0x238] sm:$0xff] %vm452_vm1, %v6409_v29  ;;  %v6054_v29 = vunpack.c.l.bf16 %v6176_v36  ;;  %v6307_v36 = vpop.permute.xlu1 %6306 }
  0xa9   : > { %590 = vst.msk [vmem:[#allocation2 + $0x28] sm:$0xff] %vm452_vm1, %v6050_v26 }
  0xaa   : > { %591 = vst.msk [vmem:[#allocation2 + $0x30] sm:$0xff] %vm452_vm1, %v6051_v27  ;;  %v6095_v27 = vunpack.c.h.bf16 %v6186_v16 }
  0xab   : > { %815 = vst.msk [vmem:[#allocation2 + $0x28] sm:$0xff] %vm814_vm2, %v6268_v30 }
  0xac   : > { %816 = vst.msk [vmem:[#allocation2 + $0x30] sm:$0xff] %vm814_vm2, %v6269_v31 }
  0xad   : > { %606 = vst.msk [vmem:[#allocation2 + $0x128] sm:$0xff] %vm452_vm1, %v6082_v33  ;;  %v6294_v33 = vunpack.i.h.bf16 %v6292_v12 }
  0xae   : > { %607 = vst.msk [vmem:[#allocation2 + $0x130] sm:$0xff] %vm452_vm1, %v6083_v34 }
  0xaf   : > { %831 = vst.msk [vmem:[#allocation2 + $0x128] sm:$0xff] %vm814_vm2, %v6263_v37  ;;  %v6179_v37 = vld [vmem:[%s6726_s28 + $0x20] sm:$0xff]  }
  0xb0   : > { %832 = vst.msk [vmem:[#allocation2 + $0x130] sm:$0xff] %vm814_vm2, %v6264_v38  ;;  %v6308_v38 = vunpack.i.l.bf16 %v6307_v36 }
  0xb1   : > { %592 = vst.msk [vmem:[#allocation2 + $0x48] sm:$0xff] %vm452_vm1, %v6054_v29  ;;  %v6066_v29 = vunpack.c.l.bf16 %v6179_v37 }
  0xb2   : > { %v903_v45 = vld [vmem:[#allocation2 + $0x28] sm:$0xff]  ;;  %593 = vst.msk [vmem:[#allocation2 + $0x50] sm:$0xff] %vm452_vm1, %v6055_v39  ;;  %v6067_v39 = vunpack.c.h.bf16 %v6179_v37 }
  0xb3   : > { %v849_v46 = vld [vmem:[#allocation2 + $0x27] sm:$0xff]  ;;  %v904_v50 = vld [vmem:[#allocation2 + $0x30] sm:$0xff]  ;;  %817 = vst.msk [vmem:[#allocation2 + $0x48] sm:$0xff] %vm814_vm2, %v6278_v41  ;;  %v6309_v41 = vunpack.i.h.bf16 %v6307_v36 }
  0xb4   : > { %v850_v51 = vld [vmem:[#allocation2 + $0x2f] sm:$0xff]  ;;  %v6907_v53 = vpack.c.bf16 %v904_v50, %v903_v45  ;;  %818 = vst.msk [vmem:[#allocation2 + $0x50] sm:$0xff] %vm814_vm2, %v6279_v42  ;;  %v6187_v42 = vld [vmem:[%s6726_s28 + $0x60] sm:$0xff]  }
  0xb5   : > { %v6909_v54 = vpack.c.bf16 %v850_v51, %v849_v46  ;;  %594 = vst.msk [vmem:[#allocation2 + $0x68] sm:$0xff] %vm452_vm1, %v6058_v44  ;;  %v6098_v43 = vunpack.c.l.bf16 %v6187_v42  ;;  %v6302_v44 = vpop.permute.xlu0 %6301  ;;  %v6099_v45 = vunpack.c.h.bf16 %v6187_v42 }
  0xb6   : > { %5466 = vmatmul.msk.bf16.gmra.mxu0 %vm379_vm0, %v6907_v53  ;;  %v919_v58 = vld [vmem:[#allocation2 + $0x128] sm:$0xff]  ;;  %595 = vst.msk [vmem:[#allocation2 + $0x70] sm:$0xff] %vm452_vm1, %v6059_v47  ;;  %v6303_v46 = vunpack.i.l.bf16 %v6302_v44  ;;  %v6304_v47 = vunpack.i.h.bf16 %v6302_v44 }
  0xb7   : > { %5494 = vmatmul.msk.bf16.gmra.mxu1 %vm379_vm0, %v6909_v54  ;;  %v865_v59 = vld [vmem:[#allocation2 + $0x127] sm:$0xff]  ;;  %v920_v62 = vld [vmem:[#allocation2 + $0x130] sm:$0xff]  ;;  %819 = vst.msk [vmem:[#allocation2 + $0x68] sm:$0xff] %vm814_vm2, %v6288_v52 }
  0xb8   : > { %v866_v63 = vld [vmem:[#allocation2 + $0x12f] sm:$0xff]  ;;  %v6923_v2 = vpack.c.bf16 %v920_v62, %v919_v58  ;;  %820 = vst.msk [vmem:[#allocation2 + $0x70] sm:$0xff] %vm814_vm2, %v6289_v55 }
  0xb9   : > { %v6925_v3 = vpack.c.bf16 %v866_v63, %v865_v59  ;;  %608 = vst.msk [vmem:[#allocation2 + $0x148] sm:$0xff] %vm452_vm1, %v6086_v57  ;;  %v6180_v63 = vld [vmem:[%s6726_s28 + $0x28] sm:$0xff]  }
  0xba   : > { %5474 = vmatmul.msk.bf16.gmra.mxu2 %vm379_vm0, %v6923_v2  ;;  %609 = vst.msk [vmem:[#allocation2 + $0x150] sm:$0xff] %vm452_vm1, %v6087_v60  ;;  %v905_v14 = vld [vmem:[#allocation2 + $0x48] sm:$0xff]  ;;  %v6071_v5 = vunpack.c.h.bf16 %v6180_v63 }
  0xbb   : > { %5502 = vmatmul.msk.bf16.gmra.mxu3 %vm379_vm0, %v6925_v3  ;;  %833 = vst.msk [vmem:[#allocation2 + $0x148] sm:$0xff] %vm814_vm2, %v6273_v0  ;;  %v906_v17 = vld [vmem:[#allocation2 + $0x50] sm:$0xff]  ;;  %v851_v19 = vld [vmem:[#allocation2 + $0x47] sm:$0xff] }
  0xbc   : > { %834 = vst.msk [vmem:[#allocation2 + $0x150] sm:$0xff] %vm814_vm2, %v6274_v4  ;;  %v852_v20 = vld [vmem:[#allocation2 + $0x4f] sm:$0xff]  ;;  %v6946_v24 = vpack.c.bf16 %v906_v17, %v905_v14  ;;  %v6070_v4 = vunpack.c.l.bf16 %v6180_v63  ;;  %v1186_v63 = vpop.f32.mrf.mxu1 }
  0xbd   : > { %610 = vst.msk [vmem:[#allocation2 + $0x168] sm:$0xff] %vm452_vm1, %v6090_v6  ;;  %v6948_v25 = vpack.c.bf16 %v852_v20, %v851_v19  ;;  %v6317_v62 = vpop.permute.xlu0 %6316  ;;  %v6188_v0 = vld [vmem:[%s6726_s28 + $0x68] sm:$0xff]  }
  0xbe   : > { %611 = vst.msk [vmem:[#allocation2 + $0x170] sm:$0xff] %vm452_vm1, %v6091_v7  ;;  %v907_v48 = vld [vmem:[#allocation2 + $0x68] sm:$0xff]  ;;  %v6318_v1 = vunpack.i.l.bf16 %v6317_v62  ;;  %v6319_v6 = vunpack.i.h.bf16 %v6317_v62  ;;  %v6102_v7 = vunpack.c.l.bf16 %v6188_v0  ;;  %v1031_v62 = vpop.f32.mrf.mxu0 }
  0xbf   : > { %835 = vst.msk [vmem:[#allocation2 + $0x168] sm:$0xff] %vm814_vm2, %v6283_v9  ;;  %v908_v49 = vld [vmem:[#allocation2 + $0x70] sm:$0xff]  ;;  %v853_v50 = vld [vmem:[#allocation2 + $0x67] sm:$0xff]  ;;  %v6103_v9 = vunpack.c.h.bf16 %v6188_v0 }
  0xc0   : > { %836 = vst.msk [vmem:[#allocation2 + $0x170] sm:$0xff] %vm814_vm2, %v6284_v10  ;;  %v854_v51 = vld [vmem:[#allocation2 + $0x6f] sm:$0xff]  ;;  %v6982_v52 = vpack.c.bf16 %v908_v49, %v907_v48  ;;  %v6313_v10 = vunpack.i.l.bf16 %v6312_v8  ;;  %v6014_v49 = vld [vmem:[%s8690_s2 + $0x60] sm:$0xff] }
  0xc1   : > { %596 = vst.msk [vmem:[#allocation2 + $0x88] sm:$0xff] %vm452_vm1, %v6062_v13  ;;  %v6984_v55 = vpack.c.bf16 %v854_v51, %v853_v50  ;;  %v6322_v50 = vpop.permute.xlu1 %6321  ;;  %v6189_v51 = vld [vmem:[%s6726_s28 + $0x70] sm:$0xff]   ;;  %1878 = vmatpush.bf16.msrb.mxu0 %v6014_v49 }
  0xc2   : > { %v921_v26 = vld [vmem:[#allocation2 + $0x148] sm:$0xff]  ;;  %597 = vst.msk [vmem:[#allocation2 + $0x90] sm:$0xff] %vm452_vm1, %v6063_v15  ;;  %v6324_v0 = vunpack.i.h.bf16 %v6322_v50 }
  0xc3   : > { %v922_v28 = vld [vmem:[#allocation2 + $0x150] sm:$0xff]  ;;  %v867_v30 = vld [vmem:[#allocation2 + $0x147] sm:$0xff]  ;;  %821 = vst.msk [vmem:[#allocation2 + $0x88] sm:$0xff] %vm814_vm2, %v6298_v21 }
  0xc4   : > { %v868_v31 = vld [vmem:[#allocation2 + $0x14f] sm:$0xff]  ;;  %822 = vst.msk [vmem:[#allocation2 + $0x90] sm:$0xff] %vm814_vm2, %v6299_v22  ;;  %v6958_v34 = vpack.c.bf16 %v922_v28, %v921_v26 }
  0xc5   : > { %612 = vst.msk [vmem:[#allocation2 + $0x188] sm:$0xff] %vm452_vm1, %v6094_v23  ;;  %v6960_v35 = vpack.c.bf16 %v868_v31, %v867_v30  ;;  %v6008_v28 = vld [vmem:[%s8690_s2 + $0x30] sm:$0xff]  ;;  %v6011_v30 = vld [vmem:[%s8690_s2 + $0x48] sm:$0xff] }
  0xc6   : > { %5467 = vmatmul.msk.bf16.gmra.mxu0 %vm379_vm0, %v6946_v24  ;;  %613 = vst.msk [vmem:[#allocation2 + $0x190] sm:$0xff] %vm452_vm1, %v6095_v27  ;;  %v923_v56 = vld [vmem:[#allocation2 + $0x168] sm:$0xff]  ;;  %v6181_v27 = vld [vmem:[%s6726_s28 + $0x30] sm:$0xff]   ;;  %1394 = vmatpush.bf16.msrb.mxu2 %v6008_v28 }
  0xc7   : > { %5495 = vmatmul.msk.bf16.gmra.mxu1 %vm379_vm0, %v6948_v25  ;;  %837 = vst.msk [vmem:[#allocation2 + $0x188] sm:$0xff] %vm814_vm2, %v6293_v32  ;;  %v924_v57 = vld [vmem:[#allocation2 + $0x170] sm:$0xff]  ;;  %v869_v58 = vld [vmem:[#allocation2 + $0x167] sm:$0xff]  ;;  %v6074_v31 = vunpack.c.l.bf16 %v6181_v27  ;;  %v6075_v32 = vunpack.c.h.bf16 %v6181_v27  ;;  %1636 = vmatpush.bf16.msrb.mxu3 %v6011_v30 }
  0xc8   : > { %838 = vst.msk [vmem:[#allocation2 + $0x190] sm:$0xff] %vm814_vm2, %v6294_v33  ;;  %v870_v59 = vld [vmem:[#allocation2 + $0x16f] sm:$0xff]  ;;  %v6990_v60 = vpack.c.bf16 %v924_v57, %v923_v56  ;;  %v6327_v33 = vpop.permute.xlu2 %6326  ;;  %v6323_v57 = vunpack.i.l.bf16 %v6322_v50 }
  0xc9   : > { %598 = vst.msk [vmem:[#allocation2 + $0xa8] sm:$0xff] %vm452_vm1, %v6066_v29  ;;  %v6992_v61 = vpack.c.bf16 %v870_v59, %v869_v58  ;;  %v6329_v36 = vunpack.i.h.bf16 %v6327_v33  ;;  %v6328_v37 = vunpack.i.l.bf16 %v6327_v33  ;;  %v6019_v56 = vld [vmem:[%s8690_s2 + $0x88] sm:$0xff]  ;;  %v6106_v58 = vunpack.c.l.bf16 %v6189_v51  ;;  %v1993_v50 = vld [vmem:[#allocation2 + $0x31] sm:$0xff] }
  0xca   : > { %5475 = vmatmul.msk.bf16.gmra.mxu2 %vm379_vm0, %v6958_v34  ;;  %599 = vst.msk [vmem:[#allocation2 + $0xb0] sm:$0xff] %vm452_vm1, %v6067_v39  ;;  %v909_v12 = vld [vmem:[#allocation2 + $0x88] sm:$0xff]  ;;  %v6107_v59 = vunpack.c.h.bf16 %v6189_v51  ;;  %2118 = vmatpush.bf16.msrb.mxu1 %v6019_v56  ;;  %v1267_v56 = vld [vmem:[#allocation2 + $0x11] sm:$0xff] }
  0xcb   : > { %5503 = vmatmul.msk.bf16.gmra.mxu3 %vm379_vm0, %v6960_v35  ;;  %823 = vst.msk [vmem:[#allocation2 + $0xa8] sm:$0xff] %vm814_vm2, %v6308_v38  ;;  %v910_v13 = vld [vmem:[#allocation2 + $0x90] sm:$0xff]  ;;  %v855_v14 = vld [vmem:[#allocation2 + $0x87] sm:$0xff] }
  0xcc   : > { %824 = vst.msk [vmem:[#allocation2 + $0xb0] sm:$0xff] %vm814_vm2, %v6309_v41  ;;  %v856_v15 = vld [vmem:[#allocation2 + $0x8f] sm:$0xff]  ;;  %v7008_v16 = vpack.c.bf16 %v910_v13, %v909_v12 }
  0xcd   : > { %614 = vst.msk [vmem:[#allocation2 + $0x1a8] sm:$0xff] %vm452_vm1, %v6098_v43  ;;  %v7010_v17 = vpack.c.bf16 %v856_v15, %v855_v14  ;;  %v1992_v49 = vld [vmem:[#allocation2 + $0x29] sm:$0xff] }
  0xce   : > { %615 = vst.msk [vmem:[#allocation2 + $0x1b0] sm:$0xff] %vm452_vm1, %v6099_v45  ;;  %v925_v19 = vld [vmem:[#allocation2 + $0x188] sm:$0xff] }
  0xcf   : > { %839 = vst.msk [vmem:[#allocation2 + $0x1a8] sm:$0xff] %vm814_vm2, %v6303_v46  ;;  %v926_v20 = vld [vmem:[#allocation2 + $0x190] sm:$0xff]  ;;  %v871_v21 = vld [vmem:[#allocation2 + $0x187] sm:$0xff] }
  0xd0   : > { %840 = vst.msk [vmem:[#allocation2 + $0x1b0] sm:$0xff] %vm814_vm2, %v6304_v47  ;;  %v872_v22 = vld [vmem:[#allocation2 + $0x18f] sm:$0xff]  ;;  %v7016_v23 = vpack.c.bf16 %v926_v20, %v925_v19 }
  0xd1   : > { %600 = vst.msk [vmem:[#allocation2 + $0xc8] sm:$0xff] %vm452_vm1, %v6070_v4  ;;  %v7018_v26 = vpack.c.bf16 %v872_v22, %v871_v21  ;;  %v7057_v4 = vadd.f32 %v1186_v63, %v1031_v62  ;;  %v1266_v51 = vld [vmem:[#allocation2 + $0x9] sm:$0xff]  ;;  %v7118_v62 = vpop.f32.mrf.mxu1 }
  0xd2   : > { %601 = vst.msk [vmem:[#allocation2 + $0xd0] sm:$0xff] %vm452_vm1, %v6071_v5  ;;  %v911_v38 = vld [vmem:[#allocation2 + $0xa8] sm:$0xff]  ;;  %v6017_v5 = vld [vmem:[%s8690_s2 + $0x78] sm:$0xff] }
  0xd3   : > { %825 = vst.msk [vmem:[#allocation2 + $0xc8] sm:$0xff] %vm814_vm2, %v6318_v1  ;;  %v912_v29 = vld [vmem:[#allocation2 + $0xb0] sm:$0xff]  ;;  %v857_v39 = vld [vmem:[#allocation2 + $0xa7] sm:$0xff] }
  0xd4   : > { %826 = vst.msk [vmem:[#allocation2 + $0xd0] sm:$0xff] %vm814_vm2, %v6319_v6  ;;  %v858_v40 = vld [vmem:[#allocation2 + $0xaf] sm:$0xff]  ;;  %v7035_v41 = vpack.c.bf16 %v912_v29, %v911_v38  ;;  %v6018_v1 = vld [vmem:[%s8690_s2 + $0x80] sm:$0xff] }
  0xd5   : > { %616 = vst.msk [vmem:[#allocation2 + $0x1c8] sm:$0xff] %vm452_vm1, %v6102_v7  ;;  %v7037_v42 = vpack.c.bf16 %v858_v40, %v857_v39  ;;  %2119 = vmatpush.bf16.msrb.mxu1 %v6018_v1  ;;  %v6022_v39 = vld [vmem:[%s8690_s2 + $0xa0] sm:$0xff]  ;;  %v6025_v40 = vld [vmem:[%s8690_s2 + $0xb8] sm:$0xff]  ;;  %v1994_v63 = vld [vmem:[#allocation2 + $0x49] sm:$0xff] }
  0xd6   : > { %5468 = vmatmul.msk.bf16.gmra.mxu0 %vm379_vm0, %v6982_v52  ;;  %617 = vst.msk [vmem:[#allocation2 + $0x1d0] sm:$0xff] %vm452_vm1, %v6103_v9  ;;  %v927_v43 = vld [vmem:[#allocation2 + $0x1a8] sm:$0xff]  ;;  %2361 = vmatpush.bf16.msra.mxu2 %v6022_v39 }
  0xd7   : > { %5496 = vmatmul.msk.bf16.gmra.mxu1 %vm379_vm0, %v6984_v55  ;;  %841 = vst.msk [vmem:[#allocation2 + $0x1c8] sm:$0xff] %vm814_vm2, %v6313_v10  ;;  %v928_v44 = vld [vmem:[#allocation2 + $0x1b0] sm:$0xff]  ;;  %v873_v45 = vld [vmem:[#allocation2 + $0x1a7] sm:$0xff]  ;;  %2603 = vmatpush.bf16.msra.mxu3 %v6025_v40 }
  0xd8   : > { %842 = vst.msk [vmem:[#allocation2 + $0x1d0] sm:$0xff] %vm814_vm2, %v6314_v11  ;;  %v874_v46 = vld [vmem:[#allocation2 + $0x1af] sm:$0xff]  ;;  %v7043_v47 = vpack.c.bf16 %v928_v44, %v927_v43 }
  0xd9   : > { %602 = vst.msk [vmem:[#allocation2 + $0xe8] sm:$0xff] %vm452_vm1, %v6074_v31  ;;  %v7045_v48 = vpack.c.bf16 %v874_v46, %v873_v45  ;;  %2120 = vmatpush.bf16.msrb.mxu1 %v6017_v5  ;;  %v6028_v46 = vld [vmem:[%s8690_s2 + $0xd0] sm:$0xff] }
  0xda   : > { %5476 = vmatmul.msk.bf16.gmra.mxu2 %vm379_vm0, %v6990_v60  ;;  %603 = vst.msk [vmem:[#allocation2 + $0xf0] sm:$0xff] %vm452_vm1, %v6075_v32  ;;  %v913_v6 = vld [vmem:[#allocation2 + $0xc8] sm:$0xff]  ;;  %2845 = vmatpush.bf16.msra.mxu0 %v6028_v46 }
  0xdb   : > { %5504 = vmatmul.msk.bf16.gmra.mxu3 %vm379_vm0, %v6992_v61  ;;  %827 = vst.msk [vmem:[#allocation2 + $0xe8] sm:$0xff] %vm814_vm2, %v6328_v37  ;;  %v914_v7 = vld [vmem:[#allocation2 + $0xd0] sm:$0xff]  ;;  %v859_v8 = vld [vmem:[#allocation2 + $0xc7] sm:$0xff] }
  0xdc   : > { %828 = vst.msk [vmem:[#allocation2 + $0xf0] sm:$0xff] %vm814_vm2, %v6329_v36  ;;  %v860_v9 = vld [vmem:[#allocation2 + $0xcf] sm:$0xff]  ;;  %v7070_v10 = vpack.c.bf16 %v914_v7, %v913_v6 }
  0xdd   : > { %618 = vst.msk [vmem:[#allocation2 + $0x1e8] sm:$0xff] %vm452_vm1, %v6106_v58  ;;  %v7072_v11 = vpack.c.bf16 %v860_v9, %v859_v8  ;;  %v1298_v58 = vpack.c.bf16 %v1267_v56, %v1266_v51 }
  0xde   : > { %619 = vst.msk [vmem:[#allocation2 + $0x1f0] sm:$0xff] %vm452_vm1, %v6107_v59  ;;  %v929_v12 = vld [vmem:[#allocation2 + $0x1c8] sm:$0xff]  ;;  %v7116_v59 = vpop.f32.mrf.mxu0 }
  0xdf   : > { %843 = vst.msk [vmem:[#allocation2 + $0x1e8] sm:$0xff] %vm814_vm2, %v6323_v57  ;;  %v930_v13 = vld [vmem:[#allocation2 + $0x1d0] sm:$0xff]  ;;  %v875_v14 = vld [vmem:[#allocation2 + $0x1c7] sm:$0xff]  ;;  %v2024_v57 = vpack.c.bf16 %v1993_v50, %v1992_v49 }
  0xe0   : > { %844 = vst.msk [vmem:[#allocation2 + $0x1f0] sm:$0xff] %vm814_vm2, %v6324_v0  ;;  %v876_v15 = vld [vmem:[#allocation2 + $0x1cf] sm:$0xff]  ;;  %v7078_v19 = vpack.c.bf16 %v930_v13, %v929_v12 }
  0xe1   : > { %v7080_v20 = vpack.c.bf16 %v876_v15, %v875_v14  ;;  %v1995_v0 = vld [vmem:[#allocation2 + $0x51] sm:$0xff] }
  0xe2   : > { %v915_v21 = vld [vmem:[#allocation2 + $0xe8] sm:$0xff]  ;;  %v7129_v8 = vpack.c.bf16 %v1995_v0, %v1994_v63  ;;  %v1999_v49 = vld [vmem:[#allocation2 + $0x91] sm:$0xff] }
  0xe3   : > { %v916_v22 = vld [vmem:[#allocation2 + $0xf0] sm:$0xff]  ;;  %v861_v27 = vld [vmem:[#allocation2 + $0xe7] sm:$0xff] }
  0xe4   : > { %v862_v28 = vld [vmem:[#allocation2 + $0xef] sm:$0xff]  ;;  %v7086_v30 = vpack.c.bf16 %v916_v22, %v915_v21 }
  0xe5   : > { %v7088_v31 = vpack.c.bf16 %v862_v28, %v861_v27  ;;  %v1996_v21 = vld [vmem:[#allocation2 + $0x69] sm:$0xff]  ;;  %v1997_v22 = vld [vmem:[#allocation2 + $0x71] sm:$0xff] }
  0xe6   : > { %5469 = vmatmul.msk.bf16.gmra.mxu0 %vm379_vm0, %v7008_v16  ;;  %v931_v32 = vld [vmem:[#allocation2 + $0x1e8] sm:$0xff] }
  0xe7   : > { %5497 = vmatmul.msk.bf16.gmra.mxu1 %vm379_vm0, %v7010_v17  ;;  %v932_v33 = vld [vmem:[#allocation2 + $0x1f0] sm:$0xff]  ;;  %v877_v36 = vld [vmem:[#allocation2 + $0x1e7] sm:$0xff] }
  0xe8   : > { %v878_v37 = vld [vmem:[#allocation2 + $0x1ef] sm:$0xff]  ;;  %v7094_v38 = vpack.c.bf16 %v932_v33, %v931_v32  ;;  %v7144_v32 = vpack.c.bf16 %v1997_v22, %v1996_v21 }
  0xe9   : > { %v7096_v29 = vpack.c.bf16 %v878_v37, %v877_v36 }
  0xea   : > { %5477 = vmatmul.msk.bf16.gmra.mxu2 %vm379_vm0, %v7016_v23 }
  0xeb   : > { %5505 = vmatmul.msk.bf16.gmra.mxu3 %vm379_vm0, %v7018_v26 }
  0xf6   : > { %5470 = vmatmul.msk.bf16.gmra.mxu0 %vm379_vm0, %v7035_v41 }
  0xf7   : > { %5498 = vmatmul.msk.bf16.gmra.mxu1 %vm379_vm0, %v7037_v42 }
  0xfa   : > { %5478 = vmatmul.msk.bf16.gmra.mxu2 %vm379_vm0, %v7043_v47 }
  0xfb   : > { %5506 = vmatmul.msk.bf16.gmra.mxu3 %vm379_vm0, %v7045_v48 }
 0x106   : > { %5471 = vmatmul.msk.bf16.gmra.mxu0 %vm379_vm0, %v7070_v10 }
 0x107   : > { %5499 = vmatmul.msk.bf16.gmra.mxu1 %vm379_vm0, %v7072_v11 }
 0x10a   : > { %5479 = vmatmul.msk.bf16.gmra.mxu2 %vm379_vm0, %v7078_v19 }
 0x10b   : > { %5507 = vmatmul.msk.bf16.gmra.mxu3 %vm379_vm0, %v7080_v20 }
 0x116   : > { %5472 = vmatmul.msk.bf16.gmra.mxu0 %vm379_vm0, %v7086_v30 }
 0x117   : > { %5500 = vmatmul.msk.bf16.gmra.mxu1 %vm379_vm0, %v7088_v31 }
 0x11a   : > { %5480 = vmatmul.msk.bf16.gmra.mxu2 %vm379_vm0, %v7094_v38 }
 0x11b   : > { %5508 = vmatmul.msk.bf16.gmra.mxu3 %vm379_vm0, %v7096_v29 }
 0x121   : > { %v1071_v43 = vpop.f32.mrf.mxu2 }
 0x122   : > { %v1226_v44 = vpop.f32.mrf.mxu3 }
 0x123   : > { %v7108_v45 = vadd.f32 %v1226_v44, %v1071_v43 }
 0x126   : > { %5595 = vmatmul.msk.bf16.vlgmr.msrb.gmra.mxu0 %vm379_vm0, %v6907_v53 }
 0x127   : > { %5629 = vmatmul.msk.bf16.vlgmr.msrb.gmra.mxu1 %vm379_vm0, %v2024_v57 }
 0x129   : > { %v7123_v1 = vpop.f32.mrf.mxu2 }
 0x12a   : > { %5527 = vmatmul.msk.bf16.vlgmr.msrb.gmra.mxu2 %vm379_vm0, %v1298_v58  ;;  %v7125_v5 = vpop.f32.mrf.mxu3 }
 0x12b   : > { %5561 = vmatmul.msk.bf16.vlgmr.msrb.gmra.mxu3 %vm379_vm0, %v6909_v54 }
 0x133   : > { %v1036_v6 = vpop.f32.mrf.mxu0 }
 0x134   : > { %v1191_v53 = vpop.f32.mrf.mxu1 }
 0x135   : > { %v7127_v7 = vadd.f32 %v1191_v53, %v1036_v6 }
 0x136   : > { %5596 = vmatmul.msk.bf16.gmra.mxu0 %vm379_vm0, %v6946_v24 }
 0x137   : > { %5630 = vmatmul.msk.bf16.gmra.mxu1 %vm379_vm0, %v7129_v8 }
 0x13a   : > { %5528 = vmatmul.msk.bf16.gmra.mxu2 %vm379_vm0, %v2024_v57 }
 0x13b   : > { %5562 = vmatmul.msk.bf16.gmra.mxu3 %vm379_vm0, %v6948_v25  ;;  %v1038_v54 = vpop.f32.mrf.mxu0 }
 0x13c   : > { %v1193_v9 = vpop.f32.mrf.mxu1 }
 0x13d   : > { %v7138_v12 = vadd.f32 %v1193_v9, %v1038_v54  ;;  %v1076_v13 = vpop.f32.mrf.mxu2 }
 0x13e   : > { %v1231_v14 = vpop.f32.mrf.mxu3 }
 0x13f   : > { %v7140_v15 = vadd.f32 %v1231_v14, %v1076_v13  ;;  %v2001_v14 = vld [vmem:[#allocation2 + $0xb1] sm:$0xff] }
 0x143   : > { %v1041_v27 = vpop.f32.mrf.mxu0 }
 0x144   : > { %v1196_v24 = vpop.f32.mrf.mxu1 }
 0x145   : > { %v7142_v28 = vadd.f32 %v1196_v24, %v1041_v27  ;;  %v1078_v33 = vpop.f32.mrf.mxu2 }
 0x146   : > { %v1233_v36 = vpop.f32.mrf.mxu3  ;;  %5597 = vmatmul.msk.bf16.gmra.mxu0 %vm379_vm0, %v6982_v52  ;;  %v1998_v52 = vld [vmem:[#allocation2 + $0x89] sm:$0xff] }
 0x147   : > { %5631 = vmatmul.msk.bf16.gmra.mxu1 %vm379_vm0, %v7144_v32  ;;  %v7150_v25 = vadd.f32 %v1233_v36, %v1078_v33  ;;  %v7162_v57 = vpack.c.bf16 %v1999_v49, %v1998_v52 }
 0x14a   : > { %5529 = vmatmul.msk.bf16.gmra.mxu2 %vm379_vm0, %v7129_v8 }
 0x14b   : > { %5563 = vmatmul.msk.bf16.gmra.mxu3 %vm379_vm0, %v6984_v55  ;;  %v1043_v37 = vpop.f32.mrf.mxu0 }
 0x14c   : > { %v1198_v39 = vpop.f32.mrf.mxu1 }
 0x14d   : > { %v7156_v40 = vadd.f32 %v1198_v39, %v1043_v37  ;;  %v1081_v43 = vpop.f32.mrf.mxu2 }
 0x14e   : > { %v1236_v44 = vpop.f32.mrf.mxu3 }
 0x14f   : > { %v7158_v46 = vadd.f32 %v1236_v44, %v1081_v43  ;;  %v6024_v44 = vld [vmem:[%s8690_s2 + $0xb0] sm:$0xff] }
 0x150   : > { %2604 = vmatpush.bf16.msra.mxu3 %v6024_v44 }
 0x153   : > { %v1046_v50 = vpop.f32.mrf.mxu0 }
 0x154   : > { %v1201_v51 = vpop.f32.mrf.mxu1 }
 0x155   : > { %v7160_v56 = vadd.f32 %v1201_v51, %v1046_v50  ;;  %v1083_v58 = vpop.f32.mrf.mxu2  ;;  %v2002_v51 = vld [vmem:[#allocation2 + $0xc9] sm:$0xff] }
 0x156   : > { %v1238_v63 = vpop.f32.mrf.mxu3  ;;  %5598 = vmatmul.msk.bf16.gmra.mxu0 %vm379_vm0, %v7008_v16  ;;  %v2000_v16 = vld [vmem:[#allocation2 + $0xa9] sm:$0xff] }
 0x157   : > { %5632 = vmatmul.msk.bf16.gmra.mxu1 %vm379_vm0, %v7162_v57  ;;  %v7168_v55 = vadd.f32 %v1238_v63, %v1083_v58  ;;  %v7180_v24 = vpack.c.bf16 %v2001_v14, %v2000_v16  ;;  %v6205_v58 = vld [vmem:[%s6525_s29 + $0x78] sm:$0xff]   ;;  %s6364_s29 = scalar_lea.hbm %s8698_s10, 512 }
 0x15a   : > { %5530 = vmatmul.msk.bf16.gmra.mxu2 %vm379_vm0, %v7144_v32 }
 0x15b   : > { %5564 = vmatmul.msk.bf16.gmra.mxu3 %vm379_vm0, %v7010_v17  ;;  %v1048_v0 = vpop.f32.mrf.mxu0 }
 0x15c   : > { %v1203_v6 = vpop.f32.mrf.mxu1 }
 0x15d   : > { %v7174_v53 = vadd.f32 %v1203_v6, %v1048_v0  ;;  %v1086_v54 = vpop.f32.mrf.mxu2  ;;  %v6174_v6 = vunpack.c.l.bf16 %v6205_v58 }
 0x15e   : > { %v1241_v9 = vpop.f32.mrf.mxu3 }
 0x15f   : > { %v7176_v13 = vadd.f32 %v1241_v9, %v1086_v54  ;;  %v6175_v54 = vunpack.c.h.bf16 %v6205_v58 }
 0x163   : > { %v1051_v21 = vpop.f32.mrf.mxu0 }
 0x164   : > { %v1206_v22 = vpop.f32.mrf.mxu1 }
 0x165   : > { %v7178_v27 = vadd.f32 %v1206_v22, %v1051_v21  ;;  %v1088_v33 = vpop.f32.mrf.mxu2  ;;  %v6330_v22 = vpack.i.bf16 %v6175_v54, %v6174_v6 }
 0x166   : > { %v1243_v36 = vpop.f32.mrf.mxu3  ;;  %5599 = vmatmul.msk.bf16.gmra.mxu0 %vm379_vm0, %v7035_v41  ;;  %v6021_v41 = vld [vmem:[%s8690_s2 + $0x98] sm:$0xff] }
 0x167   : > { %5633 = vmatmul.msk.bf16.gmra.mxu1 %vm379_vm0, %v7180_v24  ;;  %v7186_v17 = vadd.f32 %v1243_v36, %v1088_v33  ;;  %2362 = vmatpush.bf16.msra.mxu2 %v6021_v41  ;;  %v6027_v36 = vld [vmem:[%s8690_s2 + $0xc8] sm:$0xff] }
 0x168   : > { %6331 = vrot.lane.b32.xlu0 %v6330_v22, %s6408_s30  ;;  %2846 = vmatpush.bf16.msra.mxu0 %v6027_v36 }
 0x16a   : > { %5531 = vmatmul.msk.bf16.gmra.mxu2 %vm379_vm0, %v7162_v57 }
 0x16b   : > { %5565 = vmatmul.msk.bf16.gmra.mxu3 %vm379_vm0, %v7037_v42  ;;  %v1053_v37 = vpop.f32.mrf.mxu0  ;;  %v2003_v42 = vld [vmem:[#allocation2 + $0xd1] sm:$0xff] }
 0x16c   : > { %v1208_v39 = vpop.f32.mrf.mxu1  ;;  %v7205_v16 = vpack.c.bf16 %v2003_v42, %v2002_v51  ;;  %v2005_v51 = vld [vmem:[#allocation2 + $0xf1] sm:$0xff] }
 0x16d   : > { %v7192_v43 = vadd.f32 %v1208_v39, %v1053_v37  ;;  %v1091_v52 = vpop.f32.mrf.mxu2 }
 0x16e   : > { %v1246_v49 = vpop.f32.mrf.mxu3 }
 0x16f   : > { %v7200_v50 = vadd.f32 %v1246_v49, %v1091_v52  ;;  %v2004_v49 = vld [vmem:[#allocation2 + $0xe9] sm:$0xff] }
 0x173   : > { %v1056_v63 = vpop.f32.mrf.mxu0 }
 0x174   : > { %v1211_v0 = vpop.f32.mrf.mxu1 }
 0x175   : > { %v7203_v9 = vadd.f32 %v1211_v0, %v1056_v63  ;;  %v1093_v14 = vpop.f32.mrf.mxu2  ;;  %v7227_v0 = vpack.c.bf16 %v2005_v51, %v2004_v49 }
 0x176   : > { %v1248_v21 = vpop.f32.mrf.mxu3  ;;  %5600 = vmatmul.msk.bf16.gmra.mxu0 %vm379_vm0, %v7070_v10 }
 0x177   : > { %5634 = vmatmul.msk.bf16.gmra.mxu1 %vm379_vm0, %v7205_v16  ;;  %v7211_v33 = vadd.f32 %v1248_v21, %v1093_v14 }
 0x179   : > { %8718 = vst [vmem:[#allocation7_spill] sm:$0xff] %v7211_v33 }
 0x17a   : > { %5532 = vmatmul.msk.bf16.gmra.mxu2 %vm379_vm0, %v7180_v24 }
 0x17b   : > { %5566 = vmatmul.msk.bf16.gmra.mxu3 %vm379_vm0, %v7072_v11  ;;  %v1058_v37 = vpop.f32.mrf.mxu0 }
 0x17c   : > { %v1213_v10 = vpop.f32.mrf.mxu1 }
 0x17d   : > { %v7221_v39 = vadd.f32 %v1213_v10, %v1058_v37  ;;  %v1096_v41 = vpop.f32.mrf.mxu2 }
 0x17e   : > { %v1251_v44 = vpop.f32.mrf.mxu3 }
 0x17f   : > { %v7223_v52 = vadd.f32 %v1251_v44, %v1096_v41  ;;  %v2007_v41 = vld [vmem:[#allocation2 + $0x111] sm:$0xff] }
 0x181   : > { %8719 = vst [vmem:[#allocation8_spill] sm:$0xff] %v7223_v52 }
 0x183   : > { %v1061_v42 = vpop.f32.mrf.mxu0 }
 0x184   : > { %v1216_v58 = vpop.f32.mrf.mxu1 }
 0x185   : > { %v7225_v63 = vadd.f32 %v1216_v58, %v1061_v42  ;;  %v1098_v6 = vpop.f32.mrf.mxu2 }
 0x186   : > { %v1253_v54 = vpop.f32.mrf.mxu3  ;;  %5601 = vmatmul.msk.bf16.gmra.mxu0 %vm379_vm0, %v7086_v30  ;;  %v2006_v30 = vld [vmem:[#allocation2 + $0x109] sm:$0xff] }
 0x187   : > { %5635 = vmatmul.msk.bf16.gmra.mxu1 %vm379_vm0, %v7227_v0  ;;  %v7233_v11 = vadd.f32 %v1253_v54, %v1098_v6  ;;  %v7245_v42 = vpack.c.bf16 %v2007_v41, %v2006_v30  ;;  %v1522_v54 = vld [vmem:[#allocation2 + $0x107] sm:$0xff] }
 0x189   : > { %8720 = vst [vmem:[#allocation9_spill] sm:$0xff] %v7233_v11 }
 0x18a   : > { %5533 = vmatmul.msk.bf16.gmra.mxu2 %vm379_vm0, %v7205_v16  ;;  %8722 = vst [vmem:[#allocation11_spill] sm:$0xff] %v7245_v42 }
 0x18b   : > { %5567 = vmatmul.msk.bf16.gmra.mxu3 %vm379_vm0, %v7088_v31  ;;  %v1063_v14 = vpop.f32.mrf.mxu0  ;;  %v1523_v31 = vld [vmem:[#allocation2 + $0x10f] sm:$0xff] }
 0x18c   : > { %v1218_v21 = vpop.f32.mrf.mxu1 }
 0x18d   : > { %v7239_v22 = vadd.f32 %v1218_v21, %v1063_v14  ;;  %v1101_v36 = vpop.f32.mrf.mxu2  ;;  %v7253_v21 = vpack.c.bf16 %v1523_v31, %v1522_v54 }
 0x18e   : > { %v1256_v37 = vpop.f32.mrf.mxu3 }
 0x18f   : > { %v7241_v10 = vadd.f32 %v1256_v37, %v1101_v36  ;;  %8724 = vst [vmem:[#allocation13_spill] sm:$0xff] %v7253_v21 }
 0x191   : > { %8721 = vst [vmem:[#allocation10_spill] sm:$0xff] %v7241_v10  ;;  %v2009_v10 = vld [vmem:[#allocation2 + $0x131] sm:$0xff] }
 0x193   : > { %v1066_v44 = vpop.f32.mrf.mxu0 }
 0x194   : > { %v1221_v49 = vpop.f32.mrf.mxu1 }
 0x195   : > { %v7243_v51 = vadd.f32 %v1221_v49, %v1066_v44  ;;  %v1103_v58 = vpop.f32.mrf.mxu2  ;;  %v2008_v49 = vld [vmem:[#allocation2 + $0x129] sm:$0xff] }
 0x196   : > { %v1258_v6 = vpop.f32.mrf.mxu3  ;;  %5602 = vmatmul.msk.bf16.gmra.mxu0 %vm379_vm0, %v6837_v18  ;;  %v7263_v54 = vpack.c.bf16 %v2009_v10, %v2008_v49 }
 0x197   : > { %5636 = vmatmul.msk.bf16.gmra.mxu1 %vm379_vm0, %v7245_v42  ;;  %v7251_v14 = vadd.f32 %v1258_v6, %v1103_v58 }
 0x199   : > { %8723 = vst [vmem:[#allocation12_spill] sm:$0xff] %v7251_v14 }
 0x19a   : > { %5534 = vmatmul.msk.bf16.gmra.mxu2 %vm379_vm0, %v7227_v0 }
 0x19b   : > { %5568 = vmatmul.msk.bf16.gmra.mxu3 %vm379_vm0, %v7253_v21  ;;  %v1068_v36 = vpop.f32.mrf.mxu0 }
 0x19c   : > { %v1223_v37 = vpop.f32.mrf.mxu1 }
 0x19d   : > { %v7259_v30 = vadd.f32 %v1223_v37, %v1068_v36  ;;  %v1106_v41 = vpop.f32.mrf.mxu2  ;;  %v6032_v37 = vld [vmem:[%s8694_s6 + $0x18] sm:$0xff] }
 0x19e   : > { %v1261_v44 = vpop.f32.mrf.mxu3  ;;  %3305 = vmatpush.bf16.msra.mxu1 %v6032_v37  ;;  %v1189_v37 = vadd.f32 %v7118_v62, %v7116_v59 }
 0x19f   : > { %v7261_v18 = vadd.f32 %v1261_v44, %v1106_v41 }
 0x1a1   : > { %8725 = vst [vmem:[#allocation14_spill] sm:$0xff] %v7261_v18 }
 0x1a3   : > { %v1880_v58 = vpop.f32.mrf.mxu0 }
 0x1a4   : > { %v2122_v6 = vpop.f32.mrf.mxu1 }
 0x1a5   : > { %v1108_v31 = vpop.f32.mrf.mxu2 }
 0x1a6   : > { %v1263_v14 = vpop.f32.mrf.mxu3  ;;  %5603 = vmatmul.msk.bf16.gmra.mxu0 %vm379_vm0, %v6923_v2 }
 0x1a7   : > { %5637 = vmatmul.msk.bf16.gmra.mxu1 %vm379_vm0, %v7263_v54  ;;  %v7269_v36 = vadd.f32 %v1263_v14, %v1108_v31  ;;  %v2010_v14 = vld [vmem:[#allocation2 + $0x149] sm:$0xff]  ;;  %v2011_v31 = vld [vmem:[#allocation2 + $0x151] sm:$0xff] }
 0x1a8   : > { %v7281_v52 = vpack.c.bf16 %v2011_v31, %v2010_v14 }
 0x1a9   : > { %8726 = vst [vmem:[#allocation15_spill] sm:$0xff] %v7269_v36 }
 0x1aa   : > { %5535 = vmatmul.msk.bf16.gmra.mxu2 %vm379_vm0, %v7245_v42 }
 0x1ab   : > { %5569 = vmatmul.msk.bf16.gmra.mxu3 %vm379_vm0, %v6925_v3  ;;  %v1882_v10 = vpop.f32.mrf.mxu0 }
 0x1ac   : > { %v2124_v41 = vpop.f32.mrf.mxu1 }
 0x1ad   : > { %v1396_v44 = vpop.f32.mrf.mxu2 }
 0x1ae   : > { %v1638_v2 = vpop.f32.mrf.mxu3  ;;  %v1476_v49 = vadd.f32 %v1396_v44, %v7057_v4 }
 0x1b0   : > { %v1718_v18 = vadd.f32 %v1638_v2, %v1476_v49  ;;  %v2012_v2 = vld [vmem:[#allocation2 + $0x169] sm:$0xff]  ;;  %v2013_v49 = vld [vmem:[#allocation2 + $0x171] sm:$0xff] }
 0x1b2   : > { %v1960_v36 = vadd.f32 %v1880_v58, %v1718_v18  ;;  %v6020_v58 = vld [vmem:[%s8690_s2 + $0x90] sm:$0xff] }
 0x1b3   : > { %v1885_v21 = vpop.f32.mrf.mxu0  ;;  %2363 = vmatpush.bf16.msra.mxu2 %v6020_v58 }
 0x1b4   : > { %v2127_v11 = vpop.f32.mrf.mxu1  ;;  %v7283_v42 = vadd.f32 %v2122_v6, %v1960_v36 }
 0x1b5   : > { %v1398_v3 = vpop.f32.mrf.mxu2 }
 0x1b6   : > { %v1640_v33 = vpop.f32.mrf.mxu3  ;;  %5604 = vmatmul.msk.bf16.gmra.mxu0 %vm379_vm0, %v6958_v34  ;;  %v1477_v4 = vadd.f32 %v1398_v3, %v1189_v37  ;;  %v7302_v3 = vpack.c.bf16 %v2013_v49, %v2012_v2  ;;  %v2015_v2 = vld [vmem:[#allocation2 + $0x191] sm:$0xff] }
 0x1b7   : > { %5638 = vmatmul.msk.bf16.gmra.mxu1 %vm379_vm0, %v7281_v52 }
 0x1b8   : > { %v1719_v44 = vadd.f32 %v1640_v33, %v1477_v4 }
 0x1ba   : > { %v1961_v18 = vadd.f32 %v1882_v10, %v1719_v44  ;;  %5536 = vmatmul.msk.bf16.gmra.mxu2 %vm379_vm0, %v7263_v54 }
 0x1bb   : > { %5570 = vmatmul.msk.bf16.gmra.mxu3 %vm379_vm0, %v6960_v35  ;;  %v1887_v59 = vpop.f32.mrf.mxu0  ;;  %v6023_v35 = vld [vmem:[%s8690_s2 + $0xa8] sm:$0xff] }
 0x1bc   : > { %v2129_v62 = vpop.f32.mrf.mxu1  ;;  %v7296_v6 = vadd.f32 %v2124_v41, %v1961_v18  ;;  %2605 = vmatpush.bf16.msra.mxu3 %v6023_v35 }
 0x1bd   : > { %v1401_v34 = vpop.f32.mrf.mxu2 }
 0x1be   : > { %v1643_v36 = vpop.f32.mrf.mxu3  ;;  %v1478_v33 = vadd.f32 %v1401_v34, %v7127_v7  ;;  %v6026_v34 = vld [vmem:[%s8690_s2 + $0xc0] sm:$0xff] }
 0x1bf   : > { %2847 = vmatpush.bf16.msra.mxu0 %v6026_v34 }
 0x1c0   : > { %v1720_v10 = vadd.f32 %v1643_v36, %v1478_v33 }
 0x1c2   : > { %v1962_v14 = vadd.f32 %v1885_v21, %v1720_v10  ;;  %v2014_v10 = vld [vmem:[#allocation2 + $0x189] sm:$0xff] }
 0x1c3   : > { %v1890_v31 = vpop.f32.mrf.mxu0 }
 0x1c4   : > { %v2132_v37 = vpop.f32.mrf.mxu1  ;;  %v7304_v4 = vadd.f32 %v2127_v11, %v1962_v14 }
 0x1c5   : > { %v1403_v41 = vpop.f32.mrf.mxu2 }
 0x1c6   : > { %v1645_v44 = vpop.f32.mrf.mxu3  ;;  %5605 = vmatmul.msk.bf16.gmra.mxu0 %vm379_vm0, %v6990_v60  ;;  %v1479_v7 = vadd.f32 %v1403_v41, %v7138_v12 }
 0x1c7   : > { %5639 = vmatmul.msk.bf16.gmra.mxu1 %vm379_vm0, %v7302_v3 }
 0x1c8   : > { %v1721_v21 = vadd.f32 %v1645_v44, %v1479_v7 }
 0x1ca   : > { %v1963_v18 = vadd.f32 %v1887_v59, %v1721_v21  ;;  %5537 = vmatmul.msk.bf16.gmra.mxu2 %vm379_vm0, %v7281_v52 }
 0x1cb   : > { %5571 = vmatmul.msk.bf16.gmra.mxu3 %vm379_vm0, %v6992_v61  ;;  %v1892_v11 = vpop.f32.mrf.mxu0  ;;  %v7321_v61 = vpack.c.bf16 %v2015_v2, %v2014_v10 }
 0x1cc   : > { %v2134_v58 = vpop.f32.mrf.mxu1  ;;  %v7318_v60 = vadd.f32 %v2129_v62, %v1963_v18 }
 0x1cd   : > { %v1406_v36 = vpop.f32.mrf.mxu2 }
 0x1ce   : > { %v1648_v33 = vpop.f32.mrf.mxu3  ;;  %v1480_v12 = vadd.f32 %v1406_v36, %v7142_v28 }
 0x1d0   : > { %v1722_v59 = vadd.f32 %v1648_v33, %v1480_v12  ;;  %v2016_v12 = vld [vmem:[#allocation2 + $0x1a9] sm:$0xff] }
 0x1d2   : > { %v1964_v49 = vadd.f32 %v1890_v31, %v1722_v59 }
 0x1d3   : > { %v1895_v14 = vpop.f32.mrf.mxu0 }
 0x1d4   : > { %v2137_v35 = vpop.f32.mrf.mxu1  ;;  %v7323_v41 = vadd.f32 %v2132_v37, %v1964_v49 }
 0x1d5   : > { %v1408_v44 = vpop.f32.mrf.mxu2 }
 0x1d6   : > { %v1650_v7 = vpop.f32.mrf.mxu3  ;;  %5606 = vmatmul.msk.bf16.gmra.mxu0 %vm379_vm0, %v7016_v23  ;;  %v1481_v28 = vadd.f32 %v1408_v44, %v7156_v40  ;;  %v2017_v40 = vld [vmem:[#allocation2 + $0x1b1] sm:$0xff] }
 0x1d7   : > { %5640 = vmatmul.msk.bf16.gmra.mxu1 %vm379_vm0, %v7321_v61  ;;  %v7337_v2 = vpack.c.bf16 %v2017_v40, %v2016_v12  ;;  %v2018_v40 = vld [vmem:[#allocation2 + $0x1c9] sm:$0xff] }
 0x1d8   : > { %v1723_v62 = vadd.f32 %v1650_v7, %v1481_v28 }
 0x1da   : > { %v1965_v21 = vadd.f32 %v1892_v11, %v1723_v62  ;;  %5538 = vmatmul.msk.bf16.gmra.mxu2 %vm379_vm0, %v7302_v3  ;;  %v6332_v62 = vpop.permute.xlu0 %6331 }
 0x1db   : > { %5572 = vmatmul.msk.bf16.gmra.mxu3 %vm379_vm0, %v7018_v26  ;;  %v1897_v31 = vpop.f32.mrf.mxu0 }
 0x1dc   : > { %v2139_v37 = vpop.f32.mrf.mxu1  ;;  %v7334_v18 = vadd.f32 %v2134_v58, %v1965_v21  ;;  %v6190_v58 = vld [vmem:[%s6726_s28 + $0x78] sm:$0xff]   ;;  %s6047_s28 = sshll.u32 %s6488_s17, 8  ;;  %s5349_s17 = scalar_lea.sflag [#allocation5], %s365_s12 }
 0x1dd   : > { %v1411_v34 = vpop.f32.mrf.mxu2  ;;  %v6110_v7 = vunpack.c.l.bf16 %v6190_v58  ;;  %v6111_v28 = vunpack.c.h.bf16 %v6190_v58  ;;  %s5360_s30 = scalar_lea.hbm %s8698_s10, %s6047_s28 }
 0x1de   : > { %v1653_v23 = vpop.f32.mrf.mxu3  ;;  %v1482_v36 = vadd.f32 %v1411_v34, %v7160_v56  ;;  %s5363_s20 = sshll.u32 %s5360_s30, 4  ;;  %s5364_s20 = int_to_ptr.hbm [resolvable:$true] %s5363_s20 }
 0x1df   : > { %620 = vst.msk [vmem:[#allocation2 + $0x208] sm:$0xff] %vm452_vm1, %v6110_v7  ;;  %s6358_s21 = sshra.s32 %s5364_s20, 4  ;;  %s6359_s21 = int_to_ptr.hbm [resolvable:$true] %s6358_s21 }
 0x1e0   : > { %v1724_v33 = vadd.f32 %v1653_v23, %v1482_v36  ;;  %621 = vst.msk [vmem:[#allocation2 + $0x210] sm:$0xff] %vm452_vm1, %v6111_v28  ;;  %s6360_s27 = scalar_lea.hbm %s6359_s21, 256  ;;  %p6365_p0 = scmp.lt.s32.totalorder %s6359_s21, %s8698_s10 }
 0x1e1   : > { %p6361_p11 = scmp.ne.s32.totalorder %s6359_s21, %s6360_s27  ;;  %p6366_p1 = scmp.lt.s32.totalorder %s6364_s29, %s6360_s27 }
 0x1e2   : > { %v1966_v59 = vadd.f32 %v1895_v14, %v1724_v33 }
 0x1e3   : > { %v1900_v11 = vpop.f32.mrf.mxu0  ;;  %p6362_p12 = pnand %p6361_p11, %p6505_p5  ;;  %p6367_p2 = por %p6366_p1, %p6365_p0 }
 0x1e4   : > { %v2142_v10 = vpop.f32.mrf.mxu1  ;;  %v7339_v49 = vadd.f32 %v2137_v35, %v1966_v59  ;;  %v6333_v35 = vunpack.i.l.bf16 %v6332_v62 }
 0x1e5   : > { %v1413_v26 = vpop.f32.mrf.mxu2  ;;  %p6363_p13 = pneg %p6362_p12 }
 0x1e6   : > { %v1655_v44 = vpop.f32.mrf.mxu3  ;;  %5607 = vmatmul.msk.bf16.gmra.mxu0 %vm379_vm0, %v7043_v47  ;;  %v1483_v56 = vadd.f32 %v1413_v26, %v7174_v53  ;;  %v6334_v47 = vunpack.i.h.bf16 %v6332_v62  ;;  %845 = vst.msk [vmem:[#allocation2 + $0x208] sm:$0xff] %vm814_vm2, %v6333_v35  ;;  %v2020_v35 = vld [vmem:[#allocation2 + $0x1e9] sm:$0xff] }
 0x1e7   : > { %5641 = vmatmul.msk.bf16.gmra.mxu1 %vm379_vm0, %v7337_v2  ;;  %p6368_p3 = pnand %p6367_p2, %p6363_p13 }
 0x1e8   : > { %v1725_v14 = vadd.f32 %v1655_v44, %v1483_v56  ;;  %846 = vst.msk [vmem:[#allocation2 + $0x210] sm:$0xff] %vm814_vm2, %v6334_v47 }
 0x1ea   : > { %v1967_v21 = vadd.f32 %v1897_v31, %v1725_v14  ;;  %5539 = vmatmul.msk.bf16.gmra.mxu2 %vm379_vm0, %v7321_v61 }
 0x1eb   : > { %5573 = vmatmul.msk.bf16.gmra.mxu3 %vm379_vm0, %v7045_v48  ;;  %v1902_v34 = vpop.f32.mrf.mxu0  ;;  %v2019_v48 = vld [vmem:[#allocation2 + $0x1d1] sm:$0xff] }
 0x1ec   : > { %v7353_v53 = vpop.f32.mrf.mxu1  ;;  %v7356_v23 = vadd.f32 %v2139_v37, %v1967_v21  ;;  %v7360_v56 = vpack.c.bf16 %v2019_v48, %v2018_v40 }
 0x1ed   : > { %v1416_v36 = vpop.f32.mrf.mxu2 }
 0x1ee   : > { %v1658_v33 = vpop.f32.mrf.mxu3  ;;  %v1484_v31 = vadd.f32 %v1416_v36, %v7178_v27  ;;  %v2021_v36 = vld [vmem:[#allocation2 + $0x1f1] sm:$0xff] }
 0x1f0   : > { %v1726_v12 = vadd.f32 %v1658_v33, %v1484_v31  ;;  %v7378_v31 = vpack.c.bf16 %v2021_v36, %v2020_v35 }
 0x1f2   : > { %v1968_v59 = vadd.f32 %v1900_v11, %v1726_v12 }
 0x1f3   : > { %v1905_v26 = vpop.f32.mrf.mxu0 }
 0x1f4   : > { %v2147_v44 = vpop.f32.mrf.mxu1  ;;  %v7362_v58 = vadd.f32 %v2142_v10, %v1968_v59 }
 0x1f5   : > { %v1418_v7 = vpop.f32.mrf.mxu2 }
 0x1f6   : > { %v1660_v28 = vpop.f32.mrf.mxu3  ;;  %5608 = vmatmul.msk.bf16.gmra.mxu0 %vm379_vm0, %v7078_v19  ;;  %v1485_v27 = vadd.f32 %v1418_v7, %v7192_v43 }
 0x1f7   : > { %5642 = vmatmul.msk.bf16.gmra.mxu1 %vm379_vm0, %v7360_v56 }
 0x1f8   : > { %v1727_v37 = vadd.f32 %v1660_v28, %v1485_v27 }
 0x1fa   : > { %v7369_v14 = vadd.f32 %v1902_v34, %v1727_v37  ;;  %5540 = vmatmul.msk.bf16.gmra.mxu2 %vm379_vm0, %v7337_v2  ;;  %v1781_v37 = vld [vmem:[#allocation2 + $0x210] sm:$0xff] }
 0x1fb   : > { %5574 = vmatmul.msk.bf16.gmra.mxu3 %vm379_vm0, %v7080_v20  ;;  %v1907_v11 = vpop.f32.mrf.mxu0 }
 0x1fc   : > { %v7375_v10 = vpop.f32.mrf.mxu1 }
 0x1fd   : > { %v1421_v62 = vpop.f32.mrf.mxu2 }
 0x1fe   : > { %v1663_v21 = vpop.f32.mrf.mxu3  ;;  %v1486_v19 = vadd.f32 %v1421_v62, %v7203_v9  ;;  %v2022_v62 = vld [vmem:[#allocation2 + $0x209] sm:$0xff] }
 0x200   : > { %v1728_v47 = vadd.f32 %v1663_v21, %v1486_v19 }
 0x202   : > { %v1970_v43 = vadd.f32 %v1905_v26, %v1728_v47 }
 0x203   : > { %v1910_v33 = vpop.f32.mrf.mxu0 }
 0x204   : > { %v2152_v34 = vpop.f32.mrf.mxu1  ;;  %v7380_v12 = vadd.f32 %v2147_v44, %v1970_v43  ;;  %v1538_v43 = vld [vmem:[#allocation2 + $0x207] sm:$0xff] }
 0x205   : > { %v1423_v40 = vpop.f32.mrf.mxu2 }
 0x206   : > { %v1665_v48 = vpop.f32.mrf.mxu3  ;;  %5609 = vmatmul.msk.bf16.gmra.mxu0 %vm379_vm0, %v7094_v38  ;;  %v1487_v20 = vadd.f32 %v1423_v40, %v7221_v39  ;;  %v1780_v38 = vld [vmem:[#allocation2 + $0x208] sm:$0xff]  ;;  %v2023_v39 = vld [vmem:[#allocation2 + $0x211] sm:$0xff] }
 0x207   : > { %5643 = vmatmul.msk.bf16.gmra.mxu1 %vm379_vm0, %v7378_v31  ;;  %v7396_v47 = vpack.c.bf16 %v2023_v39, %v2022_v62 }
 0x208   : > { %v1729_v9 = vadd.f32 %v1665_v48, %v1487_v20 }
 0x20a   : > { %v7387_v59 = vadd.f32 %v1907_v11, %v1729_v9  ;;  %5541 = vmatmul.msk.bf16.gmra.mxu2 %vm379_vm0, %v7360_v56  ;;  %v1797_v11 = vpack.c.bf16 %v1781_v37, %v1780_v38 }
 0x20b   : > { %5575 = vmatmul.msk.bf16.gmra.mxu3 %vm379_vm0, %v7096_v29  ;;  %v1912_v26 = vpop.f32.mrf.mxu0  ;;  %v1539_v29 = vld [vmem:[#allocation2 + $0x20f] sm:$0xff] }
 0x20c   : > { %v7393_v44 = vpop.f32.mrf.mxu1  ;;  %v7404_v9 = vpack.c.bf16 %v1539_v29, %v1538_v43  ;;  %v2236_v29 = vld [vmem:[#allocation2 + $0x4f] sm:$0xff] }
 0x20d   : > { %v1426_v7 = vpop.f32.mrf.mxu2 }
 0x20e   : > { %v1668_v28 = vpop.f32.mrf.mxu3  ;;  %v1488_v27 = vadd.f32 %v1426_v7, %v7225_v63 }
 0x210   : > { %v1730_v21 = vadd.f32 %v1668_v28, %v1488_v27 }
 0x212   : > { %v1972_v19 = vadd.f32 %v1910_v33, %v1730_v21 }
 0x213   : > { %v1915_v35 = vpop.f32.mrf.mxu0 }
 0x214   : > { %v2157_v36 = vpop.f32.mrf.mxu1  ;;  %v7398_v40 = vadd.f32 %v2152_v34, %v1972_v19 }
 0x215   : > { %v1428_v48 = vpop.f32.mrf.mxu2 }
 0x216   : > { %v1670_v20 = vpop.f32.mrf.mxu3  ;;  %5610 = vmatmul.msk.bf16.gmra.mxu0 %vm379_vm0, %v1797_v11  ;;  %v1489_v63 = vadd.f32 %v1428_v48, %v7239_v22  ;;  %v2235_v11 = vld [vmem:[#allocation2 + $0x47] sm:$0xff] }
 0x217   : > { %5644 = vmatmul.msk.bf16.gmra.mxu1 %vm379_vm0, %v7396_v47  ;;  %v2477_v48 = vld [vmem:[#allocation2 + $0x48] sm:$0xff] }
 0x218   : > { %v1731_v33 = vadd.f32 %v1670_v20, %v1489_v63  ;;  %v2478_v20 = vld [vmem:[#allocation2 + $0x50] sm:$0xff] }
 0x21a   : > { %v7406_v7 = vadd.f32 %v1912_v26, %v1731_v33  ;;  %5542 = vmatmul.msk.bf16.gmra.mxu2 %vm379_vm0, %v7378_v31  ;;  %v2267_v33 = vpack.c.bf16 %v2236_v29, %v2235_v11  ;;  %v1229_v11 = vadd.f32 %v7125_v5, %v7123_v1 }
 0x21b   : > { %5576 = vmatmul.msk.bf16.gmra.mxu3 %vm379_vm0, %v7404_v9  ;;  %v1917_v34 = vpop.f32.mrf.mxu0 }
 0x21c   : > { %v7412_v28 = vpop.f32.mrf.mxu1 }
 0x21d   : > { %8727 = vst [vmem:[#allocation16_spill] sm:$0xff] %v7412_v28  ;;  %v1431_v38 = vpop.f32.mrf.mxu2 }
 0x21e   : > { %v1673_v27 = vpop.f32.mrf.mxu3  ;;  %v1490_v37 = vadd.f32 %v1431_v38, %v7243_v51  ;;  %v6031_v51 = vld [vmem:[%s8694_s6 + $0x10] sm:$0xff]  ;;  %v2509_v38 = vpack.c.bf16 %v2478_v20, %v2477_v48 }
 0x21f   : > { %3306 = vmatpush.bf16.msra.mxu1 %v6031_v51  ;;  %v2479_v51 = vld [vmem:[#allocation2 + $0x68] sm:$0xff] }
 0x220   : > { %v1732_v62 = vadd.f32 %v1673_v27, %v1490_v37 }
 0x222   : > { %v1974_v22 = vadd.f32 %v1915_v35, %v1732_v62 }
 0x223   : > { %v1920_v39 = vpop.f32.mrf.mxu0 }
 0x224   : > { %v2162_v21 = vpop.f32.mrf.mxu1  ;;  %v7415_v26 = vadd.f32 %v2157_v36, %v1974_v22 }
 0x225   : > { %v1433_v19 = vpop.f32.mrf.mxu2 }
 0x226   : > { %v1675_v43 = vpop.f32.mrf.mxu3  ;;  %5731 = vmatmul.msk.bf16.vlgmr.msra.gmra.mxu0 %vm379_vm0, %v7129_v8  ;;  %v1491_v63 = vadd.f32 %v1433_v19, %v7259_v30 }
 0x228   : > { %v1733_v35 = vadd.f32 %v1675_v43, %v1491_v63  ;;  %v2238_v63 = vld [vmem:[#allocation2 + $0x6f] sm:$0xff] }
 0x22a   : > { %v7423_v36 = vadd.f32 %v1917_v34, %v1733_v35  ;;  %5663 = vmatmul.msk.bf16.vlgmr.msra.gmra.mxu2 %vm379_vm0, %v2267_v33  ;;  %v2237_v34 = vld [vmem:[#allocation2 + $0x67] sm:$0xff]  ;;  %v2480_v35 = vld [vmem:[#allocation2 + $0x70] sm:$0xff] }
 0x22b   : > { %5697 = vmatmul.msk.bf16.vlgmr.msra.gmra.mxu3 %vm379_vm0, %v2509_v38  ;;  %v1922_v27 = vpop.f32.mrf.mxu0  ;;  %v2268_v38 = vpack.c.bf16 %v2238_v63, %v2237_v34  ;;  %v2240_v63 = vld [vmem:[#allocation2 + $0x8f] sm:$0xff] }
 0x22c   : > { %v7427_v37 = vpop.f32.mrf.mxu1 }
 0x22d   : > { %v1436_v8 = vpop.f32.mrf.mxu2 }
 0x22e   : > { %v1678_v62 = vpop.f32.mrf.mxu3  ;;  %v1492_v30 = vadd.f32 %v1436_v8, %v7108_v45 }
 0x230   : > { %v1734_v22 = vadd.f32 %v1678_v62, %v1492_v30 }
 0x232   : > { %v1976_v19 = vadd.f32 %v1920_v39, %v1734_v22  ;;  %v2510_v39 = vpack.c.bf16 %v2480_v35, %v2479_v51  ;;  %v2481_v51 = vld [vmem:[#allocation2 + $0x88] sm:$0xff]  ;;  %v2482_v35 = vld [vmem:[#allocation2 + $0x90] sm:$0xff] }
 0x233   : > { %v1925_v28 = vpop.f32.mrf.mxu0 }
 0x234   : > { %v2167_v43 = vpop.f32.mrf.mxu1  ;;  %v7432_v29 = vadd.f32 %v2162_v21, %v1976_v19 }
 0x235   : > { %v1438_v48 = vpop.f32.mrf.mxu2 }
 0x236   : > { %v1680_v20 = vpop.f32.mrf.mxu3  ;;  %5732 = vmatmul.msk.bf16.gmra.mxu0 %vm379_vm0, %v7144_v32  ;;  %v1493_v33 = vadd.f32 %v1438_v48, %v1229_v11  ;;  %v2239_v48 = vld [vmem:[#allocation2 + $0x87] sm:$0xff] }
 0x238   : > { %v1735_v45 = vadd.f32 %v1680_v20, %v1493_v33 }
 0x23a   : > { %v7436_v8 = vadd.f32 %v1922_v27, %v1735_v45  ;;  %5664 = vmatmul.msk.bf16.gmra.mxu2 %vm379_vm0, %v2268_v38  ;;  %v2269_v38 = vpack.c.bf16 %v2240_v63, %v2239_v48  ;;  %v2242_v63 = vld [vmem:[#allocation2 + $0xaf] sm:$0xff] }
 0x23b   : > { %5698 = vmatmul.msk.bf16.gmra.mxu3 %vm379_vm0, %v2510_v39  ;;  %v1927_v1 = vpop.f32.mrf.mxu0 }
 0x23c   : > { %v7440_v5 = vpop.f32.mrf.mxu1 }
 0x23d   : > { %v1441_v21 = vpop.f32.mrf.mxu2 }
 0x23e   : > { %v1683_v62 = vpop.f32.mrf.mxu3  ;;  %v1494_v30 = vadd.f32 %v1441_v21, %v7140_v15  ;;  %v2511_v15 = vpack.c.bf16 %v2482_v35, %v2481_v51  ;;  %v2483_v51 = vld [vmem:[#allocation2 + $0xa8] sm:$0xff]  ;;  %v2484_v35 = vld [vmem:[#allocation2 + $0xb0] sm:$0xff] }
 0x240   : > { %v1736_v22 = vadd.f32 %v1683_v62, %v1494_v30 }
 0x242   : > { %v1978_v19 = vadd.f32 %v1925_v28, %v1736_v22 }
 0x243   : > { %v1930_v32 = vpop.f32.mrf.mxu0 }
 0x244   : > { %v2172_v11 = vpop.f32.mrf.mxu1  ;;  %v7443_v34 = vadd.f32 %v2167_v43, %v1978_v19 }
 0x245   : > { %v1443_v27 = vpop.f32.mrf.mxu2 }
 0x246   : > { %v1685_v20 = vpop.f32.mrf.mxu3  ;;  %5733 = vmatmul.msk.bf16.gmra.mxu0 %vm379_vm0, %v7162_v57  ;;  %v1495_v33 = vadd.f32 %v1443_v27, %v7150_v25  ;;  %v2241_v27 = vld [vmem:[#allocation2 + $0xa7] sm:$0xff] }
 0x248   : > { %v1737_v45 = vadd.f32 %v1685_v20, %v1495_v33 }
 0x24a   : > { %v7448_v39 = vadd.f32 %v1927_v1, %v1737_v45  ;;  %5665 = vmatmul.msk.bf16.gmra.mxu2 %vm379_vm0, %v2269_v38  ;;  %v2270_v38 = vpack.c.bf16 %v2242_v63, %v2241_v27  ;;  %v2485_v63 = vld [vmem:[#allocation2 + $0xc8] sm:$0xff] }
 0x24b   : > { %5699 = vmatmul.msk.bf16.gmra.mxu3 %vm379_vm0, %v2511_v15  ;;  %v1932_v28 = vpop.f32.mrf.mxu0 }
 0x24c   : > { %v7452_v43 = vpop.f32.mrf.mxu1 }
 0x24d   : > { %v1446_v21 = vpop.f32.mrf.mxu2 }
 0x24e   : > { %v1688_v62 = vpop.f32.mrf.mxu3  ;;  %v1496_v30 = vadd.f32 %v1446_v21, %v7158_v46  ;;  %v2512_v46 = vpack.c.bf16 %v2484_v35, %v2483_v51  ;;  %v2486_v51 = vld [vmem:[#allocation2 + $0xd0] sm:$0xff] }
 0x250   : > { %v1738_v22 = vadd.f32 %v1688_v62, %v1496_v30 }
 0x252   : > { %v1980_v57 = vadd.f32 %v1930_v32, %v1738_v22 }
 0x253   : > { %v1935_v19 = vpop.f32.mrf.mxu0 }
 0x254   : > { %v2177_v25 = vpop.f32.mrf.mxu1  ;;  %v7455_v48 = vadd.f32 %v2172_v11, %v1980_v57 }
 0x255   : > { %v1448_v1 = vpop.f32.mrf.mxu2 }
 0x256   : > { %v1690_v20 = vpop.f32.mrf.mxu3  ;;  %5734 = vmatmul.msk.bf16.gmra.mxu0 %vm379_vm0, %v7180_v24  ;;  %v1497_v33 = vadd.f32 %v1448_v1, %v7168_v55  ;;  %v2243_v55 = vld [vmem:[#allocation2 + $0xc7] sm:$0xff] }
 0x258   : > { %v1739_v45 = vadd.f32 %v1690_v20, %v1497_v33  ;;  %v2244_v20 = vld [vmem:[#allocation2 + $0xcf] sm:$0xff] }
 0x25a   : > { %v7460_v15 = vadd.f32 %v1932_v28, %v1739_v45  ;;  %5666 = vmatmul.msk.bf16.gmra.mxu2 %vm379_vm0, %v2270_v38  ;;  %v2271_v38 = vpack.c.bf16 %v2244_v20, %v2243_v55  ;;  %v2487_v20 = vld [vmem:[#allocation2 + $0xe8] sm:$0xff] }
 0x25b   : > { %5700 = vmatmul.msk.bf16.gmra.mxu3 %vm379_vm0, %v2512_v46  ;;  %v1937_v32 = vpop.f32.mrf.mxu0 }
 0x25c   : > { %v7464_v62 = vpop.f32.mrf.mxu1 }
 0x25d   : > { %v1451_v11 = vpop.f32.mrf.mxu2 }
 0x25e   : > { %v1693_v21 = vpop.f32.mrf.mxu3  ;;  %v1498_v30 = vadd.f32 %v1451_v11, %v7176_v13  ;;  %v2513_v13 = vpack.c.bf16 %v2486_v51, %v2485_v63  ;;  %v2488_v63 = vld [vmem:[#allocation2 + $0xf0] sm:$0xff]  ;;  %v8730_v51 = vld [vmem:[#allocation7_spill] sm:$0xff] }
 0x260   : > { %v1740_v22 = vadd.f32 %v1693_v21, %v1498_v30 }
 0x262   : > { %v1982_v24 = vadd.f32 %v1935_v19, %v1740_v22 }
 0x263   : > { %v1940_v57 = vpop.f32.mrf.mxu0 }
 0x264   : > { %v7467_v1 = vadd.f32 %v2177_v25, %v1982_v24  ;;  %v2182_v33 = vpop.f32.mrf.mxu1  ;;  %v2245_v24 = vld [vmem:[#allocation2 + $0xe7] sm:$0xff] }
 0x265   : > { %v1453_v27 = vpop.f32.mrf.mxu2 }
 0x266   : > { %v1695_v28 = vpop.f32.mrf.mxu3  ;;  %5735 = vmatmul.msk.bf16.gmra.mxu0 %vm379_vm0, %v7205_v16  ;;  %v1499_v35 = vadd.f32 %v1453_v27, %v7186_v17 }
 0x268   : > { %v1741_v45 = vadd.f32 %v1695_v28, %v1499_v35  ;;  %v2246_v28 = vld [vmem:[#allocation2 + $0xef] sm:$0xff] }
 0x26a   : > { %v7472_v46 = vadd.f32 %v1937_v32, %v1741_v45  ;;  %5667 = vmatmul.msk.bf16.gmra.mxu2 %vm379_vm0, %v2271_v38  ;;  %v2514_v38 = vpack.c.bf16 %v2488_v63, %v2487_v20  ;;  %v8733_v20 = vld [vmem:[#allocation9_spill] sm:$0xff] }
 0x26b   : > { %5701 = vmatmul.msk.bf16.gmra.mxu3 %vm379_vm0, %v2513_v13  ;;  %v1942_v19 = vpop.f32.mrf.mxu0 }
 0x26c   : > { %v7477_v22 = vpop.f32.mrf.mxu1 }
 0x26d   : > { %v1456_v25 = vpop.f32.mrf.mxu2  ;;  %8728 = vst [vmem:[#allocation17_spill] sm:$0xff] %v7477_v22 }
 0x26e   : > { %v1698_v11 = vpop.f32.mrf.mxu3  ;;  %v1500_v21 = vadd.f32 %v1456_v25, %v7200_v50  ;;  %v2272_v50 = vpack.c.bf16 %v2246_v28, %v2245_v24  ;;  %v8732_v28 = vld [vmem:[#allocation11_spill] sm:$0xff] }
 0x270   : > { %v1742_v30 = vadd.f32 %v1698_v11, %v1500_v21  ;;  %v8731_v21 = vld [vmem:[#allocation8_spill] sm:$0xff] }
 0x272   : > { %v1984_v16 = vadd.f32 %v1940_v57, %v1742_v30 }
 0x273   : > { %v1945_v17 = vpop.f32.mrf.mxu0 }
 0x274   : > { %v7479_v27 = vadd.f32 %v2182_v33, %v1984_v16  ;;  %v2187_v33 = vpop.f32.mrf.mxu1 }
 0x275   : > { %v1458_v55 = vpop.f32.mrf.mxu2 }
 0x276   : > { %8729 = vst [vmem:[#allocation18_spill] sm:$0xff] %v7479_v27  ;;  %v1700_v32 = vpop.f32.mrf.mxu3  ;;  %5736 = vmatmul.msk.bf16.gmra.mxu0 %vm379_vm0, %v7227_v0  ;;  %v1501_v35 = vadd.f32 %v1458_v55, %v8730_v51 }
 0x278   : > { %v1743_v45 = vadd.f32 %v1700_v32, %v1501_v35  ;;  %v2489_v32 = vld [vmem:[#allocation2 + $0x108] sm:$0xff] }
 0x27a   : > { %v7484_v13 = vadd.f32 %v1942_v19, %v1743_v45  ;;  %5668 = vmatmul.msk.bf16.gmra.mxu2 %vm379_vm0, %v2272_v50  ;;  %v2490_v19 = vld [vmem:[#allocation2 + $0x110] sm:$0xff] }
 0x27b   : > { %5702 = vmatmul.msk.bf16.gmra.mxu3 %vm379_vm0, %v2514_v38  ;;  %v1947_v57 = vpop.f32.mrf.mxu0  ;;  %v2515_v45 = vpack.c.bf16 %v2490_v19, %v2489_v32  ;;  %v8735_v38 = vld [vmem:[#allocation13_spill] sm:$0xff]  ;;  %v2491_v19 = vld [vmem:[#allocation2 + $0x128] sm:$0xff] }
 0x27c   : > { %v7494_v51 = vpop.f32.mrf.mxu1  ;;  %v2250_v32 = vld [vmem:[#allocation2 + $0x12f] sm:$0xff] }
 0x27d   : > { %v1461_v25 = vpop.f32.mrf.mxu2  ;;  %8734 = vst [vmem:[#allocation7_spill] sm:$0xff] %v7494_v51 }
 0x27e   : > { %v1703_v11 = vpop.f32.mrf.mxu3  ;;  %v1502_v30 = vadd.f32 %v1461_v25, %v8731_v21  ;;  %v8736_v25 = vld [vmem:[#allocation10_spill] sm:$0xff] }
 0x280   : > { %v1744_v16 = vadd.f32 %v1703_v11, %v1502_v30 }
 0x282   : > { %v1986_v22 = vadd.f32 %v1945_v17, %v1744_v16 }
 0x283   : > { %v1950_v0 = vpop.f32.mrf.mxu0 }
 0x284   : > { %v7489_v27 = vadd.f32 %v2187_v33, %v1986_v22  ;;  %v2192_v30 = vpop.f32.mrf.mxu1 }
 0x285   : > { %v1463_v55 = vpop.f32.mrf.mxu2 }
 0x286   : > { %v1705_v24 = vpop.f32.mrf.mxu3  ;;  %5737 = vmatmul.msk.bf16.gmra.mxu0 %vm379_vm0, %v8732_v28  ;;  %v1503_v63 = vadd.f32 %v1463_v55, %v8733_v20  ;;  %v2249_v28 = vld [vmem:[#allocation2 + $0x127] sm:$0xff] }
 0x287   : > { %v2274_v51 = vpack.c.bf16 %v2250_v32, %v2249_v28  ;;  %v3187_v28 = vld [vmem:[#allocation3 + $0x10] sm:$0xff] }
 0x288   : > { %v1745_v35 = vadd.f32 %v1705_v24, %v1503_v63  ;;  %v2492_v63 = vld [vmem:[#allocation2 + $0x130] sm:$0xff] }
 0x28a   : > { %v7496_v50 = vadd.f32 %v1947_v57, %v1745_v35  ;;  %5669 = vmatmul.msk.bf16.gmra.mxu2 %vm379_vm0, %v8735_v38  ;;  %v8738_v35 = vld [vmem:[#allocation12_spill] sm:$0xff] }
 0x28b   : > { %5703 = vmatmul.msk.bf16.gmra.mxu3 %vm379_vm0, %v2515_v45  ;;  %v1952_v22 = vpop.f32.mrf.mxu0 }
 0x28d   : > { %v1466_v17 = vpop.f32.mrf.mxu2 }
 0x28e   : > { %v1708_v33 = vpop.f32.mrf.mxu3  ;;  %v1504_v11 = vadd.f32 %v1466_v17, %v8736_v25  ;;  %v2516_v17 = vpack.c.bf16 %v2492_v63, %v2491_v19 }
 0x290   : > { %v1746_v21 = vadd.f32 %v1708_v33, %v1504_v11  ;;  %v6030_v11 = vld [vmem:[%s8694_s6 + $0x8] sm:$0xff] }
 0x291   : > { %3454 = vmatpush.bf16.msrb.mxu2 %v6030_v11  ;;  %v8742_v11 = vld [vmem:[#allocation15_spill] sm:$0xff] }
 0x292   : > { %v1988_v16 = vadd.f32 %v1950_v0, %v1746_v21  ;;  %v7511_v0 = vpop.f32.mrf.mxu1 }
 0x293   : > { %v1955_v55 = vpop.f32.mrf.mxu0  ;;  %8740 = vst [vmem:[#allocation9_spill] sm:$0xff] %v7511_v0  ;;  %v2252_v0 = vld [vmem:[#allocation2 + $0x14f] sm:$0xff] }
 0x294   : > { %v7502_v20 = vadd.f32 %v2192_v30, %v1988_v16  ;;  %v8741_v16 = vld [vmem:[#allocation14_spill] sm:$0xff] }
 0x295   : > { %v1468_v24 = vpop.f32.mrf.mxu2 }
 0x296   : > { %8737 = vst [vmem:[#allocation8_spill] sm:$0xff] %v7502_v20  ;;  %v1710_v57 = vpop.f32.mrf.mxu3  ;;  %5738 = vmatmul.msk.bf16.gmra.mxu0 %vm379_vm0, %v7263_v54  ;;  %v1505_v45 = vadd.f32 %v1468_v24, %v8738_v35  ;;  %v6034_v54 = vld [vmem:[%s8694_s6 + $0x28] sm:$0xff]  ;;  %v2494_v20 = vld [vmem:[#allocation2 + $0x150] sm:$0xff] }
 0x297   : > { %3656 = vmatpush.bf16.msrb.mxu3 %v6034_v54  ;;  %v2251_v35 = vld [vmem:[#allocation2 + $0x147] sm:$0xff] }
 0x298   : > { %v1747_v38 = vadd.f32 %v1710_v57, %v1505_v45 }
 0x29a   : > { %v7507_v33 = vadd.f32 %v1952_v22, %v1747_v38  ;;  %5670 = vmatmul.msk.bf16.gmra.mxu2 %vm379_vm0, %v2274_v51  ;;  %v3186_v51 = vld [vmem:[#allocation3 + $0x8] sm:$0xff]  ;;  %v2197_v19 = vpop.f32.mrf.mxu1 }
 0x29b   : > { %5704 = vmatmul.msk.bf16.gmra.mxu3 %vm379_vm0, %v2516_v17  ;;  %v1957_v25 = vpop.f32.mrf.mxu0  ;;  %v3218_v57 = vpack.c.bf16 %v3187_v28, %v3186_v51 }
 0x29c   : > { %8739 = vst [vmem:[#allocation11_spill] sm:$0xff] %v7507_v33  ;;  %v2493_v33 = vld [vmem:[#allocation2 + $0x148] sm:$0xff] }
 0x29d   : > { %v1471_v21 = vpop.f32.mrf.mxu2  ;;  %5759 = vmatmul.msk.bf16.vlgmr.msra.gmra.mxu1 %vm452_vm1, %v3218_v57 }
 0x29e   : > { %v1713_v30 = vpop.f32.mrf.mxu3  ;;  %v1506_v22 = vadd.f32 %v1471_v21, %v8741_v16  ;;  %v2517_v16 = vpack.c.bf16 %v2494_v20, %v2493_v33  ;;  %v7540_v20 = vld [vmem:[%s8691_s3] ss:$0 sm:$0xff] }
 0x2a0   : > { %v1748_v24 = vadd.f32 %v1713_v30, %v1506_v22  ;;  %v2275_v30 = vpack.c.bf16 %v2252_v0, %v2251_v35  ;;  %v2253_v35 = vld [vmem:[#allocation2 + $0x167] sm:$0xff] }
 0x2a2   : > { %v1990_v32 = vadd.f32 %v1955_v55, %v1748_v24  ;;  %v6036_v55 = vld [vmem:[%s8694_s6 + $0x38] sm:$0xff] }
 0x2a3   : > { %v2849_v63 = vpop.f32.mrf.mxu0  ;;  %3890 = vmatpush.bf16.msrb.mxu0 %v6036_v55 }
 0x2a4   : > { %v7521_v45 = vadd.f32 %v2197_v19, %v1990_v32  ;;  %v7546_v19 = vld [vmem:[%s8692_s4] ss:$0 sm:$0xff] }
 0x2a5   : > { %v1473_v38 = vpop.f32.mrf.mxu2 }
 0x2a6   : > { %v1715_v17 = vpop.f32.mrf.mxu3  ;;  %5739 = vmatmul.msk.bf16.gmra.mxu0 %vm379_vm0, %v7281_v52  ;;  %v1507_v54 = vadd.f32 %v1473_v38, %v8742_v11  ;;  %v6038_v52 = vld [vmem:[%s8694_s6 + $0x48] sm:$0xff] }
 0x2a7   : > { %4124 = vmatpush.bf16.msrb.mxu1 %v6038_v52  ;;  %v2495_v11 = vld [vmem:[#allocation2 + $0x168] sm:$0xff] }
 0x2a8   : > { %v1749_v21 = vadd.f32 %v1715_v17, %v1507_v54  ;;  %v2496_v54 = vld [vmem:[#allocation2 + $0x170] sm:$0xff] }
 0x2aa   : > { %v7529_v22 = vadd.f32 %v1957_v25, %v1749_v21  ;;  %5671 = vmatmul.msk.bf16.gmra.mxu2 %vm379_vm0, %v2275_v30 }
 0x2ab   : > { %5705 = vmatmul.msk.bf16.gmra.mxu3 %vm379_vm0, %v2517_v16  ;;  %v2851_v51 = vpop.f32.mrf.mxu0 }
 0x2ad   : > { %v2365_v28 = vpop.f32.mrf.mxu2 }
 0x2ae   : > { %v2607_v24 = vpop.f32.mrf.mxu3  ;;  %v2445_v57 = vadd.f32 %v2365_v28, %v7283_v42  ;;  %v2254_v42 = vld [vmem:[#allocation2 + $0x16f] sm:$0xff]  ;;  %v2518_v28 = vpack.c.bf16 %v2496_v54, %v2495_v11 }
 0x2af   : > { %v2276_v52 = vpack.c.bf16 %v2254_v42, %v2253_v35 }
 0x2b0   : > { %v2687_v32 = vadd.f32 %v2607_v24, %v2445_v57 }
 0x2b2   : > { %v2929_v33 = vadd.f32 %v2849_v63, %v2687_v32  ;;  %v7553_v63 = vld [vmem:[%s8693_s5] ss:$0 sm:$0xff] }
 0x2b3   : > { %v2854_v0 = vpop.f32.mrf.mxu0 }
 0x2b4   : > { %v2965_v25 = vadd.f32 %v7540_v20, %v2929_v33 }
 0x2b5   : > { %v2367_v38 = vpop.f32.mrf.mxu2 }
 0x2b6   : > { %v2609_v17 = vpop.f32.mrf.mxu3  ;;  %5740 = vmatmul.msk.bf16.gmra.mxu0 %vm379_vm0, %v7302_v3  ;;  %v2997_v55 = vmax.f32 %v2965_v25, 0.0  ;;  %v2446_v21 = vadd.f32 %v2367_v38, %v7296_v6 }
 0x2b8   : > { %v3033_v30 = vmul.f32 %v7546_v19, %v2997_v55  ;;  %v2688_v16 = vadd.f32 %v2609_v17, %v2446_v21  ;;  %v2255_v55 = vld [vmem:[#allocation2 + $0x187] sm:$0xff] }
 0x2ba   : > { %v3069_v24 = vadd.f32 %v7553_v63, %v3033_v30  ;;  %v2930_v57 = vadd.f32 %v2851_v51, %v2688_v16  ;;  %5672 = vmatmul.msk.bf16.gmra.mxu2 %vm379_vm0, %v2276_v52  ;;  %v2256_v16 = vld [vmem:[#allocation2 + $0x18f] sm:$0xff] }
 0x2bb   : > { %5706 = vmatmul.msk.bf16.gmra.mxu3 %vm379_vm0, %v2518_v28  ;;  %v2856_v3 = vpop.f32.mrf.mxu0  ;;  %v2497_v52 = vld [vmem:[#allocation2 + $0x188] sm:$0xff]  ;;  %v2498_v28 = vld [vmem:[#allocation2 + $0x190] sm:$0xff] }
 0x2bc   : > { %3102 = vst.msk [vmem:[#allocation3 + $0x28] sm:$0xff] %vm452_vm1, %v3069_v24  ;;  %v2966_v32 = vadd.f32 %v7540_v20, %v2930_v57 }
 0x2bd   : > { %v2370_v33 = vpop.f32.mrf.mxu2 }
 0x2be   : > { %v2612_v25 = vpop.f32.mrf.mxu3  ;;  %v2998_v6 = vmax.f32 %v2966_v32, 0.0  ;;  %v2447_v38 = vadd.f32 %v2370_v33, %v7304_v4  ;;  %v2277_v32 = vpack.c.bf16 %v2256_v16, %v2255_v55  ;;  %v2519_v33 = vpack.c.bf16 %v2498_v28, %v2497_v52 }
 0x2c0   : > { %v3034_v35 = vmul.f32 %v7546_v19, %v2998_v6  ;;  %v2689_v17 = vadd.f32 %v2612_v25, %v2447_v38 }
 0x2c2   : > { %v3070_v42 = vadd.f32 %v7553_v63, %v3034_v35  ;;  %v2931_v51 = vadd.f32 %v2854_v0, %v2689_v17 }
 0x2c3   : > { %v2859_v11 = vpop.f32.mrf.mxu0  ;;  %v3188_v35 = vld [vmem:[#allocation3 + $0x28] sm:$0xff] }
 0x2c4   : > { %3103 = vst.msk [vmem:[#allocation3 + $0x30] sm:$0xff] %vm452_vm1, %v3070_v42  ;;  %v2967_v54 = vadd.f32 %v7540_v20, %v2931_v51 }
 0x2c5   : > { %v2372_v21 = vpop.f32.mrf.mxu2 }
 0x2c6   : > { %v2614_v30 = vpop.f32.mrf.mxu3  ;;  %5741 = vmatmul.msk.bf16.gmra.mxu0 %vm379_vm0, %v7321_v61  ;;  %v2999_v4 = vmax.f32 %v2967_v54, 0.0  ;;  %v2448_v24 = vadd.f32 %v2372_v21, %v7318_v60 }
 0x2c8   : > { %v3035_v57 = vmul.f32 %v7546_v19, %v2999_v4  ;;  %v2690_v0 = vadd.f32 %v2614_v30, %v2448_v24  ;;  %v2257_v4 = vld [vmem:[#allocation2 + $0x1a7] sm:$0xff] }
 0x2ca   : > { %v3071_v25 = vadd.f32 %v7553_v63, %v3035_v57  ;;  %v2932_v6 = vadd.f32 %v2856_v3, %v2690_v0  ;;  %5673 = vmatmul.msk.bf16.gmra.mxu2 %vm379_vm0, %v2277_v32  ;;  %v2258_v0 = vld [vmem:[#allocation2 + $0x1af] sm:$0xff] }
 0x2cb   : > { %5707 = vmatmul.msk.bf16.gmra.mxu3 %vm379_vm0, %v2519_v33  ;;  %v2861_v38 = vpop.f32.mrf.mxu0  ;;  %v3189_v17 = vld [vmem:[#allocation3 + $0x30] sm:$0xff]  ;;  %v2499_v32 = vld [vmem:[#allocation2 + $0x1a8] sm:$0xff] }
 0x2cc   : > { %3104 = vst.msk [vmem:[#allocation3 + $0x48] sm:$0xff] %vm452_vm1, %v3071_v25  ;;  %v2968_v61 = vadd.f32 %v7540_v20, %v2932_v6  ;;  %v3219_v60 = vpack.c.bf16 %v3189_v17, %v3188_v35  ;;  %v2500_v33 = vld [vmem:[#allocation2 + $0x1b0] sm:$0xff]  ;;  %v2278_v35 = vpack.c.bf16 %v2258_v0, %v2257_v4  ;;  %v2259_v0 = vld [vmem:[#allocation2 + $0x1c7] sm:$0xff] }
 0x2cd   : > { %v2375_v42 = vpop.f32.mrf.mxu2  ;;  %v2520_v17 = vpack.c.bf16 %v2500_v33, %v2499_v32 }
 0x2ce   : > { %v2617_v51 = vpop.f32.mrf.mxu3  ;;  %v3000_v54 = vmax.f32 %v2968_v61, 0.0  ;;  %v2449_v55 = vadd.f32 %v2375_v42, %v7323_v41  ;;  %5760 = vmatmul.msk.bf16.gmra.mxu1 %vm452_vm1, %v3219_v60 }
 0x2d0   : > { %v3036_v3 = vmul.f32 %v7546_v19, %v3000_v54  ;;  %v2691_v21 = vadd.f32 %v2617_v51, %v2449_v55 }
 0x2d2   : > { %v3072_v30 = vadd.f32 %v7553_v63, %v3036_v3  ;;  %v2933_v16 = vadd.f32 %v2859_v11, %v2691_v21 }
 0x2d3   : > { %v2864_v52 = vpop.f32.mrf.mxu0  ;;  %v3190_v51 = vld [vmem:[#allocation3 + $0x48] sm:$0xff] }
 0x2d4   : > { %3105 = vst.msk [vmem:[#allocation3 + $0x50] sm:$0xff] %vm452_vm1, %v3072_v30  ;;  %v2969_v28 = vadd.f32 %v7540_v20, %v2933_v16 }
 0x2d5   : > { %v2377_v24 = vpop.f32.mrf.mxu2 }
 0x2d6   : > { %v2619_v57 = vpop.f32.mrf.mxu3  ;;  %5742 = vmatmul.msk.bf16.gmra.mxu0 %vm379_vm0, %v7337_v2  ;;  %v3001_v41 = vmax.f32 %v2969_v28, 0.0  ;;  %v2450_v25 = vadd.f32 %v2377_v24, %v7334_v18 }
 0x2d8   : > { %v3037_v6 = vmul.f32 %v7546_v19, %v3001_v41  ;;  %v2692_v11 = vadd.f32 %v2619_v57, %v2450_v25  ;;  %v2260_v41 = vld [vmem:[#allocation2 + $0x1cf] sm:$0xff] }
 0x2d9   : > { %v2501_v25 = vld [vmem:[#allocation2 + $0x1c8] sm:$0xff] }
 0x2da   : > { %v3073_v61 = vadd.f32 %v7553_v63, %v3037_v6  ;;  %v2934_v60 = vadd.f32 %v2861_v38, %v2692_v11  ;;  %5674 = vmatmul.msk.bf16.gmra.mxu2 %vm379_vm0, %v2278_v35  ;;  %v2502_v6 = vld [vmem:[#allocation2 + $0x1d0] sm:$0xff] }
 0x2db   : > { %5708 = vmatmul.msk.bf16.gmra.mxu3 %vm379_vm0, %v2520_v17  ;;  %v2866_v42 = vpop.f32.mrf.mxu0  ;;  %v3191_v54 = vld [vmem:[#allocation3 + $0x50] sm:$0xff]  ;;  %v2279_v17 = vpack.c.bf16 %v2260_v41, %v2259_v0  ;;  %v2211_v0 = vadd.f32 %v7353_v53, %v7369_v14 }
 0x2dc   : > { %3106 = vst.msk [vmem:[#allocation3 + $0x68] sm:$0xff] %vm452_vm1, %v3073_v61  ;;  %v2970_v2 = vadd.f32 %v7540_v20, %v2934_v60  ;;  %v3220_v18 = vpack.c.bf16 %v3191_v54, %v3190_v51  ;;  %v2521_v61 = vpack.c.bf16 %v2502_v6, %v2501_v25  ;;  %v2503_v25 = vld [vmem:[#allocation2 + $0x1e8] sm:$0xff]  ;;  %v2504_v6 = vld [vmem:[#allocation2 + $0x1f0] sm:$0xff] }
 0x2dd   : > { %v2380_v55 = vpop.f32.mrf.mxu2 }
 0x2de   : > { %v2622_v3 = vpop.f32.mrf.mxu3  ;;  %v3002_v21 = vmax.f32 %v2970_v2, 0.0  ;;  %v2451_v30 = vadd.f32 %v2380_v55, %v7339_v49  ;;  %5761 = vmatmul.msk.bf16.gmra.mxu1 %vm452_vm1, %v3220_v18 }
 0x2e0   : > { %v3038_v38 = vmul.f32 %v7546_v19, %v3002_v21  ;;  %v2693_v16 = vadd.f32 %v2622_v3, %v2451_v30 }
 0x2e2   : > { %v3074_v28 = vadd.f32 %v7553_v63, %v3038_v38  ;;  %v2935_v4 = vadd.f32 %v2864_v52, %v2693_v16 }
 0x2e3   : > { %v2869_v24 = vpop.f32.mrf.mxu0  ;;  %v3192_v2 = vld [vmem:[#allocation3 + $0x68] sm:$0xff] }
 0x2e4   : > { %3107 = vst.msk [vmem:[#allocation3 + $0x70] sm:$0xff] %vm452_vm1, %v3074_v28  ;;  %v2971_v57 = vadd.f32 %v7540_v20, %v2935_v4 }
 0x2e5   : > { %v2382_v32 = vpop.f32.mrf.mxu2 }
 0x2e6   : > { %v2624_v33 = vpop.f32.mrf.mxu3  ;;  %5743 = vmatmul.msk.bf16.gmra.mxu0 %vm379_vm0, %v7360_v56  ;;  %v3003_v49 = vmax.f32 %v2971_v57, 0.0  ;;  %v2452_v11 = vadd.f32 %v2382_v32, %v7356_v23  ;;  %v2261_v32 = vld [vmem:[#allocation2 + $0x1e7] sm:$0xff] }
 0x2e8   : > { %v3039_v35 = vmul.f32 %v7546_v19, %v3003_v49  ;;  %v2694_v52 = vadd.f32 %v2624_v33, %v2452_v11 }
 0x2ea   : > { %v3075_v60 = vadd.f32 %v7553_v63, %v3039_v35  ;;  %v2936_v51 = vadd.f32 %v2866_v42, %v2694_v52  ;;  %5675 = vmatmul.msk.bf16.gmra.mxu2 %vm379_vm0, %v2279_v17  ;;  %v2522_v17 = vpack.c.bf16 %v2504_v6, %v2503_v25 }
 0x2eb   : > { %5709 = vmatmul.msk.bf16.gmra.mxu3 %vm379_vm0, %v2521_v61  ;;  %v2871_v54 = vpop.f32.mrf.mxu0  ;;  %v3193_v18 = vld [vmem:[#allocation3 + $0x70] sm:$0xff] }
 0x2ec   : > { %3108 = vst.msk [vmem:[#allocation3 + $0x88] sm:$0xff] %vm452_vm1, %v3075_v60  ;;  %v2972_v56 = vadd.f32 %v7540_v20, %v2936_v51  ;;  %v3221_v23 = vpack.c.bf16 %v3193_v18, %v3192_v2 }
 0x2ed   : > { %v2385_v55 = vpop.f32.mrf.mxu2 }
 0x2ee   : > { %v2627_v3 = vpop.f32.mrf.mxu3  ;;  %v3004_v21 = vmax.f32 %v2972_v56, 0.0  ;;  %v2453_v30 = vadd.f32 %v2385_v55, %v7362_v58  ;;  %5762 = vmatmul.msk.bf16.gmra.mxu1 %vm452_vm1, %v3221_v23  ;;  %v2262_v58 = vld [vmem:[#allocation2 + $0x1ef] sm:$0xff] }
 0x2ef   : > { %v2280_v52 = vpack.c.bf16 %v2262_v58, %v2261_v32  ;;  %v2506_v32 = vld [vmem:[#allocation2 + $0x210] sm:$0xff] }
 0x2f0   : > { %v3040_v42 = vmul.f32 %v7546_v19, %v3004_v21  ;;  %v2695_v38 = vadd.f32 %v2627_v3, %v2453_v30  ;;  %v6035_v21 = vld [vmem:[%s8694_s6 + $0x30] sm:$0xff] }
 0x2f1   : > { %3891 = vmatpush.bf16.msrb.mxu0 %v6035_v21 }
 0x2f2   : > { %v3076_v16 = vadd.f32 %v7553_v63, %v3040_v42  ;;  %v2937_v28 = vadd.f32 %v2869_v24, %v2695_v38 }
 0x2f3   : > { %v2874_v4 = vpop.f32.mrf.mxu0  ;;  %v3194_v14 = vld [vmem:[#allocation3 + $0x88] sm:$0xff] }
 0x2f4   : > { %3109 = vst.msk [vmem:[#allocation3 + $0x90] sm:$0xff] %vm452_vm1, %v3076_v16  ;;  %v2973_v57 = vadd.f32 %v7540_v20, %v2937_v28 }
 0x2f5   : > { %v2387_v33 = vpop.f32.mrf.mxu2 }
 0x2f6   : > { %v2629_v41 = vpop.f32.mrf.mxu3  ;;  %5744 = vmatmul.msk.bf16.gmra.mxu0 %vm379_vm0, %v7378_v31  ;;  %v3005_v49 = vmax.f32 %v2973_v57, 0.0  ;;  %v2454_v11 = vadd.f32 %v2387_v33, %v2211_v0  ;;  %v2505_v0 = vld [vmem:[#allocation2 + $0x208] sm:$0xff] }
 0x2f7   : > { %v2523_v25 = vpack.c.bf16 %v2506_v32, %v2505_v0 }
 0x2f8   : > { %v3041_v24 = vmul.f32 %v7546_v19, %v3005_v49  ;;  %v2696_v35 = vadd.f32 %v2629_v41, %v2454_v11 }
 0x2fa   : > { %v3077_v61 = vadd.f32 %v7553_v63, %v3041_v24  ;;  %v2938_v60 = vadd.f32 %v2871_v54, %v2696_v35  ;;  %5676 = vmatmul.msk.bf16.gmra.mxu2 %vm379_vm0, %v2280_v52 }
 0x2fb   : > { %5710 = vmatmul.msk.bf16.gmra.mxu3 %vm379_vm0, %v2522_v17  ;;  %v2876_v53 = vpop.f32.mrf.mxu0  ;;  %v3195_v51 = vld [vmem:[#allocation3 + $0x90] sm:$0xff] }
 0x2fc   : > { %3110 = vst.msk [vmem:[#allocation3 + $0xa8] sm:$0xff] %vm452_vm1, %v3077_v61  ;;  %v2974_v31 = vadd.f32 %v7540_v20, %v2938_v60  ;;  %v3222_v2 = vpack.c.bf16 %v3195_v51, %v3194_v14  ;;  %v2749_v60 = vld [vmem:[#allocation2 + $0x229] sm:$0xff]  ;;  %v6029_v51 = vld [vmem:[%s8694_s6] sm:$0xff] }
 0x2fd   : > { %v2390_v18 = vpop.f32.mrf.mxu2  ;;  %3455 = vmatpush.bf16.msrb.mxu2 %v6029_v51 }
 0x2fe   : > { %v2632_v56 = vpop.f32.mrf.mxu3  ;;  %v3006_v23 = vmax.f32 %v2974_v31, 0.0  ;;  %v2455_v55 = vadd.f32 %v2390_v18, %v7380_v12  ;;  %5763 = vmatmul.msk.bf16.gmra.mxu1 %vm452_vm1, %v3222_v2  ;;  %v2213_v12 = vadd.f32 %v7375_v10, %v7387_v59  ;;  %v6033_v31 = vld [vmem:[%s8694_s6 + $0x20] sm:$0xff] }
 0x2ff   : > { %3657 = vmatpush.bf16.msrb.mxu3 %v6033_v31  ;;  %v8743_v31 = vld [vmem:[#allocation16_spill] sm:$0xff] }
 0x300   : > { %v3042_v54 = vmul.f32 %v7546_v19, %v3006_v23  ;;  %v2697_v3 = vadd.f32 %v2632_v56, %v2455_v55  ;;  %v2266_v55 = vld [vmem:[#allocation2 + $0x22f] sm:$0xff] }
 0x302   : > { %v3078_v30 = vadd.f32 %v7553_v63, %v3042_v54  ;;  %v2939_v42 = vadd.f32 %v2874_v4, %v2697_v3  ;;  %v2507_v54 = vld [vmem:[#allocation2 + $0x228] sm:$0xff]  ;;  %v2508_v3 = vld [vmem:[#allocation2 + $0x230] sm:$0xff] }
 0x303   : > { %v2879_v38 = vpop.f32.mrf.mxu0  ;;  %v3196_v59 = vld [vmem:[#allocation3 + $0xa8] sm:$0xff] }
 0x304   : > { %3111 = vst.msk [vmem:[#allocation3 + $0xb0] sm:$0xff] %vm452_vm1, %v3078_v30  ;;  %v2975_v16 = vadd.f32 %v7540_v20, %v2939_v42  ;;  %v2215_v30 = vadd.f32 %v7393_v44, %v7406_v7 }
 0x305   : > { %v2392_v28 = vpop.f32.mrf.mxu2 }
 0x306   : > { %v2634_v57 = vpop.f32.mrf.mxu3  ;;  %5745 = vmatmul.msk.bf16.gmra.mxu0 %vm379_vm0, %v7396_v47  ;;  %v3007_v33 = vmax.f32 %v2975_v16, 0.0  ;;  %v2456_v41 = vadd.f32 %v2392_v28, %v2213_v12 }
 0x308   : > { %v3043_v4 = vmul.f32 %v7546_v19, %v3007_v33  ;;  %v2698_v58 = vadd.f32 %v2634_v57, %v2456_v41  ;;  %v2524_v57 = vpack.c.bf16 %v2508_v3, %v2507_v54 }
 0x30a   : > { %v3079_v6 = vadd.f32 %v7553_v63, %v3043_v4  ;;  %v2940_v49 = vadd.f32 %v2876_v53, %v2698_v58  ;;  %5677 = vmatmul.msk.bf16.gmra.mxu2 %vm379_vm0, %v7404_v9  ;;  %v2750_v53 = vld [vmem:[#allocation2 + $0x231] sm:$0xff] }
 0x30b   : > { %5711 = vmatmul.msk.bf16.gmra.mxu3 %vm379_vm0, %v2523_v25  ;;  %v2881_v10 = vpop.f32.mrf.mxu0  ;;  %v3197_v11 = vld [vmem:[#allocation3 + $0xb0] sm:$0xff]  ;;  %v2766_v18 = vpack.c.bf16 %v2750_v53, %v2749_v60 }
 0x30c   : > { %3112 = vst.msk [vmem:[#allocation3 + $0xc8] sm:$0xff] %vm452_vm1, %v3079_v6  ;;  %v2976_v47 = vadd.f32 %v7540_v20, %v2940_v49  ;;  %v3223_v24 = vpack.c.bf16 %v3197_v11, %v3196_v59  ;;  %v3135_v53 = vld [vmem:[#allocation3 + $0xf] sm:$0xff] }
 0x30d   : > { %v2395_v35 = vpop.f32.mrf.mxu2 }
 0x30e   : > { %v2637_v52 = vpop.f32.mrf.mxu3  ;;  %v3008_v17 = vmax.f32 %v2976_v47, 0.0  ;;  %v2457_v61 = vadd.f32 %v2395_v35, %v7398_v40  ;;  %5764 = vmatmul.msk.bf16.gmra.mxu1 %vm452_vm1, %v3223_v24  ;;  %v2265_v40 = vld [vmem:[#allocation2 + $0x227] sm:$0xff]  ;;  %v3772_v24 = vld [vmem:[#allocation3 + $0x2f] sm:$0xff] }
 0x30f   : > { %v2282_v28 = vpack.c.bf16 %v2266_v55, %v2265_v40 }
 0x310   : > { %v3044_v9 = vmul.f32 %v7546_v19, %v3008_v17  ;;  %v2699_v14 = vadd.f32 %v2637_v52, %v2457_v61  ;;  %v3771_v52 = vld [vmem:[#allocation3 + $0x27] sm:$0xff] }
 0x311   : > { %v3134_v61 = vld [vmem:[#allocation3 + $0x7] sm:$0xff]  ;;  %v3803_v51 = vpack.c.bf16 %v3772_v24, %v3771_v52  ;;  %v3540_v52 = vld [vmem:[#allocation3 + $0x31] sm:$0xff] }
 0x312   : > { %v3080_v2 = vadd.f32 %v7553_v63, %v3044_v9  ;;  %v2941_v56 = vadd.f32 %v2879_v38, %v2699_v14  ;;  %v3537_v9 = vld [vmem:[#allocation3 + $0x9] sm:$0xff]  ;;  %v3538_v14 = vld [vmem:[#allocation3 + $0x11] sm:$0xff] }
 0x313   : > { %v2884_v23 = vpop.f32.mrf.mxu0  ;;  %v3198_v44 = vld [vmem:[#allocation3 + $0xc8] sm:$0xff]  ;;  %v3569_v54 = vpack.c.bf16 %v3538_v14, %v3537_v9 }
 0x314   : > { %3113 = vst.msk [vmem:[#allocation3 + $0xd0] sm:$0xff] %vm452_vm1, %v3080_v2  ;;  %v2977_v21 = vadd.f32 %v7540_v20, %v2941_v56  ;;  %v2217_v2 = vadd.f32 %v8743_v31, %v7423_v36 }
 0x315   : > { %v2397_v42 = vpop.f32.mrf.mxu2 }
 0x316   : > { %v2639_v16 = vpop.f32.mrf.mxu3  ;;  %5746 = vmatmul.msk.bf16.gmra.mxu0 %vm379_vm0, %v2766_v18  ;;  %v3009_v12 = vmax.f32 %v2977_v21, 0.0  ;;  %v2458_v38 = vadd.f32 %v2397_v42, %v2215_v30 }
 0x318   : > { %v3045_v0 = vmul.f32 %v7546_v19, %v3009_v12  ;;  %v2700_v32 = vadd.f32 %v2639_v16, %v2458_v38 }
 0x31a   : > { %v3081_v33 = vadd.f32 %v7553_v63, %v3045_v0  ;;  %v2942_v41 = vadd.f32 %v2881_v10, %v2700_v32  ;;  %5678 = vmatmul.msk.bf16.gmra.mxu2 %vm379_vm0, %v2282_v28 }
 0x31b   : > { %5712 = vmatmul.msk.bf16.gmra.mxu3 %vm379_vm0, %v2524_v57  ;;  %v2886_v4 = vpop.f32.mrf.mxu0  ;;  %v3199_v7 = vld [vmem:[#allocation3 + $0xd0] sm:$0xff]  ;;  %v6037_v57 = vld [vmem:[%s8694_s6 + $0x40] sm:$0xff] }
 0x31c   : > { %3114 = vst.msk [vmem:[#allocation3 + $0xe8] sm:$0xff] %vm452_vm1, %v3081_v33  ;;  %v2978_v58 = vadd.f32 %v7540_v20, %v2942_v41  ;;  %v3224_v25 = vpack.c.bf16 %v3199_v7, %v3198_v44  ;;  %4125 = vmatpush.bf16.msrb.mxu1 %v6037_v57  ;;  %v7684_v7 = vpop.f32.mrf.mxu1 }
 0x31d   : > { %v2400_v6 = vpop.f32.mrf.mxu2 }
 0x31e   : > { %v2642_v49 = vpop.f32.mrf.mxu3  ;;  %v3010_v59 = vmax.f32 %v2978_v58, 0.0  ;;  %v2459_v11 = vadd.f32 %v2400_v6, %v7415_v26  ;;  %5765 = vmatmul.msk.bf16.gmra.mxu1 %vm452_vm1, %v3224_v25  ;;  %v3774_v58 = vld [vmem:[#allocation3 + $0x4f] sm:$0xff] }
 0x320   : > { %v3046_v10 = vmul.f32 %v7546_v19, %v3010_v59  ;;  %v2701_v47 = vadd.f32 %v2642_v49, %v2459_v11  ;;  %v3773_v59 = vld [vmem:[#allocation3 + $0x47] sm:$0xff] }
 0x321   : > { %v3804_v11 = vpack.c.bf16 %v3774_v58, %v3773_v59 }
 0x322   : > { %v3082_v35 = vadd.f32 %v7553_v63, %v3046_v10  ;;  %v2943_v17 = vadd.f32 %v2884_v23, %v2701_v47  ;;  %v3166_v23 = vpack.c.bf16 %v3135_v53, %v3134_v61 }
 0x323   : > { %v2889_v60 = vpop.f32.mrf.mxu0  ;;  %v3200_v36 = vld [vmem:[#allocation3 + $0xe8] sm:$0xff] }
 0x324   : > { %3115 = vst.msk [vmem:[#allocation3 + $0xf0] sm:$0xff] %vm452_vm1, %v3082_v35  ;;  %v2979_v26 = vadd.f32 %v7540_v20, %v2943_v17  ;;  %v3539_v35 = vld [vmem:[#allocation3 + $0x29] sm:$0xff]  ;;  %v7693_v14 = vpop.f32.mrf.mxu1 }
 0x325   : > { %v2402_v18 = vpop.f32.mrf.mxu2  ;;  %v3570_v9 = vpack.c.bf16 %v3540_v52, %v3539_v35 }
 0x326   : > { %v2644_v56 = vpop.f32.mrf.mxu3  ;;  %5839 = vmatmul.msk.bf16.vlgmr.msrb.gmra.mxu0 %vm452_vm1, %v3803_v51  ;;  %v3011_v40 = vmax.f32 %v2979_v26, 0.0  ;;  %v2460_v55 = vadd.f32 %v2402_v18, %v2217_v2 }
 0x328   : > { %v3047_v3 = vmul.f32 %v7546_v19, %v3011_v40  ;;  %v2702_v21 = vadd.f32 %v2644_v56, %v2460_v55 }
 0x32a   : > { %v3083_v30 = vadd.f32 %v7553_v63, %v3047_v3  ;;  %v2944_v42 = vadd.f32 %v2886_v4, %v2702_v21  ;;  %5783 = vmatmul.msk.bf16.vlgmr.msrb.gmra.mxu2 %vm452_vm1, %v3166_v23  ;;  %v3776_v21 = vld [vmem:[#allocation3 + $0x6f] sm:$0xff] }
 0x32b   : > { %5811 = vmatmul.msk.bf16.vlgmr.msrb.gmra.mxu3 %vm452_vm1, %v3569_v54  ;;  %v2891_v16 = vpop.f32.mrf.mxu0  ;;  %v3201_v12 = vld [vmem:[#allocation3 + $0xf0] sm:$0xff] }
 0x32c   : > { %3116 = vst.msk [vmem:[#allocation3 + $0x108] sm:$0xff] %vm452_vm1, %v3083_v30  ;;  %v2980_v38 = vadd.f32 %v7540_v20, %v2944_v42  ;;  %v3225_v28 = vpack.c.bf16 %v3201_v12, %v3200_v36  ;;  %v3775_v36 = vld [vmem:[#allocation3 + $0x67] sm:$0xff]  ;;  %v7704_v12 = vpop.f32.mrf.mxu1 }
 0x32d   : > { %v2405_v0 = vpop.f32.mrf.mxu2 }
 0x32e   : > { %v2647_v32 = vpop.f32.mrf.mxu3  ;;  %v3012_v33 = vmax.f32 %v2980_v38, 0.0  ;;  %v2461_v41 = vadd.f32 %v2405_v0, %v7432_v29  ;;  %5766 = vmatmul.msk.bf16.gmra.mxu1 %vm452_vm1, %v3225_v28  ;;  %v2219_v29 = vadd.f32 %v7427_v37, %v7436_v8  ;;  %v3805_v38 = vpack.c.bf16 %v3776_v21, %v3775_v36 }
 0x330   : > { %v3048_v4 = vmul.f32 %v7546_v19, %v3012_v33  ;;  %v2703_v44 = vadd.f32 %v2647_v32, %v2461_v41  ;;  %v3541_v32 = vld [vmem:[#allocation3 + $0x49] sm:$0xff]  ;;  %v3542_v33 = vld [vmem:[#allocation3 + $0x51] sm:$0xff] }
 0x332   : > { %v3084_v25 = vadd.f32 %v7553_v63, %v3048_v4  ;;  %v2945_v6 = vadd.f32 %v2889_v60, %v2703_v44 }
 0x333   : > { %v2894_v49 = vpop.f32.mrf.mxu0  ;;  %v3202_v8 = vld [vmem:[#allocation3 + $0x108] sm:$0xff] }
 0x334   : > { %3117 = vst.msk [vmem:[#allocation3 + $0x110] sm:$0xff] %vm452_vm1, %v3084_v25  ;;  %v2981_v10 = vadd.f32 %v7540_v20, %v2945_v6  ;;  %v3571_v25 = vpack.c.bf16 %v3542_v33, %v3541_v32 }
 0x335   : > { %v2407_v47 = vpop.f32.mrf.mxu2 }
 0x336   : > { %v2649_v24 = vpop.f32.mrf.mxu3  ;;  %5840 = vmatmul.msk.bf16.gmra.mxu0 %vm452_vm1, %v3804_v11  ;;  %v3013_v17 = vmax.f32 %v2981_v10, 0.0  ;;  %v2462_v61 = vadd.f32 %v2407_v47, %v2219_v29 }
 0x338   : > { %v3049_v60 = vmul.f32 %v7546_v19, %v3013_v17  ;;  %v2704_v53 = vadd.f32 %v2649_v24, %v2462_v61 }
 0x33a   : > { %v3085_v26 = vadd.f32 %v7553_v63, %v3049_v60  ;;  %v2946_v31 = vadd.f32 %v2891_v16, %v2704_v53  ;;  %5784 = vmatmul.msk.bf16.gmra.mxu2 %vm452_vm1, %v3803_v51  ;;  %v3778_v60 = vld [vmem:[#allocation3 + $0x8f] sm:$0xff] }
 0x33b   : > { %5812 = vmatmul.msk.bf16.gmra.mxu3 %vm452_vm1, %v3570_v9  ;;  %v2896_v37 = vpop.f32.mrf.mxu0  ;;  %v3203_v2 = vld [vmem:[#allocation3 + $0x110] sm:$0xff] }
 0x33c   : > { %3118 = vst.msk [vmem:[#allocation3 + $0x128] sm:$0xff] %vm452_vm1, %v3085_v26  ;;  %v2982_v18 = vadd.f32 %v7540_v20, %v2946_v31  ;;  %v3226_v56 = vpack.c.bf16 %v3203_v2, %v3202_v8  ;;  %v3777_v31 = vld [vmem:[#allocation3 + $0x87] sm:$0xff] }
 0x33d   : > { %v2410_v40 = vpop.f32.mrf.mxu2  ;;  %v3806_v8 = vpack.c.bf16 %v3778_v60, %v3777_v31 }
 0x33e   : > { %v2652_v55 = vpop.f32.mrf.mxu3  ;;  %v3014_v23 = vmax.f32 %v2982_v18, 0.0  ;;  %v2463_v54 = vadd.f32 %v2410_v40, %v7443_v34  ;;  %5767 = vmatmul.msk.bf16.gmra.mxu1 %vm452_vm1, %v3226_v56  ;;  %v2221_v34 = vadd.f32 %v7440_v5, %v7448_v39  ;;  %v3543_v40 = vld [vmem:[#allocation3 + $0x69] sm:$0xff] }
 0x340   : > { %v3050_v3 = vmul.f32 %v7546_v19, %v3014_v23  ;;  %v2705_v51 = vadd.f32 %v2652_v55, %v2463_v54  ;;  %v3544_v55 = vld [vmem:[#allocation3 + $0x71] sm:$0xff] }
 0x341   : > { %v3572_v21 = vpack.c.bf16 %v3544_v55, %v3543_v40  ;;  %v8744_v40 = vld [vmem:[#allocation18_spill] sm:$0xff] }
 0x342   : > { %v3086_v30 = vadd.f32 %v7553_v63, %v3050_v3  ;;  %v2947_v42 = vadd.f32 %v2894_v49, %v2705_v51 }
 0x343   : > { %v2899_v16 = vpop.f32.mrf.mxu0  ;;  %v3204_v59 = vld [vmem:[#allocation3 + $0x128] sm:$0xff] }
 0x344   : > { %3119 = vst.msk [vmem:[#allocation3 + $0x130] sm:$0xff] %vm452_vm1, %v3086_v30  ;;  %v2983_v28 = vadd.f32 %v7540_v20, %v2947_v42 }
 0x345   : > { %v2412_v57 = vpop.f32.mrf.mxu2 }
 0x346   : > { %v2654_v0 = vpop.f32.mrf.mxu3  ;;  %5841 = vmatmul.msk.bf16.gmra.mxu0 %vm452_vm1, %v3805_v38  ;;  %v3015_v41 = vmax.f32 %v2983_v28, 0.0  ;;  %v2464_v4 = vadd.f32 %v2412_v57, %v2221_v34 }
 0x348   : > { %v3051_v44 = vmul.f32 %v7546_v19, %v3015_v41  ;;  %v2706_v58 = vadd.f32 %v2654_v0, %v2464_v4  ;;  %v3780_v4 = vld [vmem:[#allocation3 + $0xaf] sm:$0xff] }
 0x34a   : > { %v3087_v6 = vadd.f32 %v7553_v63, %v3051_v44  ;;  %v2948_v49 = vadd.f32 %v2896_v37, %v2706_v58  ;;  %5785 = vmatmul.msk.bf16.gmra.mxu2 %vm452_vm1, %v3804_v11 }
 0x34b   : > { %5813 = vmatmul.msk.bf16.gmra.mxu3 %vm452_vm1, %v3571_v25  ;;  %v2901_v5 = vpop.f32.mrf.mxu0  ;;  %v7715_v39 = vpop.f32.mrf.mxu1  ;;  %v3205_v10 = vld [vmem:[#allocation3 + $0x130] sm:$0xff] }
 0x34c   : > { %3120 = vst.msk [vmem:[#allocation3 + $0x148] sm:$0xff] %vm452_vm1, %v3087_v6  ;;  %v2984_v29 = vadd.f32 %v7540_v20, %v2948_v49  ;;  %v3227_v47 = vpack.c.bf16 %v3205_v10, %v3204_v59  ;;  %v3779_v6 = vld [vmem:[#allocation3 + $0xa7] sm:$0xff] }
 0x34d   : > { %v2415_v24 = vpop.f32.mrf.mxu2 }
 0x34e   : > { %v2657_v35 = vpop.f32.mrf.mxu3  ;;  %v3016_v52 = vmax.f32 %v2984_v29, 0.0  ;;  %v2465_v17 = vadd.f32 %v2415_v24, %v7455_v48  ;;  %5768 = vmatmul.msk.bf16.gmra.mxu1 %vm452_vm1, %v3227_v47  ;;  %v2223_v48 = vadd.f32 %v7452_v43, %v7460_v15  ;;  %v3545_v47 = vld [vmem:[#allocation3 + $0x89] sm:$0xff]  ;;  %v3546_v24 = vld [vmem:[#allocation3 + $0x91] sm:$0xff] }
 0x350   : > { %v3052_v11 = vmul.f32 %v7546_v19, %v3016_v52  ;;  %v2707_v61 = vadd.f32 %v2657_v35, %v2465_v17 }
 0x352   : > { %v3088_v53 = vadd.f32 %v7553_v63, %v3052_v11  ;;  %v2949_v9 = vadd.f32 %v2899_v16, %v2707_v61  ;;  %v7750_v61 = vpack.c.bf16 %v3546_v24, %v3545_v47 }
 0x353   : > { %v2904_v26 = vpop.f32.mrf.mxu0  ;;  %v7723_v37 = vpop.f32.mrf.mxu1  ;;  %v3206_v16 = vld [vmem:[#allocation3 + $0x148] sm:$0xff] }
 0x354   : > { %3121 = vst.msk [vmem:[#allocation3 + $0x150] sm:$0xff] %vm452_vm1, %v3088_v53  ;;  %v2985_v2 = vadd.f32 %v7540_v20, %v2949_v9 }
 0x355   : > { %v2417_v18 = vpop.f32.mrf.mxu2 }
 0x356   : > { %v2659_v56 = vpop.f32.mrf.mxu3  ;;  %5842 = vmatmul.msk.bf16.gmra.mxu0 %vm452_vm1, %v3806_v8  ;;  %v3017_v23 = vmax.f32 %v2985_v2, 0.0  ;;  %v2466_v54 = vadd.f32 %v2417_v18, %v2223_v48 }
 0x358   : > { %v3053_v3 = vmul.f32 %v7546_v19, %v3017_v23  ;;  %v2708_v51 = vadd.f32 %v2659_v56, %v2466_v54  ;;  %v3782_v54 = vld [vmem:[#allocation3 + $0xcf] sm:$0xff] }
 0x35a   : > { %v3089_v30 = vadd.f32 %v7553_v63, %v3053_v3  ;;  %v2950_v42 = vadd.f32 %v2901_v5, %v2708_v51  ;;  %5786 = vmatmul.msk.bf16.gmra.mxu2 %vm452_vm1, %v3805_v38  ;;  %v3807_v5 = vpack.c.bf16 %v3780_v4, %v3779_v6 }
 0x35b   : > { %5814 = vmatmul.msk.bf16.gmra.mxu3 %vm452_vm1, %v3572_v21  ;;  %v2906_v43 = vpop.f32.mrf.mxu0  ;;  %v7734_v15 = vpop.f32.mrf.mxu1  ;;  %v3207_v36 = vld [vmem:[#allocation3 + $0x150] sm:$0xff] }
 0x35c   : > { %3122 = vst.msk [vmem:[#allocation3 + $0x168] sm:$0xff] %vm452_vm1, %v3089_v30  ;;  %v2986_v28 = vadd.f32 %v7540_v20, %v2950_v42  ;;  %v3228_v34 = vpack.c.bf16 %v3207_v36, %v3206_v16  ;;  %v3781_v30 = vld [vmem:[#allocation3 + $0xc7] sm:$0xff]  ;;  %v8745_v36 = vld [vmem:[#allocation17_spill] sm:$0xff] }
 0x35d   : > { %v2420_v57 = vpop.f32.mrf.mxu2 }
 0x35e   : > { %v2662_v0 = vpop.f32.mrf.mxu3  ;;  %v3018_v32 = vmax.f32 %v2986_v28, 0.0  ;;  %v2467_v33 = vadd.f32 %v2420_v57, %v7467_v1  ;;  %5769 = vmatmul.msk.bf16.gmra.mxu1 %vm452_vm1, %v3228_v34  ;;  %v2225_v1 = vadd.f32 %v7464_v62, %v7472_v46  ;;  %v2227_v28 = vadd.f32 %v8745_v36, %v7484_v13 }
 0x360   : > { %v3054_v38 = vmul.f32 %v7546_v19, %v3018_v32  ;;  %v2709_v41 = vadd.f32 %v2662_v0, %v2467_v33  ;;  %v3547_v0 = vld [vmem:[#allocation3 + $0xa9] sm:$0xff]  ;;  %v3548_v32 = vld [vmem:[#allocation3 + $0xb1] sm:$0xff] }
 0x362   : > { %v3090_v44 = vadd.f32 %v7553_v63, %v3054_v38  ;;  %v2951_v58 = vadd.f32 %v2904_v26, %v2709_v41 }
 0x363   : > { %v2909_v25 = vpop.f32.mrf.mxu0  ;;  %v7742_v49 = vpop.f32.mrf.mxu1  ;;  %v3208_v9 = vld [vmem:[#allocation3 + $0x168] sm:$0xff] }
 0x364   : > { %3123 = vst.msk [vmem:[#allocation3 + $0x170] sm:$0xff] %vm452_vm1, %v3090_v44  ;;  %v2987_v59 = vadd.f32 %v7540_v20, %v2951_v58  ;;  %v7775_v44 = vpack.c.bf16 %v3548_v32, %v3547_v0 }
 0x365   : > { %v2422_v10 = vpop.f32.mrf.mxu2 }
 0x366   : > { %v2664_v29 = vpop.f32.mrf.mxu3  ;;  %5843 = vmatmul.msk.bf16.gmra.mxu0 %vm452_vm1, %v3807_v5  ;;  %v3019_v35 = vmax.f32 %v2987_v59, 0.0  ;;  %v2468_v52 = vadd.f32 %v2422_v10, %v2225_v1 }
 0x368   : > { %v3055_v17 = vmul.f32 %v7546_v19, %v3019_v35  ;;  %v2710_v11 = vadd.f32 %v2664_v29, %v2468_v52 }
 0x36a   : > { %v3091_v60 = vadd.f32 %v7553_v63, %v3055_v17  ;;  %v2952_v53 = vadd.f32 %v2906_v43, %v2710_v11  ;;  %5787 = vmatmul.msk.bf16.gmra.mxu2 %vm452_vm1, %v3806_v8  ;;  %v3808_v43 = vpack.c.bf16 %v3782_v54, %v3781_v30  ;;  %v3784_v11 = vld [vmem:[#allocation3 + $0xef] sm:$0xff] }
 0x36b   : > { %5815 = vmatmul.msk.bf16.gmra.mxu3 %vm452_vm1, %v7750_v61  ;;  %v2911_v62 = vpop.f32.mrf.mxu0  ;;  %v7756_v46 = vpop.f32.mrf.mxu1  ;;  %v3209_v26 = vld [vmem:[#allocation3 + $0x170] sm:$0xff] }
 0x36c   : > { %3124 = vst.msk [vmem:[#allocation3 + $0x188] sm:$0xff] %vm452_vm1, %v3091_v60  ;;  %v2988_v31 = vadd.f32 %v7540_v20, %v2952_v53  ;;  %v7760_v2 = vpack.c.bf16 %v3209_v26, %v3208_v9  ;;  %v3783_v9 = vld [vmem:[#allocation3 + $0xe7] sm:$0xff] }
 0x36d   : > { %v2425_v48 = vpop.f32.mrf.mxu2 }
 0x36e   : > { %v2667_v18 = vpop.f32.mrf.mxu3  ;;  %v3020_v56 = vmax.f32 %v2988_v31, 0.0  ;;  %v2469_v55 = vadd.f32 %v2425_v48, %v8744_v40  ;;  %5770 = vmatmul.msk.bf16.gmra.mxu1 %vm452_vm1, %v7760_v2  ;;  %v3809_v31 = vpack.c.bf16 %v3784_v11, %v3783_v9 }
 0x370   : > { %v3056_v8 = vmul.f32 %v7546_v19, %v3020_v56  ;;  %v2711_v23 = vadd.f32 %v2667_v18, %v2469_v55  ;;  %v3549_v55 = vld [vmem:[#allocation3 + $0xc9] sm:$0xff] }
 0x372   : > { %v3092_v3 = vadd.f32 %v7553_v63, %v3056_v8  ;;  %v2953_v51 = vadd.f32 %v2909_v25, %v2711_v23  ;;  %v3550_v8 = vld [vmem:[#allocation3 + $0xd1] sm:$0xff] }
 0x373   : > { %v2914_v21 = vpop.f32.mrf.mxu0  ;;  %v7767_v42 = vpop.f32.mrf.mxu1  ;;  %v3210_v59 = vld [vmem:[#allocation3 + $0x188] sm:$0xff] }
 0x374   : > { %3125 = vst.msk [vmem:[#allocation3 + $0x190] sm:$0xff] %vm452_vm1, %v3092_v3  ;;  %v2989_v16 = vadd.f32 %v7540_v20, %v2953_v51 }
 0x375   : > { %v2427_v34 = vpop.f32.mrf.mxu2 }
 0x376   : > { %v2669_v57 = vpop.f32.mrf.mxu3  ;;  %5844 = vmatmul.msk.bf16.gmra.mxu0 %vm452_vm1, %v3808_v43  ;;  %v3021_v33 = vmax.f32 %v2989_v16, 0.0  ;;  %v2470_v38 = vadd.f32 %v2427_v34, %v2227_v28 }
 0x378   : > { %v3057_v41 = vmul.f32 %v7546_v19, %v3021_v33  ;;  %v2712_v4 = vadd.f32 %v2669_v57, %v2470_v38  ;;  %v8747_v38 = vld [vmem:[#allocation8_spill] sm:$0xff] }
 0x37a   : > { %v3093_v58 = vadd.f32 %v7553_v63, %v3057_v41  ;;  %v2954_v25 = vadd.f32 %v2911_v62, %v2712_v4  ;;  %5788 = vmatmul.msk.bf16.gmra.mxu2 %vm452_vm1, %v3807_v5 }
 0x37b   : > { %5816 = vmatmul.msk.bf16.gmra.mxu3 %vm452_vm1, %v7775_v44  ;;  %v2916_v13 = vpop.f32.mrf.mxu0  ;;  %v7781_v6 = vpop.f32.mrf.mxu1  ;;  %v3211_v1 = vld [vmem:[#allocation3 + $0x190] sm:$0xff] }
 0x37c   : > { %3126 = vst.msk [vmem:[#allocation3 + $0x1a8] sm:$0xff] %vm452_vm1, %v3093_v58  ;;  %v2990_v10 = vadd.f32 %v7540_v20, %v2954_v25  ;;  %v7785_v29 = vpack.c.bf16 %v3211_v1, %v3210_v59  ;;  %v3786_v25 = vld [vmem:[#allocation3 + $0x10f] sm:$0xff]  ;;  %v3785_v1 = vld [vmem:[#allocation3 + $0x107] sm:$0xff] }
 0x37d   : > { %v2430_v47 = vpop.f32.mrf.mxu2 }
 0x37e   : > { %v2672_v24 = vpop.f32.mrf.mxu3  ;;  %v3022_v35 = vmax.f32 %v2990_v10, 0.0  ;;  %v2471_v52 = vadd.f32 %v2430_v47, %v7489_v27  ;;  %5771 = vmatmul.msk.bf16.gmra.mxu1 %vm452_vm1, %v7785_v29  ;;  %v8746_v27 = vld [vmem:[#allocation7_spill] sm:$0xff]  ;;  %v7825_v47 = vpack.c.bf16 %v3786_v25, %v3785_v1 }
 0x37f   : > { %v2229_v18 = vadd.f32 %v8746_v27, %v7496_v50 }
 0x380   : > { %v3058_v5 = vmul.f32 %v7546_v19, %v3022_v35  ;;  %v2713_v17 = vadd.f32 %v2672_v24, %v2471_v52  ;;  %v7830_v24 = vld [vmem:[%s8691_s3] ss:$0 sm:$0xff] }
 0x381   : > { %v8748_v52 = vld [vmem:[#allocation11_spill] sm:$0xff] }
 0x382   : > { %v3094_v60 = vadd.f32 %v7553_v63, %v3058_v5  ;;  %v2955_v53 = vadd.f32 %v2914_v21, %v2713_v17  ;;  %v7800_v21 = vpack.c.bf16 %v3550_v8, %v3549_v55  ;;  %v8749_v5 = vld [vmem:[#allocation9_spill] sm:$0xff] }
 0x383   : > { %v2919_v62 = vpop.f32.mrf.mxu0  ;;  %v7792_v26 = vpop.f32.mrf.mxu1  ;;  %v3212_v28 = vld [vmem:[#allocation3 + $0x1a8] sm:$0xff]  ;;  %v2231_v17 = vadd.f32 %v8749_v5, %v8748_v52  ;;  %v3554_v5 = vld [vmem:[#allocation3 + $0x111] sm:$0xff] }
 0x384   : > { %3127 = vst.msk [vmem:[#allocation3 + $0x1b0] sm:$0xff] %vm452_vm1, %v3094_v60  ;;  %v2991_v48 = vadd.f32 %v7540_v20, %v2955_v53  ;;  %v3551_v60 = vld [vmem:[#allocation3 + $0xe9] sm:$0xff]  ;;  %v3552_v53 = vld [vmem:[#allocation3 + $0xf1] sm:$0xff] }
 0x385   : > { %v2432_v56 = vpop.f32.mrf.mxu2  ;;  %v3553_v52 = vld [vmem:[#allocation3 + $0x109] sm:$0xff] }
 0x386   : > { %v2674_v40 = vpop.f32.mrf.mxu3  ;;  %5845 = vmatmul.msk.bf16.gmra.mxu0 %vm452_vm1, %v3809_v31  ;;  %v3023_v23 = vmax.f32 %v2991_v48, 0.0  ;;  %v2472_v54 = vadd.f32 %v2432_v56, %v2229_v18  ;;  %v7838_v18 = vpack.c.bf16 %v3552_v53, %v3551_v60  ;;  %v7843_v56 = vld [vmem:[%s8693_s5] ss:$0 sm:$0xff] }
 0x388   : > { %v3059_v3 = vmul.f32 %v7546_v19, %v3023_v23  ;;  %v2714_v51 = vadd.f32 %v2674_v40, %v2472_v54 }
 0x38a   : > { %v3095_v30 = vadd.f32 %v7553_v63, %v3059_v3  ;;  %v2956_v16 = vadd.f32 %v2916_v13, %v2714_v51  ;;  %5789 = vmatmul.msk.bf16.gmra.mxu2 %vm452_vm1, %v3808_v43  ;;  %v7818_v43 = vld [vmem:[%s8692_s4] ss:$0 sm:$0xff]  ;;  %v6040_v51 = vld [vmem:[%s8694_s6 + $0x58] sm:$0xff] }
 0x38b   : > { %5817 = vmatmul.msk.bf16.gmra.mxu3 %vm452_vm1, %v7800_v21  ;;  %v2921_v50 = vpop.f32.mrf.mxu0  ;;  %v7806_v36 = vpop.f32.mrf.mxu1  ;;  %v3213_v34 = vld [vmem:[#allocation3 + $0x1b0] sm:$0xff]  ;;  %4358 = vmatpush.bf16.msra.mxu2 %v6040_v51 }
 0x38c   : > { %3128 = vst.msk [vmem:[#allocation3 + $0x1c8] sm:$0xff] %vm452_vm1, %v3095_v30  ;;  %v2992_v19 = vadd.f32 %v7540_v20, %v2956_v16  ;;  %v7810_v57 = vpack.c.bf16 %v3213_v34, %v3212_v28  ;;  %v6042_v30 = vld [vmem:[%s8694_s6 + $0x68] sm:$0xff] }
 0x38d   : > { %v2435_v0 = vpop.f32.mrf.mxu2  ;;  %4593 = vmatpush.bf16.msra.mxu3 %v6042_v30 }
 0x38e   : > { %v2677_v32 = vpop.f32.mrf.mxu3  ;;  %v3024_v33 = vmax.f32 %v2992_v19, 0.0  ;;  %v2473_v41 = vadd.f32 %v2435_v0, %v8747_v38  ;;  %5772 = vmatmul.msk.bf16.gmra.mxu1 %vm452_vm1, %v7810_v57 }
 0x390   : > { %v3060_v4 = vmul.f32 %v7818_v43, %v3024_v33  ;;  %v2715_v58 = vadd.f32 %v2677_v32, %v2473_v41  ;;  %v3788_v33 = vld [vmem:[#allocation3 + $0x12f] sm:$0xff] }
 0x392   : > { %v3096_v20 = vadd.f32 %v7553_v63, %v3060_v4  ;;  %v2957_v13 = vadd.f32 %v2919_v62, %v2715_v58  ;;  %v3787_v58 = vld [vmem:[#allocation3 + $0x127] sm:$0xff] }
 0x393   : > { %v2924_v59 = vpop.f32.mrf.mxu0  ;;  %v7822_v10 = vpop.f32.mrf.mxu1  ;;  %v3214_v8 = vld [vmem:[#allocation3 + $0x1c8] sm:$0xff] }
 0x394   : > { %3129 = vst.msk [vmem:[#allocation3 + $0x1d0] sm:$0xff] %vm452_vm1, %v3096_v20  ;;  %v2993_v35 = vadd.f32 %v7830_v24, %v2957_v13  ;;  %v3811_v20 = vpack.c.bf16 %v3788_v33, %v3787_v58  ;;  %v4006_v58 = vld [vmem:[#allocation3 + $0x30] sm:$0xff] }
 0x395   : > { %v2437_v63 = vpop.f32.mrf.mxu2 }
 0x396   : > { %v2679_v11 = vpop.f32.mrf.mxu3  ;;  %5846 = vmatmul.msk.bf16.gmra.mxu0 %vm452_vm1, %v7825_v47  ;;  %v3025_v62 = vmax.f32 %v2993_v35, 0.0  ;;  %v2474_v9 = vadd.f32 %v2437_v63, %v2231_v17  ;;  %v6044_v63 = vld [vmem:[%s8694_s6 + $0x78] sm:$0xff] }
 0x397   : > { %4827 = vmatpush.bf16.msra.mxu0 %v6044_v63  ;;  %v3792_v63 = vld [vmem:[#allocation3 + $0x16f] sm:$0xff] }
 0x398   : > { %v3061_v48 = vmul.f32 %v7818_v43, %v3025_v62  ;;  %v2716_v27 = vadd.f32 %v2679_v11, %v2474_v9  ;;  %v6046_v11 = vld [vmem:[%s8694_s6 + $0x88] sm:$0xff] }
 0x399   : > { %5061 = vmatpush.bf16.msra.mxu1 %v6046_v11 }
 0x39a   : > { %v3097_v40 = vadd.f32 %v7843_v56, %v3061_v48  ;;  %v2958_v55 = vadd.f32 %v2921_v50, %v2716_v27  ;;  %5790 = vmatmul.msk.bf16.gmra.mxu2 %vm452_vm1, %v3809_v31 }
 0x39b   : > { %5818 = vmatmul.msk.bf16.gmra.mxu3 %vm452_vm1, %v7838_v18  ;;  %v2926_v23 = vpop.f32.mrf.mxu0  ;;  %v7849_v54 = vpop.f32.mrf.mxu1  ;;  %v3215_v3 = vld [vmem:[#allocation3 + $0x1d0] sm:$0xff] }
 0x39c   : > { %3130 = vst.msk [vmem:[#allocation3 + $0x1e8] sm:$0xff] %vm452_vm1, %v3097_v40  ;;  %v2994_v31 = vadd.f32 %v7830_v24, %v2958_v55  ;;  %v7859_v16 = vpack.c.bf16 %v3215_v3, %v3214_v8 }
 0x39d   : > { %v2440_v50 = vpop.f32.mrf.mxu2 }
 0x39e   : > { %v2682_v28 = vpop.f32.mrf.mxu3  ;;  %v3026_v34 = vmax.f32 %v2994_v31, 0.0  ;;  %v2475_v19 = vadd.f32 %v2440_v50, %v7521_v45  ;;  %5773 = vmatmul.msk.bf16.gmra.mxu1 %vm452_vm1, %v7859_v16  ;;  %v2233_v45 = vadd.f32 %v7684_v7, %v7529_v22  ;;  %v7880_v22 = vpack.c.bf16 %v3554_v5, %v3553_v52  ;;  %v3790_v50 = vld [vmem:[#allocation3 + $0x14f] sm:$0xff] }
 0x3a0   : > { %v3062_v0 = vmul.f32 %v7818_v43, %v3026_v34  ;;  %v2717_v32 = vadd.f32 %v2682_v28, %v2475_v19 }
 0x3a2   : > { %v3098_v38 = vadd.f32 %v7843_v56, %v3062_v0  ;;  %v2959_v41 = vadd.f32 %v2924_v59, %v2717_v32 }
 0x3a3   : > { %v3893_v4 = vpop.f32.mrf.mxu0  ;;  %v7866_v25 = vpop.f32.mrf.mxu1  ;;  %v3216_v27 = vld [vmem:[#allocation3 + $0x1e8] sm:$0xff] }
 0x3a4   : > { %3131 = vst.msk [vmem:[#allocation3 + $0x1f0] sm:$0xff] %vm452_vm1, %v3098_v38  ;;  %v2995_v13 = vadd.f32 %v7830_v24, %v2959_v41  ;;  %v3555_v38 = vld [vmem:[#allocation3 + $0x129] sm:$0xff]  ;;  %v3556_v41 = vld [vmem:[#allocation3 + $0x131] sm:$0xff] }
 0x3a5   : > { %v2442_v1 = vpop.f32.mrf.mxu2 }
 0x3a6   : > { %v2684_v35 = vpop.f32.mrf.mxu3  ;;  %5847 = vmatmul.msk.bf16.gmra.mxu0 %vm452_vm1, %v3811_v20  ;;  %v3027_v17 = vmax.f32 %v2995_v13, 0.0  ;;  %v2476_v59 = vadd.f32 %v2442_v1, %v2233_v45 }
 0x3a8   : > { %v3063_v60 = vmul.f32 %v7818_v43, %v3027_v17  ;;  %v2718_v53 = vadd.f32 %v2684_v35, %v2476_v59  ;;  %v4005_v35 = vld [vmem:[#allocation3 + $0x28] sm:$0xff] }
 0x3a9   : > { %v4037_v52 = vpack.c.bf16 %v4006_v58, %v4005_v35  ;;  %v3559_v35 = vld [vmem:[#allocation3 + $0x169] sm:$0xff] }
 0x3aa   : > { %v3099_v7 = vadd.f32 %v7843_v56, %v3063_v60  ;;  %v2960_v62 = vadd.f32 %v2926_v23, %v2718_v53  ;;  %5791 = vmatmul.msk.bf16.gmra.mxu2 %vm452_vm1, %v7825_v47  ;;  %v3791_v60 = vld [vmem:[#allocation3 + $0x167] sm:$0xff] }
 0x3ab   : > { %5819 = vmatmul.msk.bf16.gmra.mxu3 %vm452_vm1, %v7880_v22  ;;  %v3895_v9 = vpop.f32.mrf.mxu0  ;;  %v7887_v48 = vpop.f32.mrf.mxu1  ;;  %v3217_v40 = vld [vmem:[#allocation3 + $0x1f0] sm:$0xff] }
 0x3ac   : > { %3132 = vst.msk [vmem:[#allocation3 + $0x208] sm:$0xff] %vm452_vm1, %v3099_v7  ;;  %v2996_v55 = vadd.f32 %v7830_v24, %v2960_v62  ;;  %v7891_v8 = vpack.c.bf16 %v3217_v40, %v3216_v27  ;;  %v3789_v24 = vld [vmem:[#allocation3 + $0x147] sm:$0xff]  ;;  %v7923_v7 = vpack.c.bf16 %v3792_v63, %v3791_v60  ;;  %v3558_v40 = vld [vmem:[#allocation3 + $0x151] sm:$0xff] }
 0x3ad   : > { %v3457_v3 = vpop.f32.mrf.mxu2  ;;  %v7903_v32 = vpack.c.bf16 %v3790_v50, %v3789_v24  ;;  %v3557_v27 = vld [vmem:[#allocation3 + $0x149] sm:$0xff] }
 0x3ae   : > { %v3659_v51 = vpop.f32.mrf.mxu3  ;;  %v3028_v23 = vmax.f32 %v2996_v55, 0.0  ;;  %v3458_v30 = vadd.f32 %v3457_v3, %v7693_v14  ;;  %5774 = vmatmul.msk.bf16.gmra.mxu1 %vm452_vm1, %v7891_v8  ;;  %8751 = vst [vmem:[#allocation10_spill] sm:$0xff] %v7923_v7  ;;  %v7928_v3 = vpack.c.bf16 %v3558_v40, %v3557_v27  ;;  %v4009_v60 = vld [vmem:[#allocation3 + $0x68] sm:$0xff] }
 0x3af   : > { %8750 = vst [vmem:[#allocation13_spill] sm:$0xff] %v7903_v32 }
 0x3b0   : > { %v3064_v47 = vmul.f32 %v7818_v43, %v3028_v23  ;;  %v3739_v31 = vadd.f32 %v3659_v51, %v3458_v30  ;;  %8752 = vst [vmem:[#allocation12_spill] sm:$0xff] %v7928_v3  ;;  %v4008_v51 = vld [vmem:[#allocation3 + $0x50] sm:$0xff] }
 0x3b2   : > { %v3100_v28 = vadd.f32 %v7843_v56, %v3064_v47  ;;  %v7898_v34 = vadd.f32 %v3893_v4, %v3739_v31  ;;  %v7908_v4 = vpack.c.bf16 %v3556_v41, %v3555_v38  ;;  %v4007_v31 = vld [vmem:[#allocation3 + $0x48] sm:$0xff] }
 0x3b3   : > { %v3898_v19 = vpop.f32.mrf.mxu0  ;;  %v7900_v0 = vpop.f32.mrf.mxu1  ;;  %v7938_v50 = vpack.c.bf16 %v4008_v51, %v4007_v31  ;;  %v3793_v41 = vld [vmem:[#allocation3 + $0x187] sm:$0xff] }
 0x3b4   : > { %3133 = vst.msk [vmem:[#allocation3 + $0x210] sm:$0xff] %vm452_vm1, %v3100_v28 }
 0x3b5   : > { %v3459_v14 = vpop.f32.mrf.mxu2 }
 0x3b6   : > { %v3661_v33 = vpop.f32.mrf.mxu3  ;;  %5848 = vmatmul.msk.bf16.gmra.mxu0 %vm452_vm1, %v7903_v32  ;;  %v3460_v43 = vadd.f32 %v3459_v14, %v7704_v12  ;;  %v3794_v14 = vld [vmem:[#allocation3 + $0x18f] sm:$0xff] }
 0x3b8   : > { %v3740_v56 = vadd.f32 %v3661_v33, %v3460_v43 }
 0x3ba   : > { %5792 = vmatmul.msk.bf16.gmra.mxu2 %vm452_vm1, %v3811_v20  ;;  %v7913_v13 = vadd.f32 %v3895_v9, %v3740_v56  ;;  %v7947_v56 = vpack.c.bf16 %v3794_v14, %v3793_v41  ;;  %v3562_v14 = vld [vmem:[#allocation3 + $0x191] sm:$0xff] }
 0x3bb   : > { %5820 = vmatmul.msk.bf16.gmra.mxu3 %vm452_vm1, %v7908_v4  ;;  %v3900_v45 = vpop.f32.mrf.mxu0  ;;  %v7915_v1 = vpop.f32.mrf.mxu1 }
 0x3bc   : > { %8753 = vst [vmem:[#allocation14_spill] sm:$0xff] %v7947_v56 }
 0x3bd   : > { %v3462_v5 = vpop.f32.mrf.mxu2 }
 0x3be   : > { %v3664_v17 = vpop.f32.mrf.mxu3  ;;  %v3463_v12 = vadd.f32 %v3462_v5, %v7715_v39  ;;  %5867 = vmatmul.msk.bf16.vlgmr.msrb.gmra.mxu1 %vm452_vm1, %v4037_v52  ;;  %v3560_v52 = vld [vmem:[#allocation3 + $0x171] sm:$0xff] }
 0x3c0   : > { %v3741_v59 = vadd.f32 %v3664_v17, %v3463_v12  ;;  %v7952_v17 = vpack.c.bf16 %v3560_v52, %v3559_v35  ;;  %v4010_v12 = vld [vmem:[#allocation3 + $0x70] sm:$0xff] }
 0x3c2   : > { %v7919_v11 = vadd.f32 %v3898_v19, %v3741_v59  ;;  %8754 = vst [vmem:[#allocation15_spill] sm:$0xff] %v7952_v17 }
 0x3c3   : > { %v3903_v20 = vpop.f32.mrf.mxu0  ;;  %v7921_v53 = vpop.f32.mrf.mxu1 }
 0x3c5   : > { %v3464_v62 = vpop.f32.mrf.mxu2 }
 0x3c6   : > { %v3666_v9 = vpop.f32.mrf.mxu3  ;;  %5849 = vmatmul.msk.bf16.gmra.mxu0 %vm452_vm1, %v7923_v7  ;;  %v3465_v39 = vadd.f32 %v3464_v62, %v7723_v37  ;;  %v7962_v62 = vpack.c.bf16 %v4010_v12, %v4009_v60 }
 0x3c8   : > { %v3742_v55 = vadd.f32 %v3666_v9, %v3465_v39  ;;  %v3796_v39 = vld [vmem:[#allocation3 + $0x1af] sm:$0xff] }
 0x3ca   : > { %5793 = vmatmul.msk.bf16.gmra.mxu2 %vm452_vm1, %v7903_v32  ;;  %v7934_v23 = vadd.f32 %v3900_v45, %v3742_v55 }
 0x3cb   : > { %5821 = vmatmul.msk.bf16.gmra.mxu3 %vm452_vm1, %v7928_v3  ;;  %v3905_v30 = vpop.f32.mrf.mxu0  ;;  %v7936_v47 = vpop.f32.mrf.mxu1 }
 0x3cd   : > { %v3467_v28 = vpop.f32.mrf.mxu2 }
 0x3ce   : > { %v3669_v37 = vpop.f32.mrf.mxu3  ;;  %v3468_v19 = vadd.f32 %v3467_v28, %v7734_v15  ;;  %5868 = vmatmul.msk.bf16.gmra.mxu1 %vm452_vm1, %v7938_v50 }
 0x3d0   : > { %v3743_v24 = vadd.f32 %v3669_v37, %v3468_v19 }
 0x3d2   : > { %v7943_v33 = vadd.f32 %v3903_v20, %v3743_v24  ;;  %v3561_v24 = vld [vmem:[#allocation3 + $0x189] sm:$0xff] }
 0x3d3   : > { %v3908_v38 = vpop.f32.mrf.mxu0  ;;  %v7945_v43 = vpop.f32.mrf.mxu1 }
 0x3d5   : > { %v3469_v58 = vpop.f32.mrf.mxu2 }
 0x3d6   : > { %v3671_v45 = vpop.f32.mrf.mxu3  ;;  %5850 = vmatmul.msk.bf16.gmra.mxu0 %vm452_vm1, %v7947_v56  ;;  %v3470_v15 = vadd.f32 %v3469_v58, %v7742_v49  ;;  %v7976_v58 = vpack.c.bf16 %v3562_v14, %v3561_v24  ;;  %v3563_v24 = vld [vmem:[#allocation3 + $0x1a9] sm:$0xff]  ;;  %v3564_v14 = vld [vmem:[#allocation3 + $0x1b1] sm:$0xff] }
 0x3d8   : > { %v3744_v5 = vadd.f32 %v3671_v45, %v3470_v15  ;;  %8756 = vst [vmem:[#allocation18_spill] sm:$0xff] %v7976_v58  ;;  %v4011_v15 = vld [vmem:[#allocation3 + $0x88] sm:$0xff] }
 0x3da   : > { %5794 = vmatmul.msk.bf16.gmra.mxu2 %vm452_vm1, %v7923_v7  ;;  %v7958_v59 = vadd.f32 %v3905_v30, %v3744_v5  ;;  %v3795_v30 = vld [vmem:[#allocation3 + $0x1a7] sm:$0xff]  ;;  %v4475_v7 = vld [vmem:[#allocation3 + $0x4f] sm:$0xff] }
 0x3db   : > { %5822 = vmatmul.msk.bf16.gmra.mxu3 %vm452_vm1, %v7952_v17  ;;  %v3910_v63 = vpop.f32.mrf.mxu0  ;;  %v7960_v20 = vpop.f32.mrf.mxu1  ;;  %v7971_v28 = vpack.c.bf16 %v3796_v39, %v3795_v30 }
 0x3dd   : > { %v3472_v9 = vpop.f32.mrf.mxu2  ;;  %8755 = vst [vmem:[#allocation16_spill] sm:$0xff] %v7971_v28 }
 0x3de   : > { %v3674_v49 = vpop.f32.mrf.mxu3  ;;  %v3473_v27 = vadd.f32 %v3472_v9, %v7756_v46  ;;  %5869 = vmatmul.msk.bf16.gmra.mxu1 %vm452_vm1, %v7962_v62 }
 0x3e0   : > { %v3745_v40 = vadd.f32 %v3674_v49, %v3473_v27  ;;  %v3798_v49 = vld [vmem:[#allocation3 + $0x1cf] sm:$0xff] }
 0x3e2   : > { %v7967_v55 = vadd.f32 %v3908_v38, %v3745_v40  ;;  %v4012_v38 = vld [vmem:[#allocation3 + $0x90] sm:$0xff] }
 0x3e3   : > { %v3913_v51 = vpop.f32.mrf.mxu0  ;;  %v7969_v31 = vpop.f32.mrf.mxu1  ;;  %v7986_v5 = vpack.c.bf16 %v4012_v38, %v4011_v15 }
 0x3e5   : > { %v3474_v37 = vpop.f32.mrf.mxu2 }
 0x3e6   : > { %v3676_v19 = vpop.f32.mrf.mxu3  ;;  %5851 = vmatmul.msk.bf16.gmra.mxu0 %vm452_vm1, %v7971_v28  ;;  %v3475_v46 = vadd.f32 %v3474_v37, %v7767_v42 }
 0x3e8   : > { %v3746_v41 = vadd.f32 %v3676_v19, %v3475_v46 }
 0x3ea   : > { %5795 = vmatmul.msk.bf16.gmra.mxu2 %vm452_vm1, %v7947_v56  ;;  %v7982_v45 = vadd.f32 %v3910_v63, %v3746_v41  ;;  %v3797_v63 = vld [vmem:[#allocation3 + $0x1c7] sm:$0xff]  ;;  %v8000_v41 = vpack.c.bf16 %v3564_v14, %v3563_v24 }
 0x3eb   : > { %5823 = vmatmul.msk.bf16.gmra.mxu3 %vm452_vm1, %v7976_v58  ;;  %v3915_v35 = vpop.f32.mrf.mxu0  ;;  %v7984_v52 = vpop.f32.mrf.mxu1  ;;  %v7995_v30 = vpack.c.bf16 %v3798_v49, %v3797_v63  ;;  %v3799_v14 = vld [vmem:[#allocation3 + $0x1e7] sm:$0xff] }
 0x3ec   : > { %8758 = vst [vmem:[#allocation7_spill] sm:$0xff] %v8000_v41 }
 0x3ed   : > { %v3477_v12 = vpop.f32.mrf.mxu2  ;;  %8757 = vst [vmem:[#allocation17_spill] sm:$0xff] %v7995_v30 }
 0x3ee   : > { %v3679_v42 = vpop.f32.mrf.mxu3  ;;  %v3478_v60 = vadd.f32 %v3477_v12, %v7781_v6  ;;  %5870 = vmatmul.msk.bf16.gmra.mxu1 %vm452_vm1, %v7986_v5 }
 0x3f0   : > { %v3747_v9 = vadd.f32 %v3679_v42, %v3478_v60  ;;  %v4013_v42 = vld [vmem:[#allocation3 + $0xa8] sm:$0xff] }
 0x3f2   : > { %v7991_v27 = vadd.f32 %v3913_v51, %v3747_v9  ;;  %v4014_v51 = vld [vmem:[#allocation3 + $0xb0] sm:$0xff] }
 0x3f3   : > { %v3918_v40 = vpop.f32.mrf.mxu0  ;;  %v7993_v39 = vpop.f32.mrf.mxu1  ;;  %v8010_v60 = vpack.c.bf16 %v4014_v51, %v4013_v42  ;;  %v3565_v42 = vld [vmem:[#allocation3 + $0x1c9] sm:$0xff] }
 0x3f5   : > { %v3479_v37 = vpop.f32.mrf.mxu2 }
 0x3f6   : > { %v3681_v19 = vpop.f32.mrf.mxu3  ;;  %5852 = vmatmul.msk.bf16.gmra.mxu0 %vm452_vm1, %v7995_v30  ;;  %v3480_v6 = vadd.f32 %v3479_v37, %v7792_v26  ;;  %v3800_v37 = vld [vmem:[#allocation3 + $0x1ef] sm:$0xff] }
 0x3f8   : > { %v3748_v46 = vadd.f32 %v3681_v19, %v3480_v6 }
 0x3fa   : > { %5796 = vmatmul.msk.bf16.gmra.mxu2 %vm452_vm1, %v7971_v28  ;;  %v8006_v38 = vadd.f32 %v3915_v35, %v3748_v46  ;;  %v6043_v35 = vld [vmem:[%s8694_s6 + $0x70] sm:$0xff]  ;;  %v8022_v46 = vpack.c.bf16 %v3800_v37, %v3799_v14  ;;  %v4015_v14 = vld [vmem:[#allocation3 + $0xc8] sm:$0xff] }
 0x3fb   : > { %5824 = vmatmul.msk.bf16.gmra.mxu3 %vm452_vm1, %v8000_v41  ;;  %v3920_v15 = vpop.f32.mrf.mxu0  ;;  %v8008_v12 = vpop.f32.mrf.mxu1  ;;  %4828 = vmatpush.bf16.msra.mxu0 %v6043_v35 }
 0x3fc   : > { %8759 = vst [vmem:[#allocation8_spill] sm:$0xff] %v8022_v46 }
 0x3fd   : > { %v3482_v9 = vpop.f32.mrf.mxu2 }
 0x3fe   : > { %v3684_v26 = vpop.f32.mrf.mxu3  ;;  %v3483_v49 = vadd.f32 %v3482_v9, %v7806_v36  ;;  %5871 = vmatmul.msk.bf16.gmra.mxu1 %vm452_vm1, %v8010_v60  ;;  %v3566_v9 = vld [vmem:[#allocation3 + $0x1d1] sm:$0xff] }
 0x3ff   : > { %v8027_v41 = vpack.c.bf16 %v3566_v9, %v3565_v42  ;;  %v3802_v42 = vld [vmem:[#allocation3 + $0x20f] sm:$0xff]  ;;  %v6041_v9 = vld [vmem:[%s8694_s6 + $0x60] sm:$0xff] }
 0x400   : > { %v3749_v63 = vadd.f32 %v3684_v26, %v3483_v49  ;;  %4594 = vmatpush.bf16.msra.mxu3 %v6041_v9 }
 0x401   : > { %8760 = vst [vmem:[#allocation11_spill] sm:$0xff] %v8027_v41 }
 0x402   : > { %v8018_v19 = vadd.f32 %v3918_v40, %v3749_v63  ;;  %v4016_v40 = vld [vmem:[#allocation3 + $0xd0] sm:$0xff] }
 0x403   : > { %v3923_v24 = vpop.f32.mrf.mxu0  ;;  %v8020_v6 = vpop.f32.mrf.mxu1  ;;  %v8037_v28 = vpack.c.bf16 %v4016_v40, %v4015_v14  ;;  %v3801_v40 = vld [vmem:[#allocation3 + $0x207] sm:$0xff] }
 0x405   : > { %v3484_v51 = vpop.f32.mrf.mxu2 }
 0x406   : > { %v3686_v36 = vpop.f32.mrf.mxu3  ;;  %5853 = vmatmul.msk.bf16.gmra.mxu0 %vm452_vm1, %v8022_v46  ;;  %v3485_v26 = vadd.f32 %v3484_v51, %v7822_v10 }
 0x408   : > { %v3750_v49 = vadd.f32 %v3686_v36, %v3485_v26 }
 0x40a   : > { %5797 = vmatmul.msk.bf16.gmra.mxu2 %vm452_vm1, %v7995_v30  ;;  %v8033_v63 = vadd.f32 %v3920_v15, %v3750_v49  ;;  %v6039_v15 = vld [vmem:[%s8694_s6 + $0x50] sm:$0xff] }
 0x40b   : > { %5825 = vmatmul.msk.bf16.gmra.mxu3 %vm452_vm1, %v8027_v41  ;;  %v3925_v37 = vpop.f32.mrf.mxu0  ;;  %v8035_v35 = vpop.f32.mrf.mxu1  ;;  %4359 = vmatpush.bf16.msra.mxu2 %v6039_v15  ;;  %v3568_v41 = vld [vmem:[#allocation3 + $0x1f1] sm:$0xff] }
 0x40d   : > { %v3487_v58 = vpop.f32.mrf.mxu2 }
 0x40e   : > { %v3689_v10 = vpop.f32.mrf.mxu3  ;;  %v3488_v51 = vadd.f32 %v3487_v58, %v7849_v54  ;;  %5872 = vmatmul.msk.bf16.gmra.mxu1 %vm452_vm1, %v8037_v28  ;;  %v8052_v54 = vpack.c.bf16 %v3802_v42, %v3801_v40  ;;  %v4017_v40 = vld [vmem:[#allocation3 + $0xe8] sm:$0xff] }
 0x410   : > { %v3751_v36 = vadd.f32 %v3689_v10, %v3488_v51  ;;  %8761 = vst [vmem:[#allocation9_spill] sm:$0xff] %v8052_v54  ;;  %v3567_v51 = vld [vmem:[#allocation3 + $0x1e9] sm:$0xff] }
 0x412   : > { %v8048_v26 = vadd.f32 %v3923_v24, %v3751_v36  ;;  %v8057_v24 = vpack.c.bf16 %v3568_v41, %v3567_v51  ;;  %v4018_v36 = vld [vmem:[#allocation3 + $0xf0] sm:$0xff] }
 0x413   : > { %v3928_v49 = vpop.f32.mrf.mxu0  ;;  %v8050_v14 = vpop.f32.mrf.mxu1  ;;  %v8067_v17 = vpack.c.bf16 %v4018_v36, %v4017_v40 }
 0x414   : > { %8762 = vst [vmem:[#allocation19_spill] sm:$0xff] %v8057_v24 }
 0x415   : > { %v3489_v58 = vpop.f32.mrf.mxu2 }
 0x416   : > { %v3691_v10 = vpop.f32.mrf.mxu3  ;;  %5854 = vmatmul.msk.bf16.gmra.mxu0 %vm452_vm1, %v8052_v54  ;;  %v3490_v30 = vadd.f32 %v3489_v58, %v7866_v25 }
 0x418   : > { %v3752_v56 = vadd.f32 %v3691_v10, %v3490_v30 }
 0x41a   : > { %5798 = vmatmul.msk.bf16.gmra.mxu2 %vm452_vm1, %v8022_v46  ;;  %v8063_v42 = vadd.f32 %v3925_v37, %v3752_v56  ;;  %v4240_v46 = vld [vmem:[#allocation3 + $0x31] sm:$0xff] }
 0x41b   : > { %5826 = vmatmul.msk.bf16.gmra.mxu3 %vm452_vm1, %v8057_v24  ;;  %v3930_v15 = vpop.f32.mrf.mxu0  ;;  %v8065_v9 = vpop.f32.mrf.mxu1  ;;  %v4239_v24 = vld [vmem:[#allocation3 + $0x29] sm:$0xff] }
 0x41c   : > { %v4271_v40 = vpack.c.bf16 %v4240_v46, %v4239_v24 }
 0x41d   : > { %v3492_v54 = vpop.f32.mrf.mxu2 }
 0x41e   : > { %v3694_v25 = vpop.f32.mrf.mxu3  ;;  %v3493_v30 = vadd.f32 %v3492_v54, %v7887_v48  ;;  %5873 = vmatmul.msk.bf16.gmra.mxu1 %vm452_vm1, %v8067_v17  ;;  %v6045_v48 = vld [vmem:[%s8694_s6 + $0x80] sm:$0xff] }
 0x41f   : > { %v4474_v54 = vld [vmem:[#allocation3 + $0x47] sm:$0xff]  ;;  %5062 = vmatpush.bf16.msra.mxu1 %v6045_v48 }
 0x420   : > { %v3753_v41 = vadd.f32 %v3694_v25, %v3493_v30  ;;  %v4506_v25 = vpack.c.bf16 %v4475_v7, %v4474_v54  ;;  %v4020_v30 = vld [vmem:[#allocation3 + $0x110] sm:$0xff] }
 0x421   : > { %v4241_v54 = vld [vmem:[#allocation3 + $0x49] sm:$0xff] }
 0x422   : > { %v8072_v58 = vadd.f32 %v3928_v49, %v3753_v41 }
 0x423   : > { %v3933_v10 = vpop.f32.mrf.mxu0  ;;  %v8074_v51 = vpop.f32.mrf.mxu1 }
 0x424   : > { %8763 = vst [vmem:[#allocation20_spill] sm:$0xff] %v8072_v58 }
 0x425   : > { %v3494_v56 = vpop.f32.mrf.mxu2 }
 0x426   : > { %v3696_v37 = vpop.f32.mrf.mxu3  ;;  %5951 = vmatmul.msk.bf16.vlgmr.msra.gmra.mxu0 %vm452_vm1, %v7938_v50  ;;  %v3495_v36 = vadd.f32 %v3494_v56, %v7900_v0  ;;  %v4019_v0 = vld [vmem:[#allocation3 + $0x108] sm:$0xff] }
 0x427   : > { %v8088_v56 = vpack.c.bf16 %v4020_v30, %v4019_v0 }
 0x428   : > { %v3754_v49 = vadd.f32 %v3696_v37, %v3495_v36 }
 0x42a   : > { %5895 = vmatmul.msk.bf16.vlgmr.msra.gmra.mxu2 %vm452_vm1, %v4271_v40  ;;  %v8084_v41 = vadd.f32 %v3930_v15, %v3754_v49  ;;  %v4242_v49 = vld [vmem:[#allocation3 + $0x51] sm:$0xff] }
 0x42b   : > { %5923 = vmatmul.msk.bf16.vlgmr.msra.gmra.mxu3 %vm452_vm1, %v4506_v25  ;;  %v3935_v3 = vpop.f32.mrf.mxu0  ;;  %v8086_v50 = vpop.f32.mrf.mxu1  ;;  %v4477_v40 = vld [vmem:[#allocation3 + $0x6f] sm:$0xff]  ;;  %v8100_v30 = vpack.c.bf16 %v4242_v49, %v4241_v54 }
 0x42d   : > { %v3497_v58 = vpop.f32.mrf.mxu2 }
 0x42e   : > { %v3699_v32 = vpop.f32.mrf.mxu3  ;;  %v3498_v37 = vadd.f32 %v3497_v58, %v7915_v1  ;;  %5874 = vmatmul.msk.bf16.gmra.mxu1 %vm452_vm1, %v8088_v56  ;;  %v4476_v1 = vld [vmem:[#allocation3 + $0x67] sm:$0xff] }
 0x430   : > { %v3755_v7 = vadd.f32 %v3699_v32, %v3498_v37  ;;  %v4507_v32 = vpack.c.bf16 %v4477_v40, %v4476_v1 }
 0x432   : > { %v8093_v46 = vadd.f32 %v3933_v10, %v3755_v7  ;;  %v4022_v10 = vld [vmem:[#allocation3 + $0x130] sm:$0xff] }
 0x433   : > { %v3938_v24 = vpop.f32.mrf.mxu0  ;;  %v8095_v36 = vpop.f32.mrf.mxu1 }
 0x434   : > { %8764 = vst [vmem:[#allocation21_spill] sm:$0xff] %v8093_v46  ;;  %v4021_v46 = vld [vmem:[#allocation3 + $0x128] sm:$0xff] }
 0x435   : > { %v3499_v15 = vpop.f32.mrf.mxu2 }
 0x436   : > { %v3701_v48 = vpop.f32.mrf.mxu3  ;;  %5952 = vmatmul.msk.bf16.gmra.mxu0 %vm452_vm1, %v7962_v62  ;;  %v3500_v25 = vadd.f32 %v3499_v15, %v7921_v53  ;;  %v8110_v53 = vpack.c.bf16 %v4022_v10, %v4021_v46  ;;  %v4244_v46 = vld [vmem:[#allocation3 + $0x71] sm:$0xff] }
 0x437   : > { %v4479_v10 = vld [vmem:[#allocation3 + $0x8f] sm:$0xff] }
 0x438   : > { %v3756_v58 = vadd.f32 %v3701_v48, %v3500_v25 }
 0x43a   : > { %5896 = vmatmul.msk.bf16.gmra.mxu2 %vm452_vm1, %v8100_v30  ;;  %v8105_v0 = vadd.f32 %v3935_v3, %v3756_v58 }
 0x43b   : > { %5924 = vmatmul.msk.bf16.gmra.mxu3 %vm452_vm1, %v4507_v32  ;;  %v3940_v37 = vpop.f32.mrf.mxu0  ;;  %v4127_v7 = vpop.f32.mrf.mxu1  ;;  %v4243_v32 = vld [vmem:[#allocation3 + $0x69] sm:$0xff] }
 0x43c   : > { %v8108_v62 = vadd.f32 %v4127_v7, %v7898_v34  ;;  %v4478_v7 = vld [vmem:[#allocation3 + $0x87] sm:$0xff] }
 0x43d   : > { %v3502_v15 = vpop.f32.mrf.mxu2 }
 0x43e   : > { %v3704_v48 = vpop.f32.mrf.mxu3  ;;  %v3503_v54 = vadd.f32 %v3502_v15, %v7936_v47  ;;  %5875 = vmatmul.msk.bf16.gmra.mxu1 %vm452_vm1, %v8110_v53 }
 0x440   : > { %v3757_v49 = vadd.f32 %v3704_v48, %v3503_v54  ;;  %v8123_v48 = vpack.c.bf16 %v4244_v46, %v4243_v32  ;;  %v4024_v54 = vld [vmem:[#allocation3 + $0x150] sm:$0xff] }
 0x442   : > { %v8115_v40 = vadd.f32 %v3938_v24, %v3757_v49  ;;  %v4508_v24 = vpack.c.bf16 %v4479_v10, %v4478_v7 }
 0x443   : > { %v3943_v3 = vpop.f32.mrf.mxu0  ;;  %v4129_v25 = vpop.f32.mrf.mxu1 }
 0x444   : > { %8765 = vst [vmem:[#allocation22_spill] sm:$0xff] %v8115_v40  ;;  %v8118_v1 = vadd.f32 %v4129_v25, %v7913_v13  ;;  %v4023_v40 = vld [vmem:[#allocation3 + $0x148] sm:$0xff] }
 0x445   : > { %v3504_v58 = vpop.f32.mrf.mxu2 }
 0x446   : > { %v3706_v34 = vpop.f32.mrf.mxu3  ;;  %5953 = vmatmul.msk.bf16.gmra.mxu0 %vm452_vm1, %v7986_v5  ;;  %v3505_v47 = vadd.f32 %v3504_v58, %v7945_v43  ;;  %v8133_v43 = vpack.c.bf16 %v4024_v54, %v4023_v40 }
 0x448   : > { %v3758_v15 = vadd.f32 %v3706_v34, %v3505_v47 }
 0x44a   : > { %5897 = vmatmul.msk.bf16.gmra.mxu2 %vm452_vm1, %v8123_v48  ;;  %v8128_v13 = vadd.f32 %v3940_v37, %v3758_v15 }
 0x44b   : > { %5925 = vmatmul.msk.bf16.gmra.mxu3 %vm452_vm1, %v4508_v24  ;;  %v3945_v49 = vpop.f32.mrf.mxu0  ;;  %v4132_v25 = vpop.f32.mrf.mxu1  ;;  %v4481_v24 = vld [vmem:[#allocation3 + $0xaf] sm:$0xff] }
 0x44c   : > { %v8131_v5 = vadd.f32 %v4132_v25, %v7919_v11 }
 0x44d   : > { %v3507_v58 = vpop.f32.mrf.mxu2 }
 0x44e   : > { %v3709_v34 = vpop.f32.mrf.mxu3  ;;  %v3508_v32 = vadd.f32 %v3507_v58, %v7960_v20  ;;  %5876 = vmatmul.msk.bf16.gmra.mxu1 %vm452_vm1, %v8133_v43  ;;  %v4480_v20 = vld [vmem:[#allocation3 + $0xa7] sm:$0xff] }
 0x44f   : > { %v4509_v25 = vpack.c.bf16 %v4481_v24, %v4480_v20 }
 0x450   : > { %v3759_v46 = vadd.f32 %v3709_v34, %v3508_v32 }
 0x452   : > { %v8138_v10 = vadd.f32 %v3943_v3, %v3759_v46 }
 0x453   : > { %v3948_v37 = vpop.f32.mrf.mxu0  ;;  %v4134_v47 = vpop.f32.mrf.mxu1 }
 0x454   : > { %v8141_v7 = vadd.f32 %v4134_v47, %v7934_v23 }
 0x455   : > { %v3509_v15 = vpop.f32.mrf.mxu2 }
 0x456   : > { %v3711_v11 = vpop.f32.mrf.mxu3  ;;  %5954 = vmatmul.msk.bf16.gmra.mxu0 %vm452_vm1, %v8010_v60  ;;  %v3510_v40 = vadd.f32 %v3509_v15, %v7969_v31 }
 0x458   : > { %v3760_v54 = vadd.f32 %v3711_v11, %v3510_v40  ;;  %v4483_v40 = vld [vmem:[#allocation3 + $0xcf] sm:$0xff] }
 0x45a   : > { %5898 = vmatmul.msk.bf16.gmra.mxu2 %vm452_vm1, %v7750_v61  ;;  %v8149_v3 = vadd.f32 %v3945_v49, %v3760_v54 }
 0x45b   : > { %5926 = vmatmul.msk.bf16.gmra.mxu3 %vm452_vm1, %v4509_v25  ;;  %v3950_v23 = vpop.f32.mrf.mxu0  ;;  %v4137_v58 = vpop.f32.mrf.mxu1 }
 0x45c   : > { %v8152_v34 = vadd.f32 %v4137_v58, %v7943_v33 }
 0x45d   : > { %v3512_v32 = vpop.f32.mrf.mxu2 }
 0x45e   : > { %v3714_v46 = vpop.f32.mrf.mxu3  ;;  %v3513_v60 = vadd.f32 %v3512_v32, %v7984_v52  ;;  %5877 = vmatmul.msk.bf16.gmra.mxu1 %vm452_vm1, %v7760_v2  ;;  %v4482_v52 = vld [vmem:[#allocation3 + $0xc7] sm:$0xff] }
 0x45f   : > { %v4510_v54 = vpack.c.bf16 %v4483_v40, %v4482_v52 }
 0x460   : > { %v3761_v31 = vadd.f32 %v3714_v46, %v3513_v60 }
 0x462   : > { %v8157_v47 = vadd.f32 %v3948_v37, %v3761_v31 }
 0x463   : > { %v3953_v61 = vpop.f32.mrf.mxu0  ;;  %v4139_v15 = vpop.f32.mrf.mxu1 }
 0x464   : > { %v8160_v49 = vadd.f32 %v4139_v15, %v7958_v59 }
 0x465   : > { %v3514_v11 = vpop.f32.mrf.mxu2 }
 0x466   : > { %v3716_v24 = vpop.f32.mrf.mxu3  ;;  %5955 = vmatmul.msk.bf16.gmra.mxu0 %vm452_vm1, %v8037_v28  ;;  %v3515_v33 = vadd.f32 %v3514_v11, %v7993_v39  ;;  %v4485_v11 = vld [vmem:[#allocation3 + $0xef] sm:$0xff] }
 0x468   : > { %v3762_v20 = vadd.f32 %v3716_v24, %v3515_v33 }
 0x46a   : > { %5899 = vmatmul.msk.bf16.gmra.mxu2 %vm452_vm1, %v7775_v44  ;;  %v8168_v2 = vadd.f32 %v3950_v23, %v3762_v20 }
 0x46b   : > { %5927 = vmatmul.msk.bf16.gmra.mxu3 %vm452_vm1, %v4510_v54  ;;  %v3955_v59 = vpop.f32.mrf.mxu0  ;;  %v4142_v37 = vpop.f32.mrf.mxu1 }
 0x46c   : > { %v8171_v25 = vadd.f32 %v4142_v37, %v7967_v55 }
 0x46d   : > { %v3517_v58 = vpop.f32.mrf.mxu2 }
 0x46e   : > { %v3719_v32 = vpop.f32.mrf.mxu3  ;;  %v3518_v28 = vadd.f32 %v3517_v58, %v8008_v12  ;;  %5878 = vmatmul.msk.bf16.gmra.mxu1 %vm452_vm1, %v7785_v29  ;;  %v4484_v12 = vld [vmem:[#allocation3 + $0xe7] sm:$0xff] }
 0x46f   : > { %v4511_v40 = vpack.c.bf16 %v4485_v11, %v4484_v12 }
 0x470   : > { %v3763_v39 = vadd.f32 %v3719_v32, %v3518_v28  ;;  %v4487_v28 = vld [vmem:[#allocation3 + $0x10f] sm:$0xff] }
 0x472   : > { %v8176_v46 = vadd.f32 %v3953_v61, %v3763_v39 }
 0x473   : > { %v3958_v44 = vpop.f32.mrf.mxu0  ;;  %v4144_v60 = vpop.f32.mrf.mxu1 }
 0x474   : > { %v8179_v23 = vadd.f32 %v4144_v60, %v7982_v45 }
 0x475   : > { %v3519_v31 = vpop.f32.mrf.mxu2 }
 0x476   : > { %v3721_v15 = vpop.f32.mrf.mxu3  ;;  %5956 = vmatmul.msk.bf16.gmra.mxu0 %vm452_vm1, %v8067_v17  ;;  %v3520_v55 = vadd.f32 %v3519_v31, %v8020_v6 }
 0x478   : > { %v3764_v24 = vadd.f32 %v3721_v15, %v3520_v55 }
 0x47a   : > { %5900 = vmatmul.msk.bf16.gmra.mxu2 %vm452_vm1, %v7800_v21  ;;  %v8187_v29 = vadd.f32 %v3955_v59, %v3764_v24 }
 0x47b   : > { %5928 = vmatmul.msk.bf16.gmra.mxu3 %vm452_vm1, %v4511_v40  ;;  %v3960_v45 = vpop.f32.mrf.mxu0  ;;  %v4147_v61 = vpop.f32.mrf.mxu1 }
 0x47c   : > { %v8190_v33 = vadd.f32 %v4147_v61, %v7991_v27  ;;  %v4489_v61 = vld [vmem:[#allocation3 + $0x12f] sm:$0xff] }
 0x47d   : > { %v3522_v52 = vpop.f32.mrf.mxu2 }
 0x47e   : > { %v3724_v20 = vpop.f32.mrf.mxu3  ;;  %v3523_v17 = vadd.f32 %v3522_v52, %v8035_v35  ;;  %5879 = vmatmul.msk.bf16.gmra.mxu1 %vm452_vm1, %v7810_v57  ;;  %v4486_v35 = vld [vmem:[#allocation3 + $0x107] sm:$0xff] }
 0x47f   : > { %v4512_v60 = vpack.c.bf16 %v4487_v28, %v4486_v35 }
 0x480   : > { %v3765_v6 = vadd.f32 %v3724_v20, %v3523_v17 }
 0x482   : > { %v8195_v54 = vadd.f32 %v3958_v44, %v3765_v6 }
 0x483   : > { %v3963_v21 = vpop.f32.mrf.mxu0  ;;  %v4149_v37 = vpop.f32.mrf.mxu1 }
 0x484   : > { %v8198_v59 = vadd.f32 %v4149_v37, %v8006_v38 }
 0x485   : > { %v3524_v58 = vpop.f32.mrf.mxu2 }
 0x486   : > { %v3726_v32 = vpop.f32.mrf.mxu3  ;;  %5957 = vmatmul.msk.bf16.gmra.mxu0 %vm452_vm1, %v8088_v56  ;;  %v3525_v27 = vadd.f32 %v3524_v58, %v8050_v14 }
 0x488   : > { %v3766_v39 = vadd.f32 %v3726_v32, %v3525_v27 }
 0x48a   : > { %5901 = vmatmul.msk.bf16.gmra.mxu2 %vm452_vm1, %v7838_v18  ;;  %v8206_v57 = vadd.f32 %v3960_v45, %v3766_v39 }
 0x48b   : > { %5929 = vmatmul.msk.bf16.gmra.mxu3 %vm452_vm1, %v4512_v60  ;;  %v3965_v38 = vpop.f32.mrf.mxu0  ;;  %v4152_v44 = vpop.f32.mrf.mxu1 }
 0x48c   : > { %v8209_v31 = vadd.f32 %v4152_v44, %v8018_v19 }
 0x48d   : > { %v3527_v15 = vpop.f32.mrf.mxu2 }
 0x48e   : > { %v3729_v11 = vpop.f32.mrf.mxu3  ;;  %v3528_v56 = vadd.f32 %v3527_v15, %v8065_v9  ;;  %5880 = vmatmul.msk.bf16.gmra.mxu1 %vm452_vm1, %v7859_v16  ;;  %v4488_v9 = vld [vmem:[#allocation3 + $0x127] sm:$0xff] }
 0x48f   : > { %v4513_v20 = vpack.c.bf16 %v4489_v61, %v4488_v9  ;;  %v8767_v15 = vld [vmem:[#allocation20_spill] sm:$0xff] }
 0x490   : > { %v3767_v14 = vadd.f32 %v3729_v11, %v3528_v56 }
 0x492   : > { %v8214_v55 = vadd.f32 %v3963_v21, %v3767_v14 }
 0x493   : > { %v3968_v18 = vpop.f32.mrf.mxu0  ;;  %v4154_v12 = vpop.f32.mrf.mxu1 }
 0x494   : > { %v8217_v24 = vadd.f32 %v4154_v12, %v8033_v63 }
 0x495   : > { %v3529_v40 = vpop.f32.mrf.mxu2 }
 0x496   : > { %v3731_v45 = vpop.f32.mrf.mxu3  ;;  %5958 = vmatmul.msk.bf16.gmra.mxu0 %vm452_vm1, %v8110_v53  ;;  %v3530_v19 = vadd.f32 %v3529_v40, %v8074_v51  ;;  %v4726_v40 = vld [vmem:[#allocation3 + $0x168] sm:$0xff] }
 0x498   : > { %v3768_v52 = vadd.f32 %v3731_v45, %v3530_v19 }
 0x49a   : > { %5902 = vmatmul.msk.bf16.gmra.mxu2 %vm452_vm1, %v7880_v22  ;;  %v8225_v16 = vadd.f32 %v3965_v38, %v3768_v52 }
 0x49b   : > { %5930 = vmatmul.msk.bf16.gmra.mxu3 %vm452_vm1, %v4513_v20  ;;  %v3970_v63 = vpop.f32.mrf.mxu0  ;;  %v4157_v17 = vpop.f32.mrf.mxu1 }
 0x49c   : > { %v8228_v6 = vadd.f32 %v4157_v17, %v8048_v26  ;;  %v8768_v17 = vld [vmem:[#allocation12_spill] sm:$0xff] }
 0x49d   : > { %v3532_v21 = vpop.f32.mrf.mxu2 }
 0x49e   : > { %v3734_v37 = vpop.f32.mrf.mxu3  ;;  %v3533_v53 = vadd.f32 %v3532_v21, %v8086_v50  ;;  %5881 = vmatmul.msk.bf16.gmra.mxu1 %vm452_vm1, %v7891_v8  ;;  %v4036_v50 = vld [vmem:[#allocation3 + $0x210] sm:$0xff]  ;;  %v8769_v21 = vld [vmem:[#allocation10_spill] sm:$0xff] }
 0x49f   : > { %v8766_v8 = vld [vmem:[#allocation13_spill] sm:$0xff] }
 0x4a0   : > { %v3769_v51 = vadd.f32 %v3734_v37, %v3533_v53 }
 0x4a2   : > { %v8233_v58 = vadd.f32 %v3968_v18, %v3769_v51  ;;  %v4727_v18 = vld [vmem:[#allocation3 + $0x170] sm:$0xff] }
 0x4a3   : > { %v4830_v22 = vpop.f32.mrf.mxu0  ;;  %v4159_v32 = vpop.f32.mrf.mxu1  ;;  %v4749_v61 = vpack.c.bf16 %v4727_v18, %v4726_v40  ;;  %v8770_v51 = vld [vmem:[#allocation21_spill] sm:$0xff]  ;;  %v8773_v40 = vld [vmem:[#allocation22_spill] sm:$0xff] }
 0x4a4   : > { %v8236_v28 = vadd.f32 %v4159_v32, %v8063_v42  ;;  %v4035_v42 = vld [vmem:[#allocation3 + $0x208] sm:$0xff] }
 0x4a5   : > { %v3534_v27 = vpop.f32.mrf.mxu2  ;;  %v8250_v56 = vpack.c.bf16 %v4036_v50, %v4035_v42  ;;  %v4728_v50 = vld [vmem:[#allocation3 + $0x188] sm:$0xff] }
 0x4a6   : > { %v3736_v35 = vpop.f32.mrf.mxu3  ;;  %5959 = vmatmul.msk.bf16.gmra.mxu0 %vm452_vm1, %v8133_v43  ;;  %v3535_v26 = vadd.f32 %v3534_v27, %v8095_v36 }
 0x4a8   : > { %v3770_v39 = vadd.f32 %v3736_v35, %v3535_v26  ;;  %v4729_v26 = vld [vmem:[#allocation3 + $0x190] sm:$0xff] }
 0x4aa   : > { %5903 = vmatmul.msk.bf16.gmra.mxu2 %vm452_vm1, %v7908_v4  ;;  %v8245_v60 = vadd.f32 %v3970_v63, %v3770_v39 }
 0x4ab   : > { %5931 = vmatmul.msk.bf16.gmra.mxu3 %vm452_vm1, %v8766_v8  ;;  %v4162_v38 = vpop.f32.mrf.mxu1  ;;  %v4832_v44 = vpop.f32.mrf.mxu0 }
 0x4ac   : > { %v8248_v11 = vadd.f32 %v4162_v38, %v8767_v15  ;;  %v4750_v38 = vpack.c.bf16 %v4729_v26, %v4728_v50 }
 0x4ad   : > { %v4361_v43 = vpop.f32.mrf.mxu2 }
 0x4ae   : > { %v4596_v36 = vpop.f32.mrf.mxu3  ;;  %v4441_v14 = vadd.f32 %v4361_v43, %v8108_v62  ;;  %5882 = vmatmul.msk.bf16.gmra.mxu1 %vm452_vm1, %v8250_v56 }
 0x4b0   : > { %v4676_v4 = vadd.f32 %v4596_v36, %v4441_v14  ;;  %v8772_v14 = vld [vmem:[#allocation14_spill] sm:$0xff] }
 0x4b2   : > { %v8255_v12 = vadd.f32 %v4830_v22, %v4676_v4 }
 0x4b3   : > { %v4164_v45 = vpop.f32.mrf.mxu1  ;;  %v4835_v20 = vpop.f32.mrf.mxu0 }
 0x4b4   : > { %v8258_v19 = vadd.f32 %v4164_v45, %v8084_v41 }
 0x4b5   : > { %v4363_v9 = vpop.f32.mrf.mxu2 }
 0x4b6   : > { %v4598_v52 = vpop.f32.mrf.mxu3  ;;  %5960 = vmatmul.msk.bf16.gmra.mxu0 %vm452_vm1, %v4749_v61  ;;  %v4442_v62 = vadd.f32 %v4363_v9, %v8118_v1 }
 0x4b8   : > { %v4677_v63 = vadd.f32 %v4598_v52, %v4442_v62  ;;  %v4731_v52 = vld [vmem:[#allocation3 + $0x1b0] sm:$0xff]  ;;  %v4730_v62 = vld [vmem:[#allocation3 + $0x1a8] sm:$0xff] }
 0x4ba   : > { %5904 = vmatmul.msk.bf16.gmra.mxu2 %vm452_vm1, %v8768_v17  ;;  %v8266_v37 = vadd.f32 %v4832_v44, %v4677_v63 }
 0x4bb   : > { %5932 = vmatmul.msk.bf16.gmra.mxu3 %vm452_vm1, %v8769_v21  ;;  %v4167_v53 = vpop.f32.mrf.mxu1  ;;  %v4837_v1 = vpop.f32.mrf.mxu0  ;;  %v4751_v21 = vpack.c.bf16 %v4731_v52, %v4730_v62  ;;  %v4949_v52 = vld [vmem:[#allocation3 + $0xb1] sm:$0xff]  ;;  %v8776_v62 = vld [vmem:[#allocation7_spill] sm:$0xff] }
 0x4bc   : > { %v8269_v41 = vadd.f32 %v4167_v53, %v8770_v51 }
 0x4bd   : > { %v4366_v22 = vpop.f32.mrf.mxu2 }
 0x4be   : > { %v4601_v32 = vpop.f32.mrf.mxu3  ;;  %v4443_v27 = vadd.f32 %v4366_v22, %v8131_v5  ;;  %5979 = vmatmul.msk.bf16.vlgmr.msra.gmra.mxu1 %vm452_vm1, %v8100_v30  ;;  %v8771_v30 = vld [vmem:[#allocation15_spill] sm:$0xff] }
 0x4c0   : > { %v4678_v35 = vadd.f32 %v4601_v32, %v4443_v27  ;;  %v4946_v27 = vld [vmem:[#allocation3 + $0x89] sm:$0xff] }
 0x4c2   : > { %v8274_v39 = vadd.f32 %v4835_v20, %v4678_v35  ;;  %v8775_v35 = vld [vmem:[#allocation16_spill] sm:$0xff] }
 0x4c3   : > { %v4169_v8 = vpop.f32.mrf.mxu1  ;;  %v4840_v36 = vpop.f32.mrf.mxu0 }
 0x4c4   : > { %v8277_v42 = vadd.f32 %v4169_v8, %v8105_v0 }
 0x4c5   : > { %v4368_v44 = vpop.f32.mrf.mxu2 }
 0x4c6   : > { %v4603_v15 = vpop.f32.mrf.mxu3  ;;  %5961 = vmatmul.msk.bf16.gmra.mxu0 %vm452_vm1, %v4750_v38  ;;  %v4444_v5 = vadd.f32 %v4368_v44, %v8141_v7 }
 0x4c8   : > { %v4679_v43 = vadd.f32 %v4603_v15, %v4444_v5 }
 0x4ca   : > { %5905 = vmatmul.msk.bf16.gmra.mxu2 %vm452_vm1, %v8771_v30  ;;  %v8285_v4 = vadd.f32 %v4837_v1, %v4679_v43  ;;  %v8774_v1 = vld [vmem:[#allocation18_spill] sm:$0xff]  ;;  %v4733_v43 = vld [vmem:[#allocation3 + $0x1d0] sm:$0xff]  ;;  %v4732_v30 = vld [vmem:[#allocation3 + $0x1c8] sm:$0xff] }
 0x4cb   : > { %5933 = vmatmul.msk.bf16.gmra.mxu3 %vm452_vm1, %v8772_v14  ;;  %v4172_v18 = vpop.f32.mrf.mxu1  ;;  %v4842_v17 = vpop.f32.mrf.mxu0 }
 0x4cc   : > { %v8288_v0 = vadd.f32 %v4172_v18, %v8773_v40  ;;  %v4752_v18 = vpack.c.bf16 %v4733_v43, %v4732_v30  ;;  %v8781_v43 = vld [vmem:[#allocation9_spill] sm:$0xff] }
 0x4cd   : > { %v4371_v45 = vpop.f32.mrf.mxu2 }
 0x4ce   : > { %v4606_v61 = vpop.f32.mrf.mxu3  ;;  %v4445_v9 = vadd.f32 %v4371_v45, %v8152_v34  ;;  %5980 = vmatmul.msk.bf16.gmra.mxu1 %vm452_vm1, %v8123_v48  ;;  %v4947_v48 = vld [vmem:[#allocation3 + $0x91] sm:$0xff] }
 0x4cf   : > { %v4976_v8 = vpack.c.bf16 %v4947_v48, %v4946_v27  ;;  %v4950_v48 = vld [vmem:[#allocation3 + $0xc9] sm:$0xff] }
 0x4d0   : > { %v4680_v7 = vadd.f32 %v4606_v61, %v4445_v9 }
 0x4d2   : > { %v8293_v20 = vadd.f32 %v4840_v36, %v4680_v7  ;;  %v4948_v7 = vld [vmem:[#allocation3 + $0xa9] sm:$0xff] }
 0x4d3   : > { %v4174_v63 = vpop.f32.mrf.mxu1  ;;  %v4845_v15 = vpop.f32.mrf.mxu0 }
 0x4d4   : > { %v8296_v53 = vadd.f32 %v4174_v63, %v8128_v13  ;;  %v8777_v63 = vld [vmem:[#allocation17_spill] sm:$0xff] }
 0x4d5   : > { %v4373_v51 = vpop.f32.mrf.mxu2 }
 0x4d6   : > { %v4608_v22 = vpop.f32.mrf.mxu3  ;;  %5962 = vmatmul.msk.bf16.gmra.mxu0 %vm452_vm1, %v4751_v21  ;;  %v4446_v34 = vadd.f32 %v4373_v51, %v8160_v49  ;;  %v4977_v51 = vpack.c.bf16 %v4949_v52, %v4948_v7  ;;  %v4270_v7 = vld [vmem:[#allocation3 + $0x211] sm:$0xff] }
 0x4d8   : > { %v4681_v32 = vadd.f32 %v4608_v22, %v4446_v34  ;;  %v4734_v22 = vld [vmem:[#allocation3 + $0x1e8] sm:$0xff] }
 0x4da   : > { %5906 = vmatmul.msk.bf16.gmra.mxu2 %vm452_vm1, %v8774_v1  ;;  %v8304_v26 = vadd.f32 %v4842_v17, %v4681_v32  ;;  %v4951_v1 = vld [vmem:[#allocation3 + $0xd1] sm:$0xff] }
 0x4db   : > { %5934 = vmatmul.msk.bf16.gmra.mxu3 %vm452_vm1, %v8775_v35  ;;  %v4177_v50 = vpop.f32.mrf.mxu1  ;;  %v4847_v9 = vpop.f32.mrf.mxu0  ;;  %v8778_v35 = vld [vmem:[#allocation11_spill] sm:$0xff] }
 0x4dc   : > { %v8307_v13 = vadd.f32 %v4177_v50, %v8138_v10  ;;  %v8779_v50 = vld [vmem:[#allocation8_spill] sm:$0xff] }
 0x4dd   : > { %v4376_v38 = vpop.f32.mrf.mxu2 }
 0x4de   : > { %v4611_v44 = vpop.f32.mrf.mxu3  ;;  %v4447_v49 = vadd.f32 %v4376_v38, %v8171_v25  ;;  %5981 = vmatmul.msk.bf16.gmra.mxu1 %vm452_vm1, %v4976_v8  ;;  %v4978_v38 = vpack.c.bf16 %v4951_v1, %v4950_v48 }
 0x4e0   : > { %v4682_v5 = vadd.f32 %v4611_v44, %v4447_v49  ;;  %v4952_v49 = vld [vmem:[#allocation3 + $0xe9] sm:$0xff] }
 0x4e2   : > { %v8311_v36 = vadd.f32 %v4845_v15, %v4682_v5  ;;  %v4953_v15 = vld [vmem:[#allocation3 + $0xf1] sm:$0xff]  ;;  %v8780_v5 = vld [vmem:[#allocation19_spill] sm:$0xff] }
 0x4e3   : > { %v4179_v14 = vpop.f32.mrf.mxu1 }
 0x4e4   : > { %v8314_v40 = vadd.f32 %v4179_v14, %v8149_v3  ;;  %v4979_v14 = vpack.c.bf16 %v4953_v15, %v4952_v49 }
 0x4e5   : > { %v4378_v10 = vpop.f32.mrf.mxu2 }
 0x4e6   : > { %5963 = vmatmul.msk.bf16.gmra.mxu0 %vm452_vm1, %v4752_v18  ;;  %v4448_v45 = vadd.f32 %v4378_v10, %v8179_v23  ;;  %v4613_v61 = vpop.f32.mrf.mxu3  ;;  %v4735_v23 = vld [vmem:[#allocation3 + $0x1f0] sm:$0xff] }
 0x4e7   : > { %v4753_v32 = vpack.c.bf16 %v4735_v23, %v4734_v22  ;;  %v4739_v18 = vld [vmem:[#allocation3 + $0x230] sm:$0xff] }
 0x4e8   : > { %v4683_v25 = vadd.f32 %v4613_v61, %v4448_v45  ;;  %v4505_v61 = vld [vmem:[#allocation3 + $0x22f] sm:$0xff] }
 0x4ea   : > { %5907 = vmatmul.msk.bf16.gmra.mxu2 %vm452_vm1, %v8776_v62  ;;  %v8322_v17 = vadd.f32 %v4847_v9, %v4683_v25  ;;  %v4269_v9 = vld [vmem:[#allocation3 + $0x209] sm:$0xff] }
 0x4eb   : > { %5935 = vmatmul.msk.bf16.gmra.mxu3 %vm452_vm1, %v8777_v63  ;;  %v4182_v3 = vpop.f32.mrf.mxu1  ;;  %v8357_v62 = vpack.c.bf16 %v4270_v7, %v4269_v9  ;;  %v4955_v63 = vld [vmem:[#allocation3 + $0x111] sm:$0xff]  ;;  %v8409_v7 = vpop.f32.mrf.mxu0 }
 0x4ec   : > { %v8325_v21 = vadd.f32 %v4182_v3, %v8157_v47  ;;  %v4961_v9 = vld [vmem:[#allocation3 + $0x171] sm:$0xff] }
 0x4ee   : > { %5982 = vmatmul.msk.bf16.gmra.mxu1 %vm452_vm1, %v4977_v51 }
 0x4f3   : > { %v4184_v34 = vpop.f32.mrf.mxu1 }
 0x4f4   : > { %v8329_v27 = vadd.f32 %v4184_v34, %v8168_v2  ;;  %v4956_v34 = vld [vmem:[#allocation3 + $0x129] sm:$0xff] }
 0x4f6   : > { %5964 = vmatmul.msk.bf16.gmra.mxu0 %vm452_vm1, %v4753_v32  ;;  %v4957_v32 = vld [vmem:[#allocation3 + $0x131] sm:$0xff] }
 0x4fa   : > { %5908 = vmatmul.msk.bf16.gmra.mxu2 %vm452_vm1, %v8778_v35  ;;  %v4981_v35 = vpack.c.bf16 %v4957_v32, %v4956_v34 }
 0x4fb   : > { %5936 = vmatmul.msk.bf16.gmra.mxu3 %vm452_vm1, %v8779_v50  ;;  %v4187_v47 = vpop.f32.mrf.mxu1 }
 0x4fc   : > { %v8337_v8 = vadd.f32 %v4187_v47, %v8176_v46  ;;  %v4958_v47 = vld [vmem:[#allocation3 + $0x149] sm:$0xff] }
 0x4fe   : > { %5983 = vmatmul.msk.bf16.gmra.mxu1 %vm452_vm1, %v4978_v38  ;;  %v4959_v38 = vld [vmem:[#allocation3 + $0x151] sm:$0xff] }
 0x4ff   : > { %v4982_v15 = vpack.c.bf16 %v4959_v38, %v4958_v47 }
 0x503   : > { %v4189_v44 = vpop.f32.mrf.mxu1 }
 0x504   : > { %v8341_v2 = vadd.f32 %v4189_v44, %v8187_v29  ;;  %v4738_v29 = vld [vmem:[#allocation3 + $0x228] sm:$0xff] }
 0x505   : > { %v4755_v10 = vpack.c.bf16 %v4739_v18, %v4738_v29 }
 0x506   : > { %5965 = vmatmul.msk.bf16.gmra.mxu0 %vm452_vm1, %v8250_v56  ;;  %v4504_v56 = vld [vmem:[#allocation3 + $0x227] sm:$0xff] }
 0x507   : > { %v4521_v52 = vpack.c.bf16 %v4505_v61, %v4504_v56  ;;  %v4960_v61 = vld [vmem:[#allocation3 + $0x169] sm:$0xff] }
 0x50a   : > { %5909 = vmatmul.msk.bf16.gmra.mxu2 %vm452_vm1, %v8780_v5  ;;  %v8387_v5 = vld [vmem:[%s8696_s8] ss:$0 sm:$0xff] }
 0x50b   : > { %5937 = vmatmul.msk.bf16.gmra.mxu3 %vm452_vm1, %v8781_v43  ;;  %v4192_v46 = vpop.f32.mrf.mxu1  ;;  %v8395_v43 = vld [vmem:[%s8697_s9] ss:$0 sm:$0xff] }
 0x50c   : > { %v8350_v30 = vadd.f32 %v4192_v46, %v8195_v54  ;;  %v4954_v54 = vld [vmem:[#allocation3 + $0x109] sm:$0xff] }
 0x50e   : > { %5984 = vmatmul.msk.bf16.gmra.mxu1 %vm452_vm1, %v4979_v14 }
 0x513   : > { %v4194_v45 = vpop.f32.mrf.mxu1 }
 0x514   : > { %v8354_v25 = vadd.f32 %v4194_v45, %v8206_v57  ;;  %v4980_v57 = vpack.c.bf16 %v4955_v63, %v4954_v54  ;;  %v8407_v45 = vpop.f32.mrf.mxu3 }
 0x516   : > { %5966 = vmatmul.msk.bf16.gmra.mxu0 %vm452_vm1, %v4755_v10 }
 0x51a   : > { %5910 = vmatmul.msk.bf16.gmra.mxu2 %vm452_vm1, %v8357_v62 }
 0x51b   : > { %5938 = vmatmul.msk.bf16.gmra.mxu3 %vm452_vm1, %v4521_v52  ;;  %v4197_v3 = vpop.f32.mrf.mxu1 }
 0x51c   : > { %v8363_v51 = vadd.f32 %v4197_v3, %v8214_v55  ;;  %v8420_v32 = vpop.f32.mrf.mxu3 }
 0x51e   : > { %5985 = vmatmul.msk.bf16.gmra.mxu1 %vm452_vm1, %v4980_v57  ;;  %v4983_v57 = vpack.c.bf16 %v4961_v9, %v4960_v61 }
 0x523   : > { %v4199_v23 = vpop.f32.mrf.mxu1 }
 0x524   : > { %v8367_v22 = vadd.f32 %v4199_v23, %v8225_v16  ;;  %v8379_v16 = vld [vmem:[%s8695_s7] ss:$0 sm:$0xff] }
 0x52b   : > { %v4202_v48 = vpop.f32.mrf.mxu1 }
 0x52c   : > { %v8370_v1 = vadd.f32 %v4202_v48, %v8233_v58 }
 0x52e   : > { %5986 = vmatmul.msk.bf16.gmra.mxu1 %vm452_vm1, %v4981_v35 }
 0x533   : > { %v4204_v55 = vpop.f32.mrf.mxu1 }
 0x534   : > { %v8374_v50 = vadd.f32 %v4204_v55, %v8245_v60  ;;  %v8423_v55 = vpop.f32.mrf.mxu0 }
 0x53b   : > { %v5064_v44 = vpop.f32.mrf.mxu1 }
 0x53c   : > { %v5144_v49 = vadd.f32 %v5064_v44, %v8255_v12  ;;  %v8397_v12 = vpop.f32.mrf.mxu2 }
 0x53e   : > { %v5180_v58 = vadd.f32 %v8379_v16, %v5144_v49  ;;  %5987 = vmatmul.msk.bf16.gmra.mxu1 %vm452_vm1, %v4982_v15  ;;  %v4962_v15 = vld [vmem:[#allocation3 + $0x189] sm:$0xff] }
 0x540   : > { %v5212_v60 = vmax.f32 %v5180_v58, 0.0  ;;  %v4963_v58 = vld [vmem:[#allocation3 + $0x191] sm:$0xff] }
 0x542   : > { %v5248_v46 = vmul.f32 %v8387_v5, %v5212_v60 }
 0x543   : > { %v5066_v14 = vpop.f32.mrf.mxu1 }
 0x544   : > { %v5284_v29 = vadd.f32 %v8395_v43, %v5248_v46  ;;  %v5145_v18 = vadd.f32 %v5066_v14, %v8266_v37  ;;  %v8412_v54 = vpop.f32.mrf.mxu2  ;;  %v8433_v46 = vpop.f32.mrf.mxu3 }
 0x546   : > { %5316 = vst.msk [vmem:[%s8402_s26] sm:$0xff] %vm452_vm1, %v5284_v29  ;;  %v5181_v10 = vadd.f32 %v8379_v16, %v5145_v18 }
 0x548   : > { %v5213_v56 = vmax.f32 %v5181_v10, 0.0  ;;  %v8437_v10 = vpop.f32.mrf.mxu0 }
 0x54a   : > { %v5249_v52 = vmul.f32 %v8387_v5, %v5213_v56 }
 0x54b   : > { %v5069_v37 = vpop.f32.mrf.mxu1 }
 0x54c   : > { %v5285_v63 = vadd.f32 %v8395_v43, %v5249_v52  ;;  %v5146_v3 = vadd.f32 %v5069_v37, %v8274_v39  ;;  %v8427_v38 = vpop.f32.mrf.mxu2 }
 0x54e   : > { %5317 = vst.msk [vmem:[%s8402_s26 + $0x8] sm:$0xff] %vm452_vm1, %v5285_v63  ;;  %v5182_v23 = vadd.f32 %v8379_v16, %v5146_v3  ;;  %5988 = vmatmul.msk.bf16.gmra.mxu1 %vm452_vm1, %v4983_v57  ;;  %v8448_v3 = vpop.f32.mrf.mxu3 }
 0x550   : > { %v5214_v34 = vmax.f32 %v5182_v23, 0.0  ;;  %v8453_v23 = vpop.f32.mrf.mxu0 }
 0x552   : > { %v5250_v48 = vmul.f32 %v8387_v5, %v5214_v34 }
 0x553   : > { %v5071_v35 = vpop.f32.mrf.mxu1 }
 0x554   : > { %v5286_v47 = vadd.f32 %v8395_v43, %v5250_v48  ;;  %v5147_v39 = vadd.f32 %v5071_v35, %v8285_v4  ;;  %v4984_v4 = vpack.c.bf16 %v4963_v58, %v4962_v15  ;;  %v8443_v61 = vpop.f32.mrf.mxu2  ;;  %v4964_v35 = vld [vmem:[#allocation3 + $0x1a9] sm:$0xff] }
 0x556   : > { %5318 = vst.msk [vmem:[%s8402_s26 + $0x10] sm:$0xff] %vm452_vm1, %v5286_v47  ;;  %v5183_v44 = vadd.f32 %v8379_v16, %v5147_v39  ;;  %v4965_v47 = vld [vmem:[#allocation3 + $0x1b1] sm:$0xff] }
 0x557   : > { %v4985_v15 = vpack.c.bf16 %v4965_v47, %v4964_v35 }
 0x558   : > { %v5215_v49 = vmax.f32 %v5183_v44, 0.0 }
 0x55a   : > { %v5251_v60 = vmul.f32 %v8387_v5, %v5215_v49 }
 0x55b   : > { %v5074_v14 = vpop.f32.mrf.mxu1 }
 0x55c   : > { %v5287_v29 = vadd.f32 %v8395_v43, %v5251_v60  ;;  %v5148_v18 = vadd.f32 %v5074_v14, %v8293_v20  ;;  %v8455_v48 = vpop.f32.mrf.mxu2  ;;  %v8464_v60 = vpop.f32.mrf.mxu3 }
 0x55e   : > { %5319 = vst.msk [vmem:[%s8402_s26 + $0x18] sm:$0xff] %vm452_vm1, %v5287_v29  ;;  %v5184_v56 = vadd.f32 %v8379_v16, %v5148_v18  ;;  %5989 = vmatmul.msk.bf16.gmra.mxu1 %vm452_vm1, %v4984_v4  ;;  %v4449_v29 = vadd.f32 %v8397_v12, %v8190_v33  ;;  %v8468_v18 = vpop.f32.mrf.mxu0  ;;  %v4966_v12 = vld [vmem:[#allocation3 + $0x1c9] sm:$0xff] }
 0x560   : > { %v5216_v9 = vmax.f32 %v5184_v56, 0.0 }
 0x562   : > { %v5252_v52 = vmul.f32 %v8387_v5, %v5216_v9 }
 0x563   : > { %v5076_v37 = vpop.f32.mrf.mxu1 }
 0x564   : > { %v5288_v63 = vadd.f32 %v8395_v43, %v5252_v52  ;;  %v5149_v20 = vadd.f32 %v5076_v37, %v8304_v26  ;;  %v8471_v56 = vpop.f32.mrf.mxu2  ;;  %v4684_v37 = vadd.f32 %v8407_v45, %v4449_v29  ;;  %v8479_v33 = vpop.f32.mrf.mxu3 }
 0x566   : > { %5320 = vst.msk [vmem:[%s8402_s26 + $0x20] sm:$0xff] %vm452_vm1, %v5288_v63  ;;  %v5185_v57 = vadd.f32 %v8379_v16, %v5149_v20  ;;  %v4918_v47 = vadd.f32 %v8409_v7, %v4684_v37  ;;  %v4451_v7 = vadd.f32 %v8427_v38, %v8209_v31  ;;  %v4968_v38 = vld [vmem:[#allocation3 + $0x1e9] sm:$0xff] }
 0x568   : > { %v5217_v34 = vmax.f32 %v5185_v57, 0.0  ;;  %v4967_v57 = vld [vmem:[#allocation3 + $0x1d1] sm:$0xff] }
 0x56a   : > { %v5253_v39 = vmul.f32 %v8387_v5, %v5217_v34  ;;  %v4450_v34 = vadd.f32 %v8412_v54, %v8198_v59 }
 0x56b   : > { %v5079_v44 = vpop.f32.mrf.mxu1 }
 0x56c   : > { %v5289_v49 = vadd.f32 %v8395_v43, %v5253_v39  ;;  %v5150_v26 = vadd.f32 %v5079_v44, %v8311_v36  ;;  %v8485_v39 = vpop.f32.mrf.mxu0  ;;  %v4631_v29 = vpop.f32.mrf.mxu3 }
 0x56e   : > { %5321 = vst.msk [vmem:[%s8402_s26 + $0x28] sm:$0xff] %vm452_vm1, %v5289_v49  ;;  %v5186_v58 = vadd.f32 %v8379_v16, %v5150_v26  ;;  %5990 = vmatmul.msk.bf16.gmra.mxu1 %vm452_vm1, %v4985_v15  ;;  %v4986_v49 = vpack.c.bf16 %v4967_v57, %v4966_v12  ;;  %v4396_v26 = vpop.f32.mrf.mxu2  ;;  %v4685_v15 = vadd.f32 %v8420_v32, %v4450_v34 }
 0x56f   : > { %v4686_v32 = vadd.f32 %v8433_v46, %v4451_v7 }
 0x570   : > { %v5218_v14 = vmax.f32 %v5186_v58, 0.0 }
 0x571   : > { %v4920_v57 = vadd.f32 %v8437_v10, %v4686_v32  ;;  %v4453_v10 = vadd.f32 %v8455_v48, %v8228_v6  ;;  %v4454_v6 = vadd.f32 %v8471_v56, %v8236_v28 }
 0x572   : > { %v5254_v4 = vmul.f32 %v8387_v5, %v5218_v14  ;;  %v4919_v14 = vadd.f32 %v8423_v55, %v4685_v15  ;;  %v4452_v55 = vadd.f32 %v8443_v61, %v8217_v24 }
 0x573   : > { %v5081_v36 = vpop.f32.mrf.mxu1 }
 0x574   : > { %v5290_v9 = vadd.f32 %v8395_v43, %v5254_v4  ;;  %v5151_v52 = vadd.f32 %v5081_v36, %v8322_v17 }
 0x576   : > { %5322 = vst.msk [vmem:[%s8402_s26 + $0x30] sm:$0xff] %vm452_vm1, %v5290_v9  ;;  %v5187_v63 = vadd.f32 %v8379_v16, %v5151_v52  ;;  %v8499_v52 = vpop.f32.mrf.mxu0 }
 0x578   : > { %v5219_v20 = vmax.f32 %v5187_v63, 0.0  ;;  %v4398_v63 = vpop.f32.mrf.mxu2 }
 0x57a   : > { %v5255_v35 = vmul.f32 %v8387_v5, %v5219_v20  ;;  %v4969_v20 = vld [vmem:[#allocation3 + $0x1f1] sm:$0xff] }
 0x57b   : > { %v5084_v17 = vpop.f32.mrf.mxu1 }
 0x57c   : > { %v5291_v45 = vadd.f32 %v8395_v43, %v5255_v35  ;;  %v5152_v44 = vadd.f32 %v5084_v17, %v4918_v47  ;;  %v4987_v47 = vpack.c.bf16 %v4969_v20, %v4968_v38  ;;  %v4633_v17 = vpop.f32.mrf.mxu3 }
 0x57e   : > { %5323 = vst.msk [vmem:[%s8402_s26 + $0x38] sm:$0xff] %vm452_vm1, %v5291_v45  ;;  %v5188_v58 = vadd.f32 %v8379_v16, %v5152_v44  ;;  %5991 = vmatmul.msk.bf16.gmra.mxu1 %vm452_vm1, %v4986_v49  ;;  %v4687_v45 = vadd.f32 %v8448_v3, %v4452_v55  ;;  %v4867_v24 = vpop.f32.mrf.mxu0  ;;  %v4455_v55 = vadd.f32 %v4396_v26, %v8248_v11 }
 0x57f   : > { %v4456_v11 = vadd.f32 %v4398_v63, %v8258_v19 }
 0x580   : > { %v5220_v59 = vmax.f32 %v5188_v58, 0.0  ;;  %v4401_v49 = vpop.f32.mrf.mxu2  ;;  %v4921_v58 = vadd.f32 %v8453_v23, %v4687_v45  ;;  %v4972_v45 = vld [vmem:[#allocation3 + $0x229] sm:$0xff] }
 0x582   : > { %v5256_v54 = vmul.f32 %v8387_v5, %v5220_v59 }
 0x583   : > { %v5086_v4 = vpop.f32.mrf.mxu1 }
 0x584   : > { %v5292_v36 = vadd.f32 %v8395_v43, %v5256_v54  ;;  %v5153_v9 = vadd.f32 %v5086_v4, %v4919_v14  ;;  %v4688_v54 = vadd.f32 %v8464_v60, %v4453_v10  ;;  %v4636_v4 = vpop.f32.mrf.mxu3  ;;  %v4689_v60 = vadd.f32 %v8479_v33, %v4454_v6 }
 0x586   : > { %5324 = vst.msk [vmem:[%s8402_s26 + $0x40] sm:$0xff] %vm452_vm1, %v5292_v36  ;;  %v5189_v37 = vadd.f32 %v8379_v16, %v5153_v9  ;;  %v4870_v48 = vpop.f32.mrf.mxu0  ;;  %v4922_v23 = vadd.f32 %v8468_v18, %v4688_v54 }
 0x588   : > { %v5221_v31 = vmax.f32 %v5189_v37, 0.0  ;;  %v4403_v32 = vpop.f32.mrf.mxu2 }
 0x58a   : > { %v5257_v12 = vmul.f32 %v8387_v5, %v5221_v31 }
 0x58b   : > { %v5089_v34 = vpop.f32.mrf.mxu1 }
 0x58c   : > { %v5293_v46 = vadd.f32 %v8395_v43, %v5257_v12  ;;  %v5154_v35 = vadd.f32 %v5089_v34, %v4920_v57  ;;  %v4638_v56 = vpop.f32.mrf.mxu3  ;;  %v4923_v12 = vadd.f32 %v8485_v39, %v4689_v60 }
 0x58e   : > { %5325 = vst.msk [vmem:[%s8402_s26 + $0x48] sm:$0xff] %vm452_vm1, %v5293_v46  ;;  %v5190_v44 = vadd.f32 %v8379_v16, %v5154_v35  ;;  %5992 = vmatmul.msk.bf16.gmra.mxu1 %vm452_vm1, %v4987_v47  ;;  %v4872_v34 = vpop.f32.mrf.mxu0  ;;  %v4690_v47 = vadd.f32 %v4631_v29, %v4455_v55 }
 0x590   : > { %v5222_v61 = vmax.f32 %v5190_v44, 0.0  ;;  %v4406_v35 = vpop.f32.mrf.mxu2  ;;  %v4973_v44 = vld [vmem:[#allocation3 + $0x231] sm:$0xff]  ;;  %v4924_v39 = vadd.f32 %v8499_v52, %v4690_v47 }
 0x591   : > { %v4989_v10 = vpack.c.bf16 %v4973_v44, %v4972_v45  ;;  %v4459_v47 = vadd.f32 %v4406_v35, %v8288_v0 }
 0x592   : > { %v5258_v15 = vmul.f32 %v8387_v5, %v5222_v61 }
 0x593   : > { %v5091_v59 = vpop.f32.mrf.mxu1 }
 0x594   : > { %v5294_v7 = vadd.f32 %v8395_v43, %v5258_v15  ;;  %v5155_v3 = vadd.f32 %v5091_v59, %v4921_v58  ;;  %v4641_v15 = vpop.f32.mrf.mxu3 }
 0x596   : > { %5326 = vst.msk [vmem:[%s8402_s26 + $0x50] sm:$0xff] %vm452_vm1, %v5294_v7  ;;  %v5191_v14 = vadd.f32 %v8379_v16, %v5155_v3  ;;  %v4691_v7 = vadd.f32 %v4633_v17, %v4456_v11  ;;  %v4875_v3 = vpop.f32.mrf.mxu0 }
 0x598   : > { %v5223_v36 = vmax.f32 %v5191_v14, 0.0  ;;  %v4408_v19 = vpop.f32.mrf.mxu2  ;;  %v4457_v14 = vadd.f32 %v4401_v49, %v8269_v41 }
 0x59a   : > { %v5259_v9 = vmul.f32 %v8387_v5, %v5223_v36  ;;  %v4925_v36 = vadd.f32 %v4867_v24, %v4691_v7 }
 0x59b   : > { %v5094_v37 = vpop.f32.mrf.mxu1 }
 0x59c   : > { %v5295_v31 = vadd.f32 %v8395_v43, %v5259_v9  ;;  %v5156_v38 = vadd.f32 %v5094_v37, %v4922_v23  ;;  %v4643_v17 = vpop.f32.mrf.mxu3  ;;  %v4692_v37 = vadd.f32 %v4636_v4, %v4457_v14 }
 0x59e   : > { %5327 = vst.msk [vmem:[%s8402_s26 + $0x58] sm:$0xff] %vm452_vm1, %v5295_v31  ;;  %v5192_v20 = vadd.f32 %v8379_v16, %v5156_v38  ;;  %5993 = vmatmul.msk.bf16.gmra.mxu1 %vm452_vm1, %v8357_v62  ;;  %v4877_v38 = vpop.f32.mrf.mxu0  ;;  %v4926_v49 = vadd.f32 %v4870_v48, %v4692_v37 }
 0x5a0   : > { %v5224_v28 = vmax.f32 %v5192_v20, 0.0  ;;  %v4411_v20 = vpop.f32.mrf.mxu2 }
 0x5a2   : > { %v5260_v18 = vmul.f32 %v8387_v5, %v5224_v28  ;;  %v4458_v28 = vadd.f32 %v4403_v32, %v8277_v42 }
 0x5a3   : > { %v5096_v57 = vpop.f32.mrf.mxu1 }
 0x5a4   : > { %v5296_v46 = vadd.f32 %v8395_v43, %v5260_v18  ;;  %v5157_v33 = vadd.f32 %v5096_v57, %v4923_v12  ;;  %v4693_v12 = vadd.f32 %v4638_v56, %v4458_v28  ;;  %v4646_v57 = vpop.f32.mrf.mxu3 }
 0x5a6   : > { %5328 = vst.msk [vmem:[%s8402_s26 + $0x60] sm:$0xff] %vm452_vm1, %v5296_v46  ;;  %v5193_v62 = vadd.f32 %v8379_v16, %v5157_v33  ;;  %v4880_v33 = vpop.f32.mrf.mxu0  ;;  %v4927_v32 = vadd.f32 %v4872_v34, %v4693_v12 }
 0x5a8   : > { %v5225_v61 = vmax.f32 %v5193_v62, 0.0  ;;  %v4413_v62 = vpop.f32.mrf.mxu2 }
 0x5aa   : > { %v5261_v26 = vmul.f32 %v8387_v5, %v5225_v61  ;;  %v4694_v61 = vadd.f32 %v4641_v15, %v4459_v47 }
 0x5ab   : > { %v5099_v58 = vpop.f32.mrf.mxu1 }
 0x5ac   : > { %v5297_v59 = vadd.f32 %v8395_v43, %v5261_v26  ;;  %v5158_v29 = vadd.f32 %v5099_v58, %v4924_v39  ;;  %v4648_v26 = vpop.f32.mrf.mxu3  ;;  %v4460_v39 = vadd.f32 %v4408_v19, %v8296_v53  ;;  %v4928_v35 = vadd.f32 %v4875_v3, %v4694_v61 }
 0x5ae   : > { %5329 = vst.msk [vmem:[%s8402_s26 + $0x68] sm:$0xff] %vm452_vm1, %v5297_v59  ;;  %v5194_v54 = vadd.f32 %v8379_v16, %v5158_v29  ;;  %5994 = vmatmul.msk.bf16.gmra.mxu1 %vm452_vm1, %v4989_v10  ;;  %v4882_v34 = vpop.f32.mrf.mxu0  ;;  %v4695_v7 = vadd.f32 %v4643_v17, %v4460_v39 }
 0x5b0   : > { %v5226_v63 = vmax.f32 %v5194_v54, 0.0  ;;  %v4416_v29 = vpop.f32.mrf.mxu2  ;;  %v4929_v19 = vadd.f32 %v4877_v38, %v4695_v7 }
 0x5b2   : > { %v5262_v52 = vmul.f32 %v8387_v5, %v5226_v63  ;;  %v4461_v63 = vadd.f32 %v4411_v20, %v8307_v13 }
 0x5b3   : > { %v5101_v6 = vpop.f32.mrf.mxu1 }
 0x5b4   : > { %v5298_v9 = vadd.f32 %v8395_v43, %v5262_v52  ;;  %v5159_v23 = vadd.f32 %v5101_v6, %v4925_v36  ;;  %v4651_v14 = vpop.f32.mrf.mxu3 }
 0x5b6   : > { %5330 = vst.msk [vmem:[%s8402_s26 + $0x70] sm:$0xff] %vm452_vm1, %v5298_v9  ;;  %v5195_v31 = vadd.f32 %v8379_v16, %v5159_v23  ;;  %v4885_v6 = vpop.f32.mrf.mxu0  ;;  %v4696_v9 = vadd.f32 %v4646_v57, %v4461_v63 }
 0x5b8   : > { %v5227_v60 = vmax.f32 %v5195_v31, 0.0  ;;  %v4418_v17 = vpop.f32.mrf.mxu2  ;;  %v4462_v31 = vadd.f32 %v4413_v62, %v8314_v40 }
 0x5ba   : > { %v5263_v41 = vmul.f32 %v8387_v5, %v5227_v60  ;;  %v4930_v60 = vadd.f32 %v4880_v33, %v4696_v9 }
 0x5bb   : > { %v5104_v24 = vpop.f32.mrf.mxu1 }
 0x5bc   : > { %v5299_v55 = vadd.f32 %v8395_v43, %v5263_v41  ;;  %v5160_v18 = vadd.f32 %v5104_v24, %v4926_v49  ;;  %v4653_v41 = vpop.f32.mrf.mxu3  ;;  %v4697_v49 = vadd.f32 %v4648_v26, %v4462_v31 }
 0x5be   : > { %5331 = vst.msk [vmem:[%s8402_s26 + $0x78] sm:$0xff] %vm452_vm1, %v5299_v55  ;;  %v5196_v4 = vadd.f32 %v8379_v16, %v5160_v18  ;;  %v4887_v55 = vpop.f32.mrf.mxu0  ;;  %v4931_v57 = vadd.f32 %v4882_v34, %v4697_v49 }
 0x5c0   : > { %v5228_v46 = vmax.f32 %v5196_v4, 0.0  ;;  %v4421_v12 = vpop.f32.mrf.mxu2  ;;  %v4463_v4 = vadd.f32 %v4416_v29, %v8325_v21 }
 0x5c2   : > { %v5264_v42 = vmul.f32 %v8387_v5, %v5228_v46 }
 0x5c3   : > { %v5106_v48 = vpop.f32.mrf.mxu1 }
 0x5c4   : > { %v5300_v45 = vadd.f32 %v8395_v43, %v5264_v42  ;;  %v5161_v44 = vadd.f32 %v5106_v48, %v4927_v32  ;;  %v4698_v42 = vadd.f32 %v4651_v14, %v4463_v4  ;;  %v4656_v62 = vpop.f32.mrf.mxu3 }
 0x5c6   : > { %5332 = vst.msk [vmem:[%s8402_s26 + $0x80] sm:$0xff] %vm452_vm1, %v5300_v45  ;;  %v5197_v56 = vadd.f32 %v8379_v16, %v5161_v44  ;;  %v4890_v45 = vpop.f32.mrf.mxu0  ;;  %v4464_v44 = vadd.f32 %v4418_v17, %v8329_v27  ;;  %v4932_v61 = vadd.f32 %v4885_v6, %v4698_v42 }
 0x5c8   : > { %v5229_v11 = vmax.f32 %v5197_v56, 0.0  ;;  %v4423_v56 = vpop.f32.mrf.mxu2 }
 0x5ca   : > { %v5265_v0 = vmul.f32 %v8387_v5, %v5229_v11 }
 0x5cb   : > { %v5109_v10 = vpop.f32.mrf.mxu1 }
 0x5cc   : > { %v5301_v58 = vadd.f32 %v8395_v43, %v5265_v0  ;;  %v5162_v59 = vadd.f32 %v5109_v10, %v4928_v35  ;;  %v4699_v0 = vadd.f32 %v4653_v41, %v4464_v44  ;;  %v4658_v34 = vpop.f32.mrf.mxu3 }
 0x5ce   : > { %5333 = vst.msk [vmem:[%s8402_s26 + $0x88] sm:$0xff] %vm452_vm1, %v5301_v58  ;;  %v5198_v15 = vadd.f32 %v8379_v16, %v5162_v59  ;;  %v4465_v58 = vadd.f32 %v4421_v12, %v8337_v8  ;;  %v4933_v59 = vadd.f32 %v4887_v55, %v4699_v0  ;;  %v4892_v7 = vpop.f32.mrf.mxu0 }
 0x5d0   : > { %v5230_v54 = vmax.f32 %v5198_v15, 0.0  ;;  %v4426_v63 = vpop.f32.mrf.mxu2 }
 0x5d2   : > { %v5266_v53 = vmul.f32 %v8387_v5, %v5230_v54 }
 0x5d3   : > { %v5111_v3 = vpop.f32.mrf.mxu1 }
 0x5d4   : > { %v5302_v52 = vadd.f32 %v8395_v43, %v5266_v53  ;;  %v5163_v36 = vadd.f32 %v5111_v3, %v4929_v19  ;;  %v4700_v53 = vadd.f32 %v4656_v62, %v4465_v58  ;;  %v4466_v3 = vadd.f32 %v4423_v56, %v8341_v2 }
 0x5d6   : > { %5334 = vst.msk [vmem:[%s8402_s26 + $0x90] sm:$0xff] %vm452_vm1, %v5302_v52  ;;  %v5199_v23 = vadd.f32 %v8379_v16, %v5163_v36  ;;  %v4934_v52 = vadd.f32 %v4890_v45, %v4700_v53  ;;  %v4661_v36 = vpop.f32.mrf.mxu3  ;;  %v4895_v17 = vpop.f32.mrf.mxu0 }
 0x5d8   : > { %v5231_v37 = vmax.f32 %v5199_v23, 0.0 }
 0x5da   : > { %v5267_v13 = vmul.f32 %v8387_v5, %v5231_v37  ;;  %v4701_v37 = vadd.f32 %v4658_v34, %v4466_v3 }
 0x5db   : > { %v5114_v38 = vpop.f32.mrf.mxu1 }
 0x5dc   : > { %v5303_v20 = vadd.f32 %v8395_v43, %v5267_v13  ;;  %v5164_v28 = vadd.f32 %v5114_v38, %v4930_v60  ;;  %v4428_v13 = vpop.f32.mrf.mxu2  ;;  %v4467_v38 = vadd.f32 %v4426_v63, %v8350_v30 }
 0x5de   : > { %5335 = vst.msk [vmem:[%s8402_s26 + $0x98] sm:$0xff] %vm452_vm1, %v5303_v20  ;;  %v5200_v24 = vadd.f32 %v8379_v16, %v5164_v28  ;;  %v4935_v20 = vadd.f32 %v4892_v7, %v4701_v37  ;;  %v4702_v55 = vadd.f32 %v4661_v36, %v4467_v38  ;;  %v4897_v12 = vpop.f32.mrf.mxu0 }
 0x5e0   : > { %v5232_v18 = vmax.f32 %v5200_v24, 0.0  ;;  %v4663_v24 = vpop.f32.mrf.mxu3 }
 0x5e2   : > { %v5268_v40 = vmul.f32 %v8387_v5, %v5232_v18 }
 0x5e3   : > { %v5116_v46 = vpop.f32.mrf.mxu1 }
 0x5e4   : > { %v5304_v33 = vadd.f32 %v8395_v43, %v5268_v40  ;;  %v5165_v47 = vadd.f32 %v5116_v46, %v4931_v57  ;;  %v4431_v40 = vpop.f32.mrf.mxu2  ;;  %v4468_v57 = vadd.f32 %v4428_v13, %v8354_v25  ;;  %v4936_v46 = vadd.f32 %v4895_v17, %v4702_v55 }
 0x5e6   : > { %5336 = vst.msk [vmem:[%s8402_s26 + $0xa0] sm:$0xff] %vm452_vm1, %v5304_v33  ;;  %v5201_v32 = vadd.f32 %v8379_v16, %v5165_v47  ;;  %v4900_v44 = vpop.f32.mrf.mxu0 }
 0x5e8   : > { %v5233_v48 = vmax.f32 %v5201_v32, 0.0  ;;  %v4703_v32 = vadd.f32 %v4663_v24, %v4468_v57 }
 0x5ea   : > { %v5269_v21 = vmul.f32 %v8387_v5, %v5233_v48  ;;  %v4666_v48 = vpop.f32.mrf.mxu3 }
 0x5eb   : > { %v5119_v11 = vpop.f32.mrf.mxu1 }
 0x5ec   : > { %v5305_v26 = vadd.f32 %v8395_v43, %v5269_v21  ;;  %v5166_v39 = vadd.f32 %v5119_v11, %v4932_v61  ;;  %v4469_v21 = vadd.f32 %v4431_v40, %v8363_v51  ;;  %v4937_v61 = vadd.f32 %v4897_v12, %v4703_v32  ;;  %v4433_v56 = vpop.f32.mrf.mxu2 }
 0x5ed   : > { %v4470_v58 = vadd.f32 %v4433_v56, %v8367_v22 }
 0x5ee   : > { %5337 = vst.msk [vmem:[%s8402_s26 + $0xa8] sm:$0xff] %vm452_vm1, %v5305_v26  ;;  %v5202_v35 = vadd.f32 %v8379_v16, %v5166_v39  ;;  %v4704_v0 = vadd.f32 %v4666_v48, %v4469_v21 }
 0x5f0   : > { %v5234_v10 = vmax.f32 %v5202_v35, 0.0 }
 0x5f2   : > { %v5270_v27 = vmul.f32 %v8387_v5, %v5234_v10  ;;  %v4668_v34 = vpop.f32.mrf.mxu3 }
 0x5f3   : > { %v5121_v29 = vpop.f32.mrf.mxu1  ;;  %v4705_v63 = vadd.f32 %v4668_v34, %v4470_v58 }
 0x5f4   : > { %v5306_v15 = vadd.f32 %v8395_v43, %v5270_v27  ;;  %v5167_v54 = vadd.f32 %v5121_v29, %v4933_v59  ;;  %v4938_v27 = vadd.f32 %v4900_v44, %v4704_v0 }
 0x5f6   : > { %5338 = vst.msk [vmem:[%s8402_s26 + $0xb0] sm:$0xff] %vm452_vm1, %v5306_v15  ;;  %v5203_v19 = vadd.f32 %v8379_v16, %v5167_v54  ;;  %v4902_v15 = vpop.f32.mrf.mxu0  ;;  %v4436_v54 = vpop.f32.mrf.mxu2 }
 0x5f7   : > { %v4471_v3 = vadd.f32 %v4436_v54, %v8370_v1 }
 0x5f8   : > { %v5235_v14 = vmax.f32 %v5203_v19, 0.0 }
 0x5fa   : > { %v5271_v8 = vmul.f32 %v8387_v5, %v5235_v14  ;;  %v4671_v14 = vpop.f32.mrf.mxu3 }
 0x5fb   : > { %v5124_v6 = vpop.f32.mrf.mxu1 }
 0x5fc   : > { %v5307_v9 = vadd.f32 %v8395_v43, %v5271_v8  ;;  %v5168_v23 = vadd.f32 %v5124_v6, %v4934_v52  ;;  %v4939_v8 = vadd.f32 %v4902_v15, %v4705_v63 }
 0x5fe   : > { %5339 = vst.msk [vmem:[%s8402_s26 + $0xb8] sm:$0xff] %vm452_vm1, %v5307_v9  ;;  %v5204_v31 = vadd.f32 %v8379_v16, %v5168_v23  ;;  %v4905_v9 = vpop.f32.mrf.mxu0  ;;  %v4706_v23 = vadd.f32 %v4671_v14, %v4471_v3  ;;  %v4438_v37 = vpop.f32.mrf.mxu2 }
 0x5ff   : > { %v4472_v1 = vadd.f32 %v4438_v37, %v8374_v50 }
 0x600   : > { %v5236_v60 = vmax.f32 %v5204_v31, 0.0  ;;  %v4940_v13 = vadd.f32 %v4905_v9, %v4706_v23 }
 0x602   : > { %v5272_v2 = vmul.f32 %v8387_v5, %v5236_v60  ;;  %v4673_v38 = vpop.f32.mrf.mxu3 }
 0x603   : > { %v5126_v28 = vpop.f32.mrf.mxu1 }
 0x604   : > { %v5308_v41 = vadd.f32 %v8395_v43, %v5272_v2  ;;  %v5169_v49 = vadd.f32 %v5126_v28, %v4935_v20 }
 0x606   : > { %5340 = vst.msk [vmem:[%s8402_s26 + $0xc0] sm:$0xff] %vm452_vm1, %v5308_v41  ;;  %v5205_v18 = vadd.f32 %v8379_v16, %v5169_v49  ;;  %v4707_v41 = vadd.f32 %v4673_v38, %v4472_v1  ;;  %v4907_v24 = vpop.f32.mrf.mxu0 }
 0x608   : > { %v5237_v4 = vmax.f32 %v5205_v18, 0.0  ;;  %v4941_v18 = vadd.f32 %v4907_v24, %v4707_v41 }
 0x60a   : > { %v5273_v30 = vmul.f32 %v8387_v5, %v5237_v4 }
 0x60b   : > { %v5129_v33 = vpop.f32.mrf.mxu1 }
 0x60c   : > { %v5309_v47 = vadd.f32 %v8395_v43, %v5273_v30  ;;  %v5170_v42 = vadd.f32 %v5129_v33, %v4936_v46 }
 0x60e   : > { %5341 = vst.msk [vmem:[%s8402_s26 + $0xc8] sm:$0xff] %vm452_vm1, %v5309_v47  ;;  %v5206_v62 = vadd.f32 %v8379_v16, %v5170_v42 }
 0x610   : > { %v5238_v45 = vmax.f32 %v5206_v62, 0.0 }
 0x612   : > { %v5274_v25 = vmul.f32 %v8387_v5, %v5238_v45 }
 0x613   : > { %v5131_v11 = vpop.f32.mrf.mxu1 }
 0x614   : > { %v5310_v26 = vadd.f32 %v8395_v43, %v5274_v25  ;;  %v5171_v39 = vadd.f32 %v5131_v11, %v4937_v61 }
 0x616   : > { %5342 = vst.msk [vmem:[%s8402_s26 + $0xd0] sm:$0xff] %vm452_vm1, %v5310_v26  ;;  %v5207_v35 = vadd.f32 %v8379_v16, %v5171_v39 }
 0x618   : > { %v5239_v10 = vmax.f32 %v5207_v35, 0.0 }
 0x61a   : > { %v5275_v51 = vmul.f32 %v8387_v5, %v5239_v10 }
 0x61b   : > { %v5134_v59 = vpop.f32.mrf.mxu1 }
 0x61c   : > { %v5311_v29 = vadd.f32 %v8395_v43, %v5275_v51  ;;  %v5172_v7 = vadd.f32 %v5134_v59, %v4938_v27 }
 0x61e   : > { %5343 = vst.msk [vmem:[%s8402_s26 + $0xd8] sm:$0xff] %vm452_vm1, %v5311_v29  ;;  %v5208_v53 = vadd.f32 %v8379_v16, %v5172_v7 }
 0x620   : > { %v5240_v19 = vmax.f32 %v5208_v53, 0.0 }
 0x622   : > { %v5276_v22 = vmul.f32 %v8387_v5, %v5240_v19 }
 0x623   : > { %v5136_v52 = vpop.f32.mrf.mxu1 }
 0x624   : > { %v5312_v36 = vadd.f32 %v8395_v43, %v5276_v22  ;;  %v5173_v6 = vadd.f32 %v5136_v52, %v4939_v8 }
 0x626   : > { %5344 = vst.msk [vmem:[%s8402_s26 + $0xe0] sm:$0xff] %vm452_vm1, %v5312_v36  ;;  %v5209_v17 = vadd.f32 %v8379_v16, %v5173_v6 }
 0x628   : > { %v5241_v31 = vmax.f32 %v5209_v17, 0.0 }
 0x62a   : > { %v5277_v60 = vmul.f32 %v8387_v5, %v5241_v31 }
 0x62b   : > { %v5139_v2 = vpop.f32.mrf.mxu1 }
 0x62c   : > { %v5313_v20 = vadd.f32 %v8395_v43, %v5277_v60  ;;  %v5174_v28 = vadd.f32 %v5139_v2, %v4940_v13 }
 0x62e   : > { %5345 = vst.msk [vmem:[%s8402_s26 + $0xe8] sm:$0xff] %vm452_vm1, %v5313_v20  ;;  %v5210_v49 = vadd.f32 %v8379_v16, %v5174_v28 }
 0x630   : > { %v5242_v55 = vmax.f32 %v5210_v49, 0.0 }
 0x632   : > { %v5278_v50 = vmul.f32 %v8387_v5, %v5242_v55 }
 0x633   : > { %v5141_v12 = vpop.f32.mrf.mxu1 }
 0x634   : > { %v5314_v4 = vadd.f32 %v8395_v43, %v5278_v50  ;;  %v5175_v40 = vadd.f32 %v5141_v12, %v4941_v18 }
 0x636   : > { %5346 = vst.msk [vmem:[%s8402_s26 + $0xf0] sm:$0xff] %vm452_vm1, %v5314_v4  ;;  %v5211_v57 = vadd.f32 %v8379_v16, %v5175_v40 }
 0x638   : > { %v5243_v30 = vmax.f32 %v5211_v57, 0.0 }
 0x63a   : > { %v5279_v46 = vmul.f32 %v8387_v5, %v5243_v30 }
 0x63c   : > { %v5315_v33 = vadd.f32 %v8395_v43, %v5279_v46 }
 0x63e   : > { %5347 = vst.msk [vmem:[%s8402_s26 + $0xf8] sm:$0xff] %vm452_vm1, %v5315_v33 }
 0x63f   : > { %6371 = shalt.err (!%p6368_p3)
}
 0x640   : > { %s6410_s12 = smov 128   ;;  %s6411_s26 = smov 8  }
 0x641   : > { %6212 = dma.vmem_to_hbm [thread:$0]  (%p6505_p5), %s5362_s18, 4096, %s5364_s20, %s5349_s17, %s6410_s12, %s6410_s12, %s6411_s26  }
 0x642 PF: > { %p6218_p4 = scmp.ge.s32.totalorder %s6406_s16, 2  ;;  %s5378_s25 = sand.u32 1, %s6394_s13  }
 0x643   : > { %s5379_s28 = scalar_lea.sflag [#allocation5], %s5378_s25 }
 0x644   : > { %p6215_p7 = pnand %p6218_p4, %p6509_p6 }
 0x646   : > { %p6216_p8 = pneg %p6215_p7 }
 0x648   : > { %6389 = dma.done.wait (%p6216_p8), %s5379_s28, 4096  }
 0x649   : > { %6391 = vsyncadd (%p6216_p8), %s5379_s28, 4294963200  ;;  %p20_p9 = scmp.ge.s32.totalorder %s6492_s19, 4   ;;  %s8782_s13 = smov %s6398_s14 }
 0x64a   : > { %s8783_s14 = smov %s6402_s15  ;;  %s8784_s15 = smov %s6503_s22 }
 0x64b   : > { %s8785_s16 = smov %s6492_s19  ;;  %22 = sbr.rel (!%p20_p9) target bundleno = 3 (0x3), region = 118 }
 0x650   :  { %5385 = vsyncpa [#allocation5], 1 }
 0x651   :  { %5387 = vsyncpa [#allocation5 + $0x1], 1 }

</bundles_post_ra>
